<compile_context>
chip_gen: v6e
topology: v6e:2x2x1
jax: 0.10.0
libtpu: 0.0.40
codegen_flags: <defaults>
</compile_context>

<pallas_src>
import functools
import numpy as np
import jax
import jax.numpy as jnp
from jax import lax
from jax.experimental import pallas as pl
from jax.experimental.pallas import tpu as pltpu


# ----------------------------- helpers -------------------------------------

def _round_up(x, m):
    return (x + m - 1) // m * m


def _pick_tile(m, target=512):
    return target if m >= target else _round_up(m, 8)


def _pad_rows(x, mult):
    m = x.shape[0]
    mp = _round_up(m, mult)
    if mp != m:
        x = jnp.pad(x, [(0, mp - m)] + [(0, 0)] * (x.ndim - 1))
    return x, mp


# ----------------------------- Pallas kernels ------------------------------

def _conv_stats_kernel(nv_ref, xu_ref, w_ref, b_ref, y_ref, stats_ref):
    """Conv1d(k=3) as unfolded matmul + per-tile (masked) sum / sum-of-squares."""
    i = pl.program_id(0)
    tm = y_ref.shape[0]
    y = jnp.dot(xu_ref[...], w_ref[...],
                preferred_element_type=jnp.float32) + b_ref[...]
    y_ref[...] = y
    # mask out the rows added only for M-divisibility padding
    row = i * tm + lax.broadcasted_iota(jnp.int32, (tm, 1), 0)
    msk = (row < nv_ref[0]).astype(jnp.float32)
    ym = y * msk
    stats_ref[0] = jnp.concatenate(
        [jnp.sum(ym, axis=0, keepdims=True),
         jnp.sum(ym * ym, axis=0, keepdims=True)], axis=0)


def _bn_lrelu_proj_kernel(y_ref, sc_ref, sh_ref, w_ref, b_ref, o_ref):
    """BatchNorm affine + leaky_relu(0.01) fused with the (dual-direction) W_ih projection."""
    yn = y_ref[...] * sc_ref[...] + sh_ref[...]
    a = jnp.where(yn >= 0, yn, 0.01 * yn)
    o_ref[...] = jnp.dot(a.astype(w_ref.dtype), w_ref[...],
                         preferred_element_type=jnp.float32) + b_ref[...]


def _matmul_bias_kernel(x_ref, w_ref, b_ref, o_ref):
    o_ref[...] = jnp.dot(x_ref[...].astype(w_ref.dtype), w_ref[...],
                         preferred_element_type=jnp.float32) + b_ref[...]


def _pairmax_proj_kernel(a_ref, b_ref, m_ref, w_ref, bias_ref, o_ref):
    """pBLSTM pair-max pooling fused with the next projection (W_ih or key|value)."""
    pooled = jnp.maximum(a_ref[...], b_ref[...]) * m_ref[...]
    o_ref[...] = jnp.dot(pooled.astype(w_ref.dtype), w_ref[...],
                         preferred_element_type=jnp.float32) + bias_ref[...]


def _bilstm_chunk_kernel(xg_ref, whh_ref, lens_ref, h_ref, h_scr, c_scr):
    """Chunked LSTM recurrence; grid = (direction, time-chunk)."""
    tc = pl.program_id(1)

    @pl.when(tc == 0)
    def _():
        h_scr[...] = jnp.zeros_like(h_scr)
        c_scr[...] = jnp.zeros_like(c_scr)

    Tc = xg_ref.shape[1]
    H = h_scr.shape[-1]
    whh = whh_ref[0]                  # (H, 4H) bf16, resident for the chunk
    lens = lens_ref[...]              # (B, 1) int32, resident
    t0 = tc * Tc

    def step(j, carry):
        gates = xg_ref[0, j] + jnp.dot(h_scr[...].astype(whh.dtype), whh,
                                       preferred_element_type=jnp.float32)
        i_g = jax.nn.sigmoid(gates[:, 0 * H:1 * H])
        f_g = jax.nn.sigmoid(gates[:, 1 * H:2 * H])
        g_g = jnp.tanh(gates[:, 2 * H:3 * H])
        o_g = jax.nn.sigmoid(gates[:, 3 * H:4 * H])
        c_new = f_g * c_scr[...] + i_g * g_g
        h_new = o_g * jnp.tanh(c_new)
        valid = lens > (t0 + j)        # (B, 1) bool, packed-sequence masking
        c_scr[...] = jnp.where(valid, c_new, c_scr[...])
        h_scr[...] = jnp.where(valid, h_new, h_scr[...])
        h_ref[0, j] = jnp.where(valid, h_new, jnp.zeros_like(h_new))
        return carry

    lax.fori_loop(0, Tc, step, 0, unroll=True)


# ----------------------------- kernel wrappers ------------------------------

def conv_stats(xu, w, b, n_valid, tile_m=512):
    M, K = xu.shape
    N = w.shape[1]
    tm = _pick_tile(M, tile_m)
    xu_p, Mp = _pad_rows(xu, tm)
    nt = Mp // tm
    y, stats = pl.pallas_call(
        _conv_stats_kernel,
        out_shape=(jax.ShapeDtypeStruct((Mp, N), jnp.float32),
                   jax.ShapeDtypeStruct((nt, 2, N), jnp.float32)),
        grid_spec=pltpu.PrefetchScalarGridSpec(
            num_scalar_prefetch=1,
            grid=(nt,),
            in_specs=[pl.BlockSpec((tm, K), lambda i, nv: (i, 0)),
                      pl.BlockSpec((K, N), lambda i, nv: (0, 0)),
                      pl.BlockSpec((1, N), lambda i, nv: (0, 0))],
            out_specs=(pl.BlockSpec((tm, N), lambda i, nv: (i, 0)),
                       pl.BlockSpec((1, 2, N), lambda i, nv: (i, 0, 0)))),
        compiler_params=pltpu.CompilerParams(dimension_semantics=("parallel",)),
    )(jnp.asarray([n_valid], jnp.int32), xu_p, w, b.reshape(1, N))
    return y[:M], stats


def bn_lrelu_project(y, scale, shift, w, bias, tile_m=512):
    M, C = y.shape
    N = w.shape[1]
    tm = _pick_tile(M, tile_m)
    y_p, Mp = _pad_rows(y, tm)
    nt = Mp // tm
    out = pl.pallas_call(
        _bn_lrelu_proj_kernel,
        out_shape=jax.ShapeDtypeStruct((Mp, N), jnp.float32),
        grid=(nt,),
        in_specs=[pl.BlockSpec((tm, C), lambda i: (i, 0)),
                  pl.BlockSpec((1, C), lambda i: (0, 0)),
                  pl.BlockSpec((1, C), lambda i: (0, 0)),
                  pl.BlockSpec((C, N), lambda i: (0, 0)),
                  pl.BlockSpec((1, N), lambda i: (0, 0))],
        out_specs=pl.BlockSpec((tm, N), lambda i: (i, 0)),
        compiler_params=pltpu.CompilerParams(dimension_semantics=("parallel",)),
    )(y_p, scale.reshape(1, C), shift.reshape(1, C), w, bias.reshape(1, N))
    return out[:M]


def matmul_bias(x, w, bias, tile_m=512):
    M, K = x.shape
    N = w.shape[1]
    tm = _pick_tile(M, tile_m)
    x_p, Mp = _pad_rows(x, tm)
    nt = Mp // tm
    out = pl.pallas_call(
        _matmul_bias_kernel,
        out_shape=jax.ShapeDtypeStruct((Mp, N), jnp.float32),
        grid=(nt,),
        in_specs=[pl.BlockSpec((tm, K), lambda i: (i, 0)),
                  pl.BlockSpec((K, N), lambda i: (0, 0)),
                  pl.BlockSpec((1, N), lambda i: (0, 0))],
        out_specs=pl.BlockSpec((tm, N), lambda i: (i, 0)),
        compiler_params=pltpu.CompilerParams(dimension_semantics=("parallel",)),
    )(x_p, w, bias.reshape(1, N))
    return out[:M]


def pairmax_project(a, b, mask, w, bias, tile_m=512):
    M, D = a.shape
    N = w.shape[1]
    tm = _pick_tile(M, tile_m)
    a_p, Mp = _pad_rows(a, tm)
    b_p, _ = _pad_rows(b, tm)
    m_p, _ = _pad_rows(mask, tm)
    nt = Mp // tm
    out = pl.pallas_call(
        _pairmax_proj_kernel,
        out_shape=jax.ShapeDtypeStruct((Mp, N), jnp.float32),
        grid=(nt,),
        in_specs=[pl.BlockSpec((tm, D), lambda i: (i, 0)),
                  pl.BlockSpec((tm, D), lambda i: (i, 0)),
                  pl.BlockSpec((tm, 1), lambda i: (i, 0)),
                  pl.BlockSpec((D, N), lambda i: (0, 0)),
                  pl.BlockSpec((1, N), lambda i: (0, 0))],
        out_specs=pl.BlockSpec((tm, N), lambda i: (i, 0)),
        compiler_params=pltpu.CompilerParams(dimension_semantics=("parallel",)),
    )(a_p, b_p, m_p, w, bias.reshape(1, N))
    return out[:M]


def _lstm_recurrence(xg_dir, whh, lens_col, Tc):
    # xg_dir: (2, Tp, B, 4H) f32, whh: (2, H, 4H) bf16, lens_col: (B, 1) int32
    _, Tp, B, G = xg_dir.shape
    H = G // 4
    nc = Tp // Tc
    return pl.pallas_call(
        _bilstm_chunk_kernel,
        out_shape=jax.ShapeDtypeStruct((2, Tp, B, H), jnp.float32),
        grid=(2, nc),
        in_specs=[pl.BlockSpec((1, Tc, B, G), lambda d, t: (d, t, 0, 0)),
                  pl.BlockSpec((1, H, G), lambda d, t: (d, 0, 0)),
                  pl.BlockSpec((B, 1), lambda d, t: (0, 0))],
        out_specs=pl.BlockSpec((1, Tc, B, H), lambda d, t: (d, t, 0, 0)),
        scratch_shapes=[pltpu.VMEM((B, H), jnp.float32),
                        pltpu.VMEM((B, H), jnp.float32)],
        compiler_params=pltpu.CompilerParams(
            dimension_semantics=("parallel", "arbitrary")),
    )(xg_dir, whh, lens_col)


# ----------------------------- model pieces --------------------------------

def _bilstm_from_xg(xg_flat, lens, B, T, H, whh, Tc=8):
    """Bidirectional LSTM given the precomputed (both-direction) input gates."""
    xg = xg_flat.reshape(B, T, 8 * H)
    t_idx = jnp.arange(T, dtype=jnp.int32)
    rev_idx = jnp.clip(lens[:, None] - 1 - t_idx[None, :], 0, T - 1)       # (B, T)
    xg_f = xg[..., :4 * H]
    xg_b = jnp.take_along_axis(xg[..., 4 * H:], rev_idx[:, :, None], axis=1)
    xg_dir = jnp.stack([xg_f, xg_b], axis=0).transpose(0, 2, 1, 3)         # (2,T,B,4H)
    Tp = _round_up(T, Tc)
    if Tp != T:
        xg_dir = jnp.pad(xg_dir, ((0, 0), (0, Tp - T), (0, 0), (0, 0)))
    lens_col = lens.astype(jnp.int32).reshape(B, 1)
    h = _lstm_recurrence(xg_dir, whh, lens_col, Tc)                        # (2,Tp,B,H)
    h = h[:, :T]
    h_f = jnp.transpose(h[0], (1, 0, 2))                                   # (B,T,H)
    h_b = jnp.transpose(h[1], (1, 0, 2))
    mask = (t_idx[None, :] < lens[:, None]).astype(h_f.dtype)[:, :, None]
    out_b = jnp.take_along_axis(h_b, rev_idx[:, :, None], axis=1) * mask
    return jnp.concatenate([h_f, out_b], axis=-1)                          # (B,T,2H)


def _pool_project(out, lens, w, bias):
    """pBLSTM pair-max pooling fused (inside the kernel) with the next projection."""
    B, T, Dh = out.shape
    if T % 2 != 0:
        out = out[:, :T - 1]
        T -= 1
    T2 = T // 2
    new_lens = lens // 2
    pairs = out.reshape(B, T2, 2, Dh)
    a = pairs[:, :, 0, :].reshape(B * T2, Dh)
    b = pairs[:, :, 1, :].reshape(B * T2, Dh)
    msk = (jnp.arange(T2, dtype=jnp.int32)[None, :] < new_lens[:, None])
    msk = msk.astype(jnp.float32).reshape(B * T2, 1)
    proj = pairmax_project(a, b, msk, w, bias)
    return proj, new_lens, T2


@functools.partial(jax.jit, static_argnums=(3,))
def _encoder_core(x, lens, params, Tm):
    B, T, Cin = x.shape
    H = params['whh0'].shape[1]
    Cout = params['conv_b'].shape[0]

    # Conv1d(40->128, k=3, pad=1) as an unfolded matmul; K padded 120 -> 128.
    # TODO(synk): replace the k=3 unfold with in-kernel shifted matmuls to cut
    # conv input HBM traffic ~3x (the unfold triples reads of x).
    xp = jnp.pad(x, ((0, 0), (1, 1), (0, 0)))
    xu = jnp.concatenate([xp[:, 0:T], xp[:, 1:T + 1], xp[:, 2:T + 2]], axis=-1)
    Kc = params['conv_w'].shape[0]
    xu = jnp.pad(xu, ((0, 0), (0, 0), (0, Kc - 3 * Cin)))
    xu = xu.reshape(B * T, Kc).astype(jnp.bfloat16)

    y, stats = conv_stats(xu, params['conv_w'], params['conv_b'], B * T)

    # BatchNorm1d training-mode statistics over all B*T frames (padding included,
    # matching the reference which applies conv+BN before pack_padded_sequence).
    cnt = jnp.float32(B * T)
    mean = jnp.sum(stats[:, 0, :], axis=0) / cnt
    var = jnp.sum(stats[:, 1, :], axis=0) / cnt - mean * mean
    inv = lax.rsqrt(var + 1e-5)
    scale = params['bn_gamma'] * inv
    shift = params['bn_beta'] - mean * scale

    # pad_packed crop to max(lens); fused BN affine + leaky_relu + W_ih projection.
    y = y.reshape(B, T, Cout)[:, :Tm].reshape(B * Tm, Cout)
    xg0 = bn_lrelu_project(y, scale, shift, params['wih0'], params['b0'])

    out = _bilstm_from_xg(xg0, lens, B, Tm, H, params['whh0'])        # encoder.lstm
    Tcur, lens_cur = Tm, lens

    xg1 = matmul_bias(out.reshape(B * Tcur, 2 * H), params['wih1'], params['b1'])
    out = _bilstm_from_xg(xg1, lens_cur, B, Tcur, H, params['whh1'])  # pblstm1.blstm

    xg2, lens_cur, Tcur = _pool_project(out, lens_cur, params['wih2'], params['b2'])
    out = _bilstm_from_xg(xg2, lens_cur, B, Tcur, H, params['whh2'])  # pblstm2.blstm

    xg3, lens_cur, Tcur = _pool_project(out, lens_cur, params['wih3'], params['b3'])
    out = _bilstm_from_xg(xg3, lens_cur, B, Tcur, H, params['whh3'])  # pblstm3.blstm

    kv, lens_cur, Tf = _pool_project(out, lens_cur, params['kv_w'], params['kv_b'])
    V = params['kv_b'].shape[0] // 2
    kv = kv.reshape(B, Tf, 2 * V)
    return kv[..., :V], kv[..., V:]


def encoder_forward(x, lens, params):
    """x: (B, T, 40) channels-last; lens: host int array. Returns (keys, values)."""
    lens_np = np.asarray(lens)
    Tm = int(lens_np.max())                       # static per bucket; rest is jitted
    return _encoder_core(x, jnp.asarray(lens_np, dtype=jnp.int32), params, Tm)


# ----------------------------- parameter init -------------------------------

def init_params(key, hidden_size=32, value_size=256, key_size=256,
                conv_in=40, conv_out=128):
    ks = iter(jax.random.split(key, 64))

    def unif(k, shape, bound):
        return jax.random.uniform(k, shape, jnp.float32, -bound, bound)

    H = hidden_size

    def lstm_params(input_dim):
        kb = 1.0 / np.sqrt(H)
        wih, whh, bias = [], [], []
        for _ in range(2):                                   # fwd, bwd directions
            w_ih = unif(next(ks), (4 * H, input_dim), kb)    # PyTorch weight_ih
            w_hh = unif(next(ks), (4 * H, H), kb)            # PyTorch weight_hh
            b_ih = unif(next(ks), (4 * H,), kb)
            b_hh = unif(next(ks), (4 * H,), kb)
            wih.append(w_ih.T)                               # (D, 4H)
            whh.append(w_hh.T)                               # (H, 4H)
            bias.append(b_ih + b_hh)
        return (jnp.concatenate(wih, axis=1).astype(jnp.bfloat16),   # (D, 8H)
                jnp.stack(whh, axis=0).astype(jnp.bfloat16),         # (2, H, 4H)
                jnp.concatenate(bias, axis=0))                       # (8H,)

    cb = 1.0 / np.sqrt(conv_in * 3)
    conv_w = unif(next(ks), (conv_out, conv_in, 3), cb)      # PyTorch Conv1d weight
    conv_b = unif(next(ks), (conv_out,), cb)
    # unfolded layout: feature index = tap*Cin + channel, padded to 128 lanes
    w_unf = jnp.transpose(conv_w, (2, 1, 0)).reshape(3 * conv_in, conv_out)
    Kc = _round_up(3 * conv_in, 128)
    w_unf = jnp.pad(w_unf, ((0, Kc - 3 * conv_in), (0, 0)))

    lb = 1.0 / np.sqrt(2 * H)
    key_w = unif(next(ks), (2 * H, value_size), lb)
    key_b = unif(next(ks), (value_size,), lb)
    val_w = unif(next(ks), (2 * H, key_size), lb)
    val_b = unif(next(ks), (key_size,), lb)

    params = {
        'conv_w': w_unf.astype(jnp.bfloat16),
        'conv_b': conv_b,
        'bn_gamma': jnp.ones((conv_out,), jnp.float32),
        'bn_beta': jnp.zeros((conv_out,), jnp.float32),
        'kv_w': jnp.concatenate([key_w, val_w], axis=1).astype(jnp.bfloat16),
        'kv_b': jnp.concatenate([key_b, val_b], axis=0),
    }
    for l, D in enumerate([conv_out, 2 * H, 2 * H, 2 * H]):
        wih, whh, b = lstm_params(D)
        params[f'wih{l}'] = wih
        params[f'whh{l}'] = whh
        params[f'b{l}'] = b
    return params


# --------------------------------- main -------------------------------------

if __name__ == "__main__":
    key = jax.random.PRNGKey(0)
    pkey, xkey = jax.random.split(key)

    B, T, F = 2, 16, 40          # conv is hard-coded to 40 input channels
    hidden_size = 32
    lens = np.array([16, 12], dtype=np.int32)

    x = jax.random.normal(xkey, (B, T, F), jnp.float32)
    # zero-pad positions beyond lens, as a padded utterance batch would be
    tmask = (np.arange(T)[None, :] < lens[:, None]).astype(np.float32)
    x = x * jnp.asarray(tmask)[:, :, None]

    params = init_params(pkey, hidden_size=hidden_size)
    keys_out, values_out = encoder_forward(x, lens, params)
    jax.block_until_ready((keys_out, values_out))

    # after 3 pyramidal halvings: T_final = max(lens) / 8 = 2
    assert keys_out.shape == (B, 2, 256), keys_out.shape
    assert values_out.shape == (B, 2, 256), values_out.shape
    assert bool(jnp.all(jnp.isfinite(keys_out)))
    assert bool(jnp.all(jnp.isfinite(values_out)))
    print("KERNEL_OK")
</pallas_src>

<mosaic_0001>
module attributes {stable_mosaic.version = 11 : i64} {
  func.func @_conv_stats_kernel(%arg0: i32, %arg1: memref<1xi32, #tpu.memory_space<smem>>, %arg2: memref<32x128xbf16, #tpu.memory_space<vmem>>, %arg3: memref<128x128xbf16, #tpu.memory_space<vmem>>, %arg4: memref<1x128xf32, #tpu.memory_space<vmem>>, %arg5: memref<32x128xf32, #tpu.memory_space<vmem>>, %arg6: memref<1x2x128xf32, #tpu.memory_space<vmem>>) attributes {dimension_semantics = [#tpu.dimension_semantics<parallel>], iteration_bounds = array<i64: 1>, scalar_prefetch = 1 : i64, scratch_operands = 0 : i64, tpu.core_type = #tpu.core_type<tc>, window_params = [{transform_indices = @transform_0, window_bounds = array<i64: 32, 128>}, {pipeline_mode = #tpu.pipeline_mode<synchronous>, transform_indices = @transform_1, window_bounds = array<i64: 128, 128>}, {pipeline_mode = #tpu.pipeline_mode<synchronous>, transform_indices = @transform_2, window_bounds = array<i64: 1, 128>}, {transform_indices = @transform_3, window_bounds = array<i64: 32, 128>}, {transform_indices = @transform_4, window_bounds = array<i64: 1, 2, 128>}]} {
    %c0 = arith.constant 0 : index
    %c0_0 = arith.constant 0 : index
    %0 = vector.load %arg2[%c0, %c0_0] : memref<32x128xbf16, #tpu.memory_space<vmem>>, vector<32x128xbf16>
    %c0_1 = arith.constant 0 : index
    %c0_2 = arith.constant 0 : index
    %1 = vector.load %arg3[%c0_1, %c0_2] : memref<128x128xbf16, #tpu.memory_space<vmem>>, vector<128x128xbf16>
    %cst = arith.constant dense<0.000000e+00> : vector<32x128xf32>
    %2 = tpu.matmul %0, %1, %cst {dimension_numbers = #tpu.dot_dimension_numbers<[1], [0], [0], [1], [0, 0, 1, 1], [], []>} : vector<32x128xbf16>, vector<128x128xbf16>, vector<32x128xf32> -> vector<32x128xf32>
    %c0_3 = arith.constant 0 : index
    %c0_4 = arith.constant 0 : index
    %3 = vector.load %arg4[%c0_3, %c0_4] : memref<1x128xf32, #tpu.memory_space<vmem>>, vector<1x128xf32>
    %4 = vector.broadcast %3 : vector<1x128xf32> to vector<32x128xf32>
    %5 = arith.addf %2, %4 : vector<32x128xf32>
    %c0_5 = arith.constant 0 : index
    %c0_6 = arith.constant 0 : index
    %6 = vector.load %arg5[%c0_5, %c0_6] : memref<32x128xf32, #tpu.memory_space<vmem>>, vector<32x128xf32>
    tpu.vector_store %arg5[%c0_5, %c0_6], %5 {strides = array<i32>} : memref<32x128xf32, #tpu.memory_space<vmem>>, vector<32x128xf32>,
    %c32_i32 = arith.constant 32 : i32
    %7 = arith.muli %arg0, %c32_i32 : i32
    %8 = tpu.iota {dimensions = array<i32: 0>} : vector<32x1xi32>
    %9 = vector.broadcast %7 : i32 to vector<32x1xi32>
    %10 = arith.addi %9, %8 : vector<32x1xi32>
    %c0_7 = arith.constant 0 : index
    %11 = memref.load %arg1[%c0_7] : memref<1xi32, #tpu.memory_space<smem>>
    %12 = vector.broadcast %11 : i32 to vector<32x1xi32>
    %13 = arith.cmpi slt, %10, %12 : vector<32x1xi32>
    %14 = arith.extui %13 : vector<32x1xi1> to vector<32x1xi32>
    %15 = arith.sitofp %14 : vector<32x1xi32> to vector<32x1xf32>
    %16 = vector.broadcast %15 : vector<32x1xf32> to vector<32x128xf32>
    %17 = arith.mulf %5, %16 : vector<32x128xf32>
    %cst_8 = arith.constant dense<0.000000e+00> : vector<128xf32>
    %18 = vector.multi_reduction <add>, %17, %cst_8 [0] : vector<32x128xf32> to vector<128xf32>
    %19 = vector.shape_cast %18 : vector<128xf32> to vector<1x128xf32>
    %20 = arith.mulf %17, %17 : vector<32x128xf32>
    %cst_9 = arith.constant dense<0.000000e+00> : vector<128xf32>
    %21 = vector.multi_reduction <add>, %20, %cst_9 [0] : vector<32x128xf32> to vector<128xf32>
    %22 = vector.shape_cast %21 : vector<128xf32> to vector<1x128xf32>
    %23 = tpu.concatenate %19, %22 in 0 : vector<1x128xf32>, vector<1x128xf32> -> vector<2x128xf32>
    %c0_10 = arith.constant 0 : index
    %c0_11 = arith.constant 0 : index
    %c0_12 = arith.constant 0 : index
    %24 = vector.load %arg6[%c0_10, %c0_11, %c0_12] : memref<1x2x128xf32, #tpu.memory_space<vmem>>, vector<1x2x128xf32>
    %25 = vector.shape_cast %24 : vector<1x2x128xf32> to vector<2x128xf32>
    %26 = vector.shape_cast %23 : vector<2x128xf32> to vector<1x2x128xf32>
    tpu.vector_store %arg6[%c0_10, %c0_11, %c0_12], %26 {strides = array<i32>} : memref<1x2x128xf32, #tpu.memory_space<vmem>>, vector<1x2x128xf32>,
    return
  }
  func.func @transform_0(%arg0: i32, %arg1: memref<1xi32, #tpu.memory_space<smem>>) -> (i32, i32) {
    %c0_i32 = arith.constant 0 : i32
    %c0_i32_0 = arith.constant 0 : i32
    return %arg0, %c0_i32 : i32, i32
  }
  func.func @transform_1(%arg0: i32, %arg1: memref<1xi32, #tpu.memory_space<smem>>) -> (i32, i32) {
    %c0_i32 = arith.constant 0 : i32
    %c0_i32_0 = arith.constant 0 : i32
    %c0_i32_1 = arith.constant 0 : i32
    return %c0_i32, %c0_i32_0 : i32, i32
  }
  func.func @transform_2(%arg0: i32, %arg1: memref<1xi32, #tpu.memory_space<smem>>) -> (i32, i32) {
    %c0_i32 = arith.constant 0 : i32
    %c0_i32_0 = arith.constant 0 : i32
    %c0_i32_1 = arith.constant 0 : i32
    return %c0_i32, %c0_i32_0 : i32, i32
  }
  func.func @transform_3(%arg0: i32, %arg1: memref<1xi32, #tpu.memory_space<smem>>) -> (i32, i32) {
    %c0_i32 = arith.constant 0 : i32
    %c0_i32_0 = arith.constant 0 : i32
    return %arg0, %c0_i32 : i32, i32
  }
  func.func @transform_4(%arg0: i32, %arg1: memref<1xi32, #tpu.memory_space<smem>>) -> (i32, i32, i32) {
    %c0_i32 = arith.constant 0 : i32
    %c0_i32_0 = arith.constant 0 : i32
    %c0_i32_1 = arith.constant 0 : i32
    return %arg0, %c0_i32, %c0_i32_0 : i32, i32, i32
  }
}

module attributes {stable_mosaic.version = 11 : i64} {
  func.func @_bn_lrelu_proj_kernel(%arg0: i32, %arg1: memref<32x128xf32, #tpu.memory_space<vmem>>, %arg2: memref<1x128xf32, #tpu.memory_space<vmem>>, %arg3: memref<1x128xf32, #tpu.memory_space<vmem>>, %arg4: memref<128x256xbf16, #tpu.memory_space<vmem>>, %arg5: memref<1x256xf32, #tpu.memory_space<vmem>>, %arg6: memref<32x256xf32, #tpu.memory_space<vmem>>) attributes {dimension_semantics = [#tpu.dimension_semantics<parallel>], iteration_bounds = array<i64: 1>, scalar_prefetch = 0 : i64, scratch_operands = 0 : i64, tpu.core_type = #tpu.core_type<tc>, window_params = [{transform_indices = @transform_0, window_bounds = array<i64: 32, 128>}, {pipeline_mode = #tpu.pipeline_mode<synchronous>, transform_indices = @transform_1, window_bounds = array<i64: 1, 128>}, {pipeline_mode = #tpu.pipeline_mode<synchronous>, transform_indices = @transform_2, window_bounds = array<i64: 1, 128>}, {pipeline_mode = #tpu.pipeline_mode<synchronous>, transform_indices = @transform_3, window_bounds = array<i64: 128, 256>}, {pipeline_mode = #tpu.pipeline_mode<synchronous>, transform_indices = @transform_4, window_bounds = array<i64: 1, 256>}, {transform_indices = @transform_5, window_bounds = array<i64: 32, 256>}]} {
    %c0 = arith.constant 0 : index
    %c0_0 = arith.constant 0 : index
    %0 = vector.load %arg1[%c0, %c0_0] : memref<32x128xf32, #tpu.memory_space<vmem>>, vector<32x128xf32>
    %c0_1 = arith.constant 0 : index
    %c0_2 = arith.constant 0 : index
    %1 = vector.load %arg2[%c0_1, %c0_2] : memref<1x128xf32, #tpu.memory_space<vmem>>, vector<1x128xf32>
    %2 = vector.broadcast %1 : vector<1x128xf32> to vector<32x128xf32>
    %3 = arith.mulf %0, %2 : vector<32x128xf32>
    %c0_3 = arith.constant 0 : index
    %c0_4 = arith.constant 0 : index
    %4 = vector.load %arg3[%c0_3, %c0_4] : memref<1x128xf32, #tpu.memory_space<vmem>>, vector<1x128xf32>
    %5 = vector.broadcast %4 : vector<1x128xf32> to vector<32x128xf32>
    %6 = arith.addf %3, %5 : vector<32x128xf32>
    %cst = arith.constant 0.000000e+00 : f32
    %7 = vector.broadcast %cst : f32 to vector<32x128xf32>
    %8 = arith.cmpf oge, %6, %7 : vector<32x128xf32>
    %cst_5 = arith.constant 0.00999999977 : f32
    %9 = vector.broadcast %cst_5 : f32 to vector<32x128xf32>
    %10 = arith.mulf %9, %6 : vector<32x128xf32>
    %11 = arith.select %8, %6, %10 : vector<32x128xi1>, vector<32x128xf32>
    %12 = arith.truncf %11 : vector<32x128xf32> to vector<32x128xbf16>
    %c0_6 = arith.constant 0 : index
    %c0_7 = arith.constant 0 : index
    %13 = vector.load %arg4[%c0_6, %c0_7] : memref<128x256xbf16, #tpu.memory_space<vmem>>, vector<128x256xbf16>
    %cst_8 = arith.constant dense<0.000000e+00> : vector<32x256xf32>
    %14 = tpu.matmul %12, %13, %cst_8 {dimension_numbers = #tpu.dot_dimension_numbers<[1], [0], [0], [1], [0, 0, 1, 1], [], []>} : vector<32x128xbf16>, vector<128x256xbf16>, vector<32x256xf32> -> vector<32x256xf32>
    %c0_9 = arith.constant 0 : index
    %c0_10 = arith.constant 0 : index
    %15 = vector.load %arg5[%c0_9, %c0_10] : memref<1x256xf32, #tpu.memory_space<vmem>>, vector<1x256xf32>
    %16 = vector.broadcast %15 : vector<1x256xf32> to vector<32x256xf32>
    %17 = arith.addf %14, %16 : vector<32x256xf32>
    %c0_11 = arith.constant 0 : index
    %c0_12 = arith.constant 0 : index
    %18 = vector.load %arg6[%c0_11, %c0_12] : memref<32x256xf32, #tpu.memory_space<vmem>>, vector<32x256xf32>
    tpu.vector_store %arg6[%c0_11, %c0_12], %17 {strides = array<i32>} : memref<32x256xf32, #tpu.memory_space<vmem>>, vector<32x256xf32>,
    return
  }
  func.func @transform_0(%arg0: i32) -> (i32, i32) {
    %c0_i32 = arith.constant 0 : i32
    %c0_i32_0 = arith.constant 0 : i32
    return %arg0, %c0_i32 : i32, i32
  }
  func.func @transform_1(%arg0: i32) -> (i32, i32) {
    %c0_i32 = arith.constant 0 : i32
    %c0_i32_0 = arith.constant 0 : i32
    %c0_i32_1 = arith.constant 0 : i32
    return %c0_i32, %c0_i32_0 : i32, i32
  }
  func.func @transform_2(%arg0: i32) -> (i32, i32) {
    %c0_i32 = arith.constant 0 : i32
    %c0_i32_0 = arith.constant 0 : i32
    %c0_i32_1 = arith.constant 0 : i32
    return %c0_i32, %c0_i32_0 : i32, i32
  }
  func.func @transform_3(%arg0: i32) -> (i32, i32) {
    %c0_i32 = arith.constant 0 : i32
    %c0_i32_0 = arith.constant 0 : i32
    %c0_i32_1 = arith.constant 0 : i32
    return %c0_i32, %c0_i32_0 : i32, i32
  }
  func.func @transform_4(%arg0: i32) -> (i32, i32) {
    %c0_i32 = arith.constant 0 : i32
    %c0_i32_0 = arith.constant 0 : i32
    %c0_i32_1 = arith.constant 0 : i32
    return %c0_i32, %c0_i32_0 : i32, i32
  }
  func.func @transform_5(%arg0: i32) -> (i32, i32) {
    %c0_i32 = arith.constant 0 : i32
    %c0_i32_0 = arith.constant 0 : i32
    return %arg0, %c0_i32 : i32, i32
  }
}

module attributes {stable_mosaic.version = 11 : i64} {
  func.func @_bilstm_chunk_kernel(%arg0: i32, %arg1: i32, %arg2: memref<1x8x2x128xf32, #tpu.memory_space<vmem>>, %arg3: memref<1x32x128xbf16, #tpu.memory_space<vmem>>, %arg4: memref<2x1xi32, #tpu.memory_space<vmem>>, %arg5: memref<1x8x2x32xf32, #tpu.memory_space<vmem>>, %arg6: memref<2x32xf32, #tpu.memory_space<vmem>>, %arg7: memref<2x32xf32, #tpu.memory_space<vmem>>) attributes {dimension_semantics = [#tpu.dimension_semantics<parallel>, #tpu.dimension_semantics<arbitrary>], iteration_bounds = array<i64: 2, 2>, scalar_prefetch = 0 : i64, scratch_operands = 2 : i64, tpu.core_type = #tpu.core_type<tc>, window_params = [{transform_indices = @transform_0, window_bounds = array<i64: 1, 8, 2, 128>}, {transform_indices = @transform_1, window_bounds = array<i64: 1, 32, 128>}, {pipeline_mode = #tpu.pipeline_mode<synchronous>, transform_indices = @transform_2, window_bounds = array<i64: 2, 1>}, {transform_indices = @transform_3, window_bounds = array<i64: 1, 8, 2, 32>}]} {
    %c0_i32 = arith.constant 0 : i32
    %0 = arith.cmpi eq, %arg1, %c0_i32 : i32
    %1 = arith.extui %0 : i1 to i32
    %c0_i32_0 = arith.constant 0 : i32
    %2 = arith.cmpi ne, %1, %c0_i32_0 : i32
    scf.if %2 {
      %cst_190 = arith.constant 0.000000e+00 : f32
      %439 = vector.broadcast %cst_190 : f32 to vector<2x32xf32>
      %c0_191 = arith.constant 0 : index
      %c0_192 = arith.constant 0 : index
      %440 = vector.load %arg6[%c0_191, %c0_192] : memref<2x32xf32, #tpu.memory_space<vmem>>, vector<2x32xf32>
      tpu.vector_store %arg6[%c0_191, %c0_192], %439 {strides = array<i32>} : memref<2x32xf32, #tpu.memory_space<vmem>>, vector<2x32xf32>,
      %cst_193 = arith.constant 0.000000e+00 : f32
      %441 = vector.broadcast %cst_193 : f32 to vector<2x32xf32>
      %c0_194 = arith.constant 0 : index
      %c0_195 = arith.constant 0 : index
      %442 = vector.load %arg7[%c0_194, %c0_195] : memref<2x32xf32, #tpu.memory_space<vmem>>, vector<2x32xf32>
      tpu.vector_store %arg7[%c0_194, %c0_195], %441 {strides = array<i32>} : memref<2x32xf32, #tpu.memory_space<vmem>>, vector<2x32xf32>,
    } else {
    }
    %c0 = arith.constant 0 : index
    %c0_1 = arith.constant 0 : index
    %c0_2 = arith.constant 0 : index
    %3 = vector.load %arg3[%c0, %c0_1, %c0_2] : memref<1x32x128xbf16, #tpu.memory_space<vmem>>, vector<1x32x128xbf16>
    %4 = vector.shape_cast %3 : vector<1x32x128xbf16> to vector<32x128xbf16>
    %c0_3 = arith.constant 0 : index
    %c0_4 = arith.constant 0 : index
    %5 = vector.load %arg4[%c0_3, %c0_4] : memref<2x1xi32, #tpu.memory_space<vmem>>, vector<2x1xi32>
    %c8_i32 = arith.constant 8 : i32
    %6 = arith.muli %arg1, %c8_i32 : i32
    %c0_i32_5 = arith.constant 0 : i32
    %c0_6 = arith.constant 0 : index
    %7 = arith.index_cast %c0_i32_5 : i32 to index
    %c0_7 = arith.constant 0 : index
    %c0_8 = arith.constant 0 : index
    %8 = vector.load %arg2[%c0_6, %7, %c0_7, %c0_8] : memref<1x8x2x128xf32, #tpu.memory_space<vmem>>, vector<1x1x2x128xf32>
    %9 = vector.shape_cast %8 : vector<1x1x2x128xf32> to vector<2x128xf32>
    %c0_9 = arith.constant 0 : index
    %c0_10 = arith.constant 0 : index
    %10 = vector.load %arg6[%c0_9, %c0_10] : memref<2x32xf32, #tpu.memory_space<vmem>>, vector<2x32xf32>
    %11 = arith.truncf %10 : vector<2x32xf32> to vector<2x32xbf16>
    %cst = arith.constant dense<0.000000e+00> : vector<2x128xf32>
    %12 = tpu.matmul %11, %4, %cst {dimension_numbers = #tpu.dot_dimension_numbers<[1], [0], [0], [1], [0, 0, 1, 1], [], []>} : vector<2x32xbf16>, vector<32x128xbf16>, vector<2x128xf32> -> vector<2x128xf32>
    %13 = arith.addf %9, %12 : vector<2x128xf32>
    %14 = vector.extract_strided_slice %13 {offsets = [0, 0], sizes = [2, 32], strides = [1, 1]} : vector<2x128xf32> to vector<2x32xf32>
    %15 = arith.negf %14 : vector<2x32xf32>
    %16 = math.exp %15 : vector<2x32xf32>
    %cst_11 = arith.constant 1.000000e+00 : f32
    %17 = vector.broadcast %cst_11 : f32 to vector<2x32xf32>
    %18 = arith.addf %17, %16 : vector<2x32xf32>
    %19 = arith.divf %17, %18 : vector<2x32xf32>
    %20 = vector.extract_strided_slice %13 {offsets = [0, 32], sizes = [2, 32], strides = [1, 1]} : vector<2x128xf32> to vector<2x32xf32>
    %21 = arith.negf %20 : vector<2x32xf32>
    %22 = math.exp %21 : vector<2x32xf32>
    %cst_12 = arith.constant 1.000000e+00 : f32
    %23 = vector.broadcast %cst_12 : f32 to vector<2x32xf32>
    %24 = arith.addf %23, %22 : vector<2x32xf32>
    %25 = arith.divf %23, %24 : vector<2x32xf32>
    %26 = vector.extract_strided_slice %13 {offsets = [0, 64], sizes = [2, 32], strides = [1, 1]} : vector<2x128xf32> to vector<2x32xf32>
    %27 = math.tanh %26 : vector<2x32xf32>
    %28 = vector.extract_strided_slice %13 {offsets = [0, 96], sizes = [2, 32], strides = [1, 1]} : vector<2x128xf32> to vector<2x32xf32>
    %29 = arith.negf %28 : vector<2x32xf32>
    %30 = math.exp %29 : vector<2x32xf32>
    %cst_13 = arith.constant 1.000000e+00 : f32
    %31 = vector.broadcast %cst_13 : f32 to vector<2x32xf32>
    %32 = arith.addf %31, %30 : vector<2x32xf32>
    %33 = arith.divf %31, %32 : vector<2x32xf32>
    %c0_14 = arith.constant 0 : index
    %c0_15 = arith.constant 0 : index
    %34 = vector.load %arg7[%c0_14, %c0_15] : memref<2x32xf32, #tpu.memory_space<vmem>>, vector<2x32xf32>
    %35 = arith.mulf %25, %34 : vector<2x32xf32>
    %36 = arith.mulf %19, %27 : vector<2x32xf32>
    %37 = arith.addf %35, %36 : vector<2x32xf32>
    %38 = math.tanh %37 : vector<2x32xf32>
    %39 = arith.mulf %33, %38 : vector<2x32xf32>
    %40 = arith.addi %6, %c0_i32_5 : i32
    %41 = vector.broadcast %40 : i32 to vector<2x1xi32>
    %42 = arith.cmpi sgt, %5, %41 : vector<2x1xi32>
    %c0_16 = arith.constant 0 : index
    %c0_17 = arith.constant 0 : index
    %43 = vector.load %arg7[%c0_16, %c0_17] : memref<2x32xf32, #tpu.memory_space<vmem>>, vector<2x32xf32>
    %44 = vector.shape_cast %42 : vector<2x1xi1> to vector<2x1xi1>
    %45 = vector.broadcast %44 : vector<2x1xi1> to vector<2x32xi1>
    %46 = arith.select %45, %37, %43 : vector<2x32xi1>, vector<2x32xf32>
    %c0_18 = arith.constant 0 : index
    %c0_19 = arith.constant 0 : index
    %47 = vector.load %arg7[%c0_18, %c0_19] : memref<2x32xf32, #tpu.memory_space<vmem>>, vector<2x32xf32>
    tpu.vector_store %arg7[%c0_18, %c0_19], %46 {strides = array<i32>} : memref<2x32xf32, #tpu.memory_space<vmem>>, vector<2x32xf32>,
    %c0_20 = arith.constant 0 : index
    %c0_21 = arith.constant 0 : index
    %48 = vector.load %arg6[%c0_20, %c0_21] : memref<2x32xf32, #tpu.memory_space<vmem>>, vector<2x32xf32>
    %49 = vector.shape_cast %42 : vector<2x1xi1> to vector<2x1xi1>
    %50 = vector.broadcast %49 : vector<2x1xi1> to vector<2x32xi1>
    %51 = arith.select %50, %39, %48 : vector<2x32xi1>, vector<2x32xf32>
    %c0_22 = arith.constant 0 : index
    %c0_23 = arith.constant 0 : index
    %52 = vector.load %arg6[%c0_22, %c0_23] : memref<2x32xf32, #tpu.memory_space<vmem>>, vector<2x32xf32>
    tpu.vector_store %arg6[%c0_22, %c0_23], %51 {strides = array<i32>} : memref<2x32xf32, #tpu.memory_space<vmem>>, vector<2x32xf32>,
    %cst_24 = arith.constant 0.000000e+00 : f32
    %53 = vector.broadcast %cst_24 : f32 to vector<2x32xf32>
    %54 = vector.shape_cast %42 : vector<2x1xi1> to vector<2x1xi1>
    %55 = vector.broadcast %54 : vector<2x1xi1> to vector<2x32xi1>
    %56 = arith.select %55, %39, %53 : vector<2x32xi1>, vector<2x32xf32>
    %c0_25 = arith.constant 0 : index
    %57 = arith.index_cast %c0_i32_5 : i32 to index
    %c0_26 = arith.constant 0 : index
    %c0_27 = arith.constant 0 : index
    %58 = vector.load %arg5[%c0_25, %57, %c0_26, %c0_27] : memref<1x8x2x32xf32, #tpu.memory_space<vmem>>, vector<1x1x2x32xf32>
    %59 = vector.shape_cast %58 : vector<1x1x2x32xf32> to vector<2x32xf32>
    %60 = vector.shape_cast %56 : vector<2x32xf32> to vector<1x1x2x32xf32>
    tpu.vector_store %arg5[%c0_25, %57, %c0_26, %c0_27], %60 {strides = array<i32>} : memref<1x8x2x32xf32, #tpu.memory_space<vmem>>, vector<1x1x2x32xf32>,
    %c1_i32 = arith.constant 1 : i32
    %c0_28 = arith.constant 0 : index
    %61 = arith.index_cast %c1_i32 : i32 to index
    %c0_29 = arith.constant 0 : index
    %c0_30 = arith.constant 0 : index
    %62 = vector.load %arg2[%c0_28, %61, %c0_29, %c0_30] : memref<1x8x2x128xf32, #tpu.memory_space<vmem>>, vector<1x1x2x128xf32>
    %63 = vector.shape_cast %62 : vector<1x1x2x128xf32> to vector<2x128xf32>
    %c0_31 = arith.constant 0 : index
    %c0_32 = arith.constant 0 : index
    %64 = vector.load %arg6[%c0_31, %c0_32] : memref<2x32xf32, #tpu.memory_space<vmem>>, vector<2x32xf32>
    %65 = arith.truncf %64 : vector<2x32xf32> to vector<2x32xbf16>
    %cst_33 = arith.constant dense<0.000000e+00> : vector<2x128xf32>
    %66 = tpu.matmul %65, %4, %cst_33 {dimension_numbers = #tpu.dot_dimension_numbers<[1], [0], [0], [1], [0, 0, 1, 1], [], []>} : vector<2x32xbf16>, vector<32x128xbf16>, vector<2x128xf32> -> vector<2x128xf32>
    %67 = arith.addf %63, %66 : vector<2x128xf32>
    %68 = vector.extract_strided_slice %67 {offsets = [0, 0], sizes = [2, 32], strides = [1, 1]} : vector<2x128xf32> to vector<2x32xf32>
    %69 = arith.negf %68 : vector<2x32xf32>
    %70 = math.exp %69 : vector<2x32xf32>
    %cst_34 = arith.constant 1.000000e+00 : f32
    %71 = vector.broadcast %cst_34 : f32 to vector<2x32xf32>
    %72 = arith.addf %71, %70 : vector<2x32xf32>
    %73 = arith.divf %71, %72 : vector<2x32xf32>
    %74 = vector.extract_strided_slice %67 {offsets = [0, 32], sizes = [2, 32], strides = [1, 1]} : vector<2x128xf32> to vector<2x32xf32>
    %75 = arith.negf %74 : vector<2x32xf32>
    %76 = math.exp %75 : vector<2x32xf32>
    %cst_35 = arith.constant 1.000000e+00 : f32
    %77 = vector.broadcast %cst_35 : f32 to vector<2x32xf32>
    %78 = arith.addf %77, %76 : vector<2x32xf32>
    %79 = arith.divf %77, %78 : vector<2x32xf32>
    %80 = vector.extract_strided_slice %67 {offsets = [0, 64], sizes = [2, 32], strides = [1, 1]} : vector<2x128xf32> to vector<2x32xf32>
    %81 = math.tanh %80 : vector<2x32xf32>
    %82 = vector.extract_strided_slice %67 {offsets = [0, 96], sizes = [2, 32], strides = [1, 1]} : vector<2x128xf32> to vector<2x32xf32>
    %83 = arith.negf %82 : vector<2x32xf32>
    %84 = math.exp %83 : vector<2x32xf32>
    %cst_36 = arith.constant 1.000000e+00 : f32
    %85 = vector.broadcast %cst_36 : f32 to vector<2x32xf32>
    %86 = arith.addf %85, %84 : vector<2x32xf32>
    %87 = arith.divf %85, %86 : vector<2x32xf32>
    %c0_37 = arith.constant 0 : index
    %c0_38 = arith.constant 0 : index
    %88 = vector.load %arg7[%c0_37, %c0_38] : memref<2x32xf32, #tpu.memory_space<vmem>>, vector<2x32xf32>
    %89 = arith.mulf %79, %88 : vector<2x32xf32>
    %90 = arith.mulf %73, %81 : vector<2x32xf32>
    %91 = arith.addf %89, %90 : vector<2x32xf32>
    %92 = math.tanh %91 : vector<2x32xf32>
    %93 = arith.mulf %87, %92 : vector<2x32xf32>
    %94 = arith.addi %6, %c1_i32 : i32
    %95 = vector.broadcast %94 : i32 to vector<2x1xi32>
    %96 = arith.cmpi sgt, %5, %95 : vector<2x1xi32>
    %c0_39 = arith.constant 0 : index
    %c0_40 = arith.constant 0 : index
    %97 = vector.load %arg7[%c0_39, %c0_40] : memref<2x32xf32, #tpu.memory_space<vmem>>, vector<2x32xf32>
    %98 = vector.shape_cast %96 : vector<2x1xi1> to vector<2x1xi1>
    %99 = vector.broadcast %98 : vector<2x1xi1> to vector<2x32xi1>
    %100 = arith.select %99, %91, %97 : vector<2x32xi1>, vector<2x32xf32>
    %c0_41 = arith.constant 0 : index
    %c0_42 = arith.constant 0 : index
    %101 = vector.load %arg7[%c0_41, %c0_42] : memref<2x32xf32, #tpu.memory_space<vmem>>, vector<2x32xf32>
    tpu.vector_store %arg7[%c0_41, %c0_42], %100 {strides = array<i32>} : memref<2x32xf32, #tpu.memory_space<vmem>>, vector<2x32xf32>,
    %c0_43 = arith.constant 0 : index
    %c0_44 = arith.constant 0 : index
    %102 = vector.load %arg6[%c0_43, %c0_44] : memref<2x32xf32, #tpu.memory_space<vmem>>, vector<2x32xf32>
    %103 = vector.shape_cast %96 : vector<2x1xi1> to vector<2x1xi1>
    %104 = vector.broadcast %103 : vector<2x1xi1> to vector<2x32xi1>
    %105 = arith.select %104, %93, %102 : vector<2x32xi1>, vector<2x32xf32>
    %c0_45 = arith.constant 0 : index
    %c0_46 = arith.constant 0 : index
    %106 = vector.load %arg6[%c0_45, %c0_46] : memref<2x32xf32, #tpu.memory_space<vmem>>, vector<2x32xf32>
    tpu.vector_store %arg6[%c0_45, %c0_46], %105 {strides = array<i32>} : memref<2x32xf32, #tpu.memory_space<vmem>>, vector<2x32xf32>,
    %cst_47 = arith.constant 0.000000e+00 : f32
    %107 = vector.broadcast %cst_47 : f32 to vector<2x32xf32>
    %108 = vector.shape_cast %96 : vector<2x1xi1> to vector<2x1xi1>
    %109 = vector.broadcast %108 : vector<2x1xi1> to vector<2x32xi1>
    %110 = arith.select %109, %93, %107 : vector<2x32xi1>, vector<2x32xf32>
    %c0_48 = arith.constant 0 : index
    %111 = arith.index_cast %c1_i32 : i32 to index
    %c0_49 = arith.constant 0 : index
    %c0_50 = arith.constant 0 : index
    %112 = vector.load %arg5[%c0_48, %111, %c0_49, %c0_50] : memref<1x8x2x32xf32, #tpu.memory_space<vmem>>, vector<1x1x2x32xf32>
    %113 = vector.shape_cast %112 : vector<1x1x2x32xf32> to vector<2x32xf32>
    %114 = vector.shape_cast %110 : vector<2x32xf32> to vector<1x1x2x32xf32>
    tpu.vector_store %arg5[%c0_48, %111, %c0_49, %c0_50], %114 {strides = array<i32>} : memref<1x8x2x32xf32, #tpu.memory_space<vmem>>, vector<1x1x2x32xf32>,
    %c2_i32 = arith.constant 2 : i32
    %c0_51 = arith.constant 0 : index
    %115 = arith.index_cast %c2_i32 : i32 to index
    %c0_52 = arith.constant 0 : index
    %c0_53 = arith.constant 0 : index
    %116 = vector.load %arg2[%c0_51, %115, %c0_52, %c0_53] : memref<1x8x2x128xf32, #tpu.memory_space<vmem>>, vector<1x1x2x128xf32>
    %117 = vector.shape_cast %116 : vector<1x1x2x128xf32> to vector<2x128xf32>
    %c0_54 = arith.constant 0 : index
    %c0_55 = arith.constant 0 : index
    %118 = vector.load %arg6[%c0_54, %c0_55] : memref<2x32xf32, #tpu.memory_space<vmem>>, vector<2x32xf32>
    %119 = arith.truncf %118 : vector<2x32xf32> to vector<2x32xbf16>
    %cst_56 = arith.constant dense<0.000000e+00> : vector<2x128xf32>
    %120 = tpu.matmul %119, %4, %cst_56 {dimension_numbers = #tpu.dot_dimension_numbers<[1], [0], [0], [1], [0, 0, 1, 1], [], []>} : vector<2x32xbf16>, vector<32x128xbf16>, vector<2x128xf32> -> vector<2x128xf32>
    %121 = arith.addf %117, %120 : vector<2x128xf32>
    %122 = vector.extract_strided_slice %121 {offsets = [0, 0], sizes = [2, 32], strides = [1, 1]} : vector<2x128xf32> to vector<2x32xf32>
    %123 = arith.negf %122 : vector<2x32xf32>
    %124 = math.exp %123 : vector<2x32xf32>
    %cst_57 = arith.constant 1.000000e+00 : f32
    %125 = vector.broadcast %cst_57 : f32 to vector<2x32xf32>
    %126 = arith.addf %125, %124 : vector<2x32xf32>
    %127 = arith.divf %125, %126 : vector<2x32xf32>
    %128 = vector.extract_strided_slice %121 {offsets = [0, 32], sizes = [2, 32], strides = [1, 1]} : vector<2x128xf32> to vector<2x32xf32>
    %129 = arith.negf %128 : vector<2x32xf32>
    %130 = math.exp %129 : vector<2x32xf32>
    %cst_58 = arith.constant 1.000000e+00 : f32
    %131 = vector.broadcast %cst_58 : f32 to vector<2x32xf32>
    %132 = arith.addf %131, %130 : vector<2x32xf32>
    %133 = arith.divf %131, %132 : vector<2x32xf32>
    %134 = vector.extract_strided_slice %121 {offsets = [0, 64], sizes = [2, 32], strides = [1, 1]} : vector<2x128xf32> to vector<2x32xf32>
    %135 = math.tanh %134 : vector<2x32xf32>
    %136 = vector.extract_strided_slice %121 {offsets = [0, 96], sizes = [2, 32], strides = [1, 1]} : vector<2x128xf32> to vector<2x32xf32>
    %137 = arith.negf %136 : vector<2x32xf32>
    %138 = math.exp %137 : vector<2x32xf32>
    %cst_59 = arith.constant 1.000000e+00 : f32
    %139 = vector.broadcast %cst_59 : f32 to vector<2x32xf32>
    %140 = arith.addf %139, %138 : vector<2x32xf32>
    %141 = arith.divf %139, %140 : vector<2x32xf32>
    %c0_60 = arith.constant 0 : index
    %c0_61 = arith.constant 0 : index
    %142 = vector.load %arg7[%c0_60, %c0_61] : memref<2x32xf32, #tpu.memory_space<vmem>>, vector<2x32xf32>
    %143 = arith.mulf %133, %142 : vector<2x32xf32>
    %144 = arith.mulf %127, %135 : vector<2x32xf32>
    %145 = arith.addf %143, %144 : vector<2x32xf32>
    %146 = math.tanh %145 : vector<2x32xf32>
    %147 = arith.mulf %141, %146 : vector<2x32xf32>
    %148 = arith.addi %6, %c2_i32 : i32
    %149 = vector.broadcast %148 : i32 to vector<2x1xi32>
    %150 = arith.cmpi sgt, %5, %149 : vector<2x1xi32>
    %c0_62 = arith.constant 0 : index
    %c0_63 = arith.constant 0 : index
    %151 = vector.load %arg7[%c0_62, %c0_63] : memref<2x32xf32, #tpu.memory_space<vmem>>, vector<2x32xf32>
    %152 = vector.shape_cast %150 : vector<2x1xi1> to vector<2x1xi1>
    %153 = vector.broadcast %152 : vector<2x1xi1> to vector<2x32xi1>
    %154 = arith.select %153, %145, %151 : vector<2x32xi1>, vector<2x32xf32>
    %c0_64 = arith.constant 0 : index
    %c0_65 = arith.constant 0 : index
    %155 = vector.load %arg7[%c0_64, %c0_65] : memref<2x32xf32, #tpu.memory_space<vmem>>, vector<2x32xf32>
    tpu.vector_store %arg7[%c0_64, %c0_65], %154 {strides = array<i32>} : memref<2x32xf32, #tpu.memory_space<vmem>>, vector<2x32xf32>,
    %c0_66 = arith.constant 0 : index
    %c0_67 = arith.constant 0 : index
    %156 = vector.load %arg6[%c0_66, %c0_67] : memref<2x32xf32, #tpu.memory_space<vmem>>, vector<2x32xf32>
    %157 = vector.shape_cast %150 : vector<2x1xi1> to vector<2x1xi1>
    %158 = vector.broadcast %157 : vector<2x1xi1> to vector<2x32xi1>
    %159 = arith.select %158, %147, %156 : vector<2x32xi1>, vector<2x32xf32>
    %c0_68 = arith.constant 0 : index
    %c0_69 = arith.constant 0 : index
    %160 = vector.load %arg6[%c0_68, %c0_69] : memref<2x32xf32, #tpu.memory_space<vmem>>, vector<2x32xf32>
    tpu.vector_store %arg6[%c0_68, %c0_69], %159 {strides = array<i32>} : memref<2x32xf32, #tpu.memory_space<vmem>>, vector<2x32xf32>,
    %cst_70 = arith.constant 0.000000e+00 : f32
    %161 = vector.broadcast %cst_70 : f32 to vector<2x32xf32>
    %162 = vector.shape_cast %150 : vector<2x1xi1> to vector<2x1xi1>
    %163 = vector.broadcast %162 : vector<2x1xi1> to vector<2x32xi1>
    %164 = arith.select %163, %147, %161 : vector<2x32xi1>, vector<2x32xf32>
    %c0_71 = arith.constant 0 : index
    %165 = arith.index_cast %c2_i32 : i32 to index
    %c0_72 = arith.constant 0 : index
    %c0_73 = arith.constant 0 : index
    %166 = vector.load %arg5[%c0_71, %165, %c0_72, %c0_73] : memref<1x8x2x32xf32, #tpu.memory_space<vmem>>, vector<1x1x2x32xf32>
    %167 = vector.shape_cast %166 : vector<1x1x2x32xf32> to vector<2x32xf32>
    %168 = vector.shape_cast %164 : vector<2x32xf32> to vector<1x1x2x32xf32>
    tpu.vector_store %arg5[%c0_71, %165, %c0_72, %c0_73], %168 {strides = array<i32>} : memref<1x8x2x32xf32, #tpu.memory_space<vmem>>, vector<1x1x2x32xf32>,
    %c3_i32 = arith.constant 3 : i32
    %c0_74 = arith.constant 0 : index
    %169 = arith.index_cast %c3_i32 : i32 to index
    %c0_75 = arith.constant 0 : index
    %c0_76 = arith.constant 0 : index
    %170 = vector.load %arg2[%c0_74, %169, %c0_75, %c0_76] : memref<1x8x2x128xf32, #tpu.memory_space<vmem>>, vector<1x1x2x128xf32>
    %171 = vector.shape_cast %170 : vector<1x1x2x128xf32> to vector<2x128xf32>
    %c0_77 = arith.constant 0 : index
    %c0_78 = arith.constant 0 : index
    %172 = vector.load %arg6[%c0_77, %c0_78] : memref<2x32xf32, #tpu.memory_space<vmem>>, vector<2x32xf32>
    %173 = arith.truncf %172 : vector<2x32xf32> to vector<2x32xbf16>
    %cst_79 = arith.constant dense<0.000000e+00> : vector<2x128xf32>
    %174 = tpu.matmul %173, %4, %cst_79 {dimension_numbers = #tpu.dot_dimension_numbers<[1], [0], [0], [1], [0, 0, 1, 1], [], []>} : vector<2x32xbf16>, vector<32x128xbf16>, vector<2x128xf32> -> vector<2x128xf32>
    %175 = arith.addf %171, %174 : vector<2x128xf32>
    %176 = vector.extract_strided_slice %175 {offsets = [0, 0], sizes = [2, 32], strides = [1, 1]} : vector<2x128xf32> to vector<2x32xf32>
    %177 = arith.negf %176 : vector<2x32xf32>
    %178 = math.exp %177 : vector<2x32xf32>
    %cst_80 = arith.constant 1.000000e+00 : f32
    %179 = vector.broadcast %cst_80 : f32 to vector<2x32xf32>
    %180 = arith.addf %179, %178 : vector<2x32xf32>
    %181 = arith.divf %179, %180 : vector<2x32xf32>
    %182 = vector.extract_strided_slice %175 {offsets = [0, 32], sizes = [2, 32], strides = [1, 1]} : vector<2x128xf32> to vector<2x32xf32>
    %183 = arith.negf %182 : vector<2x32xf32>
    %184 = math.exp %183 : vector<2x32xf32>
    %cst_81 = arith.constant 1.000000e+00 : f32
    %185 = vector.broadcast %cst_81 : f32 to vector<2x32xf32>
    %186 = arith.addf %185, %184 : vector<2x32xf32>
    %187 = arith.divf %185, %186 : vector<2x32xf32>
    %188 = vector.extract_strided_slice %175 {offsets = [0, 64], sizes = [2, 32], strides = [1, 1]} : vector<2x128xf32> to vector<2x32xf32>
    %189 = math.tanh %188 : vector<2x32xf32>
    %190 = vector.extract_strided_slice %175 {offsets = [0, 96], sizes = [2, 32], strides = [1, 1]} : vector<2x128xf32> to vector<2x32xf32>
    %191 = arith.negf %190 : vector<2x32xf32>
    %192 = math.exp %191 : vector<2x32xf32>
    %cst_82 = arith.constant 1.000000e+00 : f32
    %193 = vector.broadcast %cst_82 : f32 to vector<2x32xf32>
    %194 = arith.addf %193, %192 : vector<2x32xf32>
    %195 = arith.divf %193, %194 : vector<2x32xf32>
    %c0_83 = arith.constant 0 : index
    %c0_84 = arith.constant 0 : index
    %196 = vector.load %arg7[%c0_83, %c0_84] : memref<2x32xf32, #tpu.memory_space<vmem>>, vector<2x32xf32>
    %197 = arith.mulf %187, %196 : vector<2x32xf32>
    %198 = arith.mulf %181, %189 : vector<2x32xf32>
    %199 = arith.addf %197, %198 : vector<2x32xf32>
    %200 = math.tanh %199 : vector<2x32xf32>
    %201 = arith.mulf %195, %200 : vector<2x32xf32>
    %202 = arith.addi %6, %c3_i32 : i32
    %203 = vector.broadcast %202 : i32 to vector<2x1xi32>
    %204 = arith.cmpi sgt, %5, %203 : vector<2x1xi32>
    %c0_85 = arith.constant 0 : index
    %c0_86 = arith.constant 0 : index
    %205 = vector.load %arg7[%c0_85, %c0_86] : memref<2x32xf32, #tpu.memory_space<vmem>>, vector<2x32xf32>
    %206 = vector.shape_cast %204 : vector<2x1xi1> to vector<2x1xi1>
    %207 = vector.broadcast %206 : vector<2x1xi1> to vector<2x32xi1>
    %208 = arith.select %207, %199, %205 : vector<2x32xi1>, vector<2x32xf32>
    %c0_87 = arith.constant 0 : index
    %c0_88 = arith.constant 0 : index
    %209 = vector.load %arg7[%c0_87, %c0_88] : memref<2x32xf32, #tpu.memory_space<vmem>>, vector<2x32xf32>
    tpu.vector_store %arg7[%c0_87, %c0_88], %208 {strides = array<i32>} : memref<2x32xf32, #tpu.memory_space<vmem>>, vector<2x32xf32>,
    %c0_89 = arith.constant 0 : index
    %c0_90 = arith.constant 0 : index
    %210 = vector.load %arg6[%c0_89, %c0_90] : memref<2x32xf32, #tpu.memory_space<vmem>>, vector<2x32xf32>
    %211 = vector.shape_cast %204 : vector<2x1xi1> to vector<2x1xi1>
    %212 = vector.broadcast %211 : vector<2x1xi1> to vector<2x32xi1>
    %213 = arith.select %212, %201, %210 : vector<2x32xi1>, vector<2x32xf32>
    %c0_91 = arith.constant 0 : index
    %c0_92 = arith.constant 0 : index
    %214 = vector.load %arg6[%c0_91, %c0_92] : memref<2x32xf32, #tpu.memory_space<vmem>>, vector<2x32xf32>
    tpu.vector_store %arg6[%c0_91, %c0_92], %213 {strides = array<i32>} : memref<2x32xf32, #tpu.memory_space<vmem>>, vector<2x32xf32>,
    %cst_93 = arith.constant 0.000000e+00 : f32
    %215 = vector.broadcast %cst_93 : f32 to vector<2x32xf32>
    %216 = vector.shape_cast %204 : vector<2x1xi1> to vector<2x1xi1>
    %217 = vector.broadcast %216 : vector<2x1xi1> to vector<2x32xi1>
    %218 = arith.select %217, %201, %215 : vector<2x32xi1>, vector<2x32xf32>
    %c0_94 = arith.constant 0 : index
    %219 = arith.index_cast %c3_i32 : i32 to index
    %c0_95 = arith.constant 0 : index
    %c0_96 = arith.constant 0 : index
    %220 = vector.load %arg5[%c0_94, %219, %c0_95, %c0_96] : memref<1x8x2x32xf32, #tpu.memory_space<vmem>>, vector<1x1x2x32xf32>
    %221 = vector.shape_cast %220 : vector<1x1x2x32xf32> to vector<2x32xf32>
    %222 = vector.shape_cast %218 : vector<2x32xf32> to vector<1x1x2x32xf32>
    tpu.vector_store %arg5[%c0_94, %219, %c0_95, %c0_96], %222 {strides = array<i32>} : memref<1x8x2x32xf32, #tpu.memory_space<vmem>>, vector<1x1x2x32xf32>,
    %c4_i32 = arith.constant 4 : i32
    %c0_97 = arith.constant 0 : index
    %223 = arith.index_cast %c4_i32 : i32 to index
    %c0_98 = arith.constant 0 : index
    %c0_99 = arith.constant 0 : index
    %224 = vector.load %arg2[%c0_97, %223, %c0_98, %c0_99] : memref<1x8x2x128xf32, #tpu.memory_space<vmem>>, vector<1x1x2x128xf32>
    %225 = vector.shape_cast %224 : vector<1x1x2x128xf32> to vector<2x128xf32>
    %c0_100 = arith.constant 0 : index
    %c0_101 = arith.constant 0 : index
    %226 = vector.load %arg6[%c0_100, %c0_101] : memref<2x32xf32, #tpu.memory_space<vmem>>, vector<2x32xf32>
    %227 = arith.truncf %226 : vector<2x32xf32> to vector<2x32xbf16>
    %cst_102 = arith.constant dense<0.000000e+00> : vector<2x128xf32>
    %228 = tpu.matmul %227, %4, %cst_102 {dimension_numbers = #tpu.dot_dimension_numbers<[1], [0], [0], [1], [0, 0, 1, 1], [], []>} : vector<2x32xbf16>, vector<32x128xbf16>, vector<2x128xf32> -> vector<2x128xf32>
    %229 = arith.addf %225, %228 : vector<2x128xf32>
    %230 = vector.extract_strided_slice %229 {offsets = [0, 0], sizes = [2, 32], strides = [1, 1]} : vector<2x128xf32> to vector<2x32xf32>
    %231 = arith.negf %230 : vector<2x32xf32>
    %232 = math.exp %231 : vector<2x32xf32>
    %cst_103 = arith.constant 1.000000e+00 : f32
    %233 = vector.broadcast %cst_103 : f32 to vector<2x32xf32>
    %234 = arith.addf %233, %232 : vector<2x32xf32>
    %235 = arith.divf %233, %234 : vector<2x32xf32>
    %236 = vector.extract_strided_slice %229 {offsets = [0, 32], sizes = [2, 32], strides = [1, 1]} : vector<2x128xf32> to vector<2x32xf32>
    %237 = arith.negf %236 : vector<2x32xf32>
    %238 = math.exp %237 : vector<2x32xf32>
    %cst_104 = arith.constant 1.000000e+00 : f32
    %239 = vector.broadcast %cst_104 : f32 to vector<2x32xf32>
    %240 = arith.addf %239, %238 : vector<2x32xf32>
    %241 = arith.divf %239, %240 : vector<2x32xf32>
    %242 = vector.extract_strided_slice %229 {offsets = [0, 64], sizes = [2, 32], strides = [1, 1]} : vector<2x128xf32> to vector<2x32xf32>
    %243 = math.tanh %242 : vector<2x32xf32>
    %244 = vector.extract_strided_slice %229 {offsets = [0, 96], sizes = [2, 32], strides = [1, 1]} : vector<2x128xf32> to vector<2x32xf32>
    %245 = arith.negf %244 : vector<2x32xf32>
    %246 = math.exp %245 : vector<2x32xf32>
    %cst_105 = arith.constant 1.000000e+00 : f32
    %247 = vector.broadcast %cst_105 : f32 to vector<2x32xf32>
    %248 = arith.addf %247, %246 : vector<2x32xf32>
    %249 = arith.divf %247, %248 : vector<2x32xf32>
    %c0_106 = arith.constant 0 : index
    %c0_107 = arith.constant 0 : index
    %250 = vector.load %arg7[%c0_106, %c0_107] : memref<2x32xf32, #tpu.memory_space<vmem>>, vector<2x32xf32>
    %251 = arith.mulf %241, %250 : vector<2x32xf32>
    %252 = arith.mulf %235, %243 : vector<2x32xf32>
    %253 = arith.addf %251, %252 : vector<2x32xf32>
    %254 = math.tanh %253 : vector<2x32xf32>
    %255 = arith.mulf %249, %254 : vector<2x32xf32>
    %256 = arith.addi %6, %c4_i32 : i32
    %257 = vector.broadcast %256 : i32 to vector<2x1xi32>
    %258 = arith.cmpi sgt, %5, %257 : vector<2x1xi32>
    %c0_108 = arith.constant 0 : index
    %c0_109 = arith.constant 0 : index
    %259 = vector.load %arg7[%c0_108, %c0_109] : memref<2x32xf32, #tpu.memory_space<vmem>>, vector<2x32xf32>
    %260 = vector.shape_cast %258 : vector<2x1xi1> to vector<2x1xi1>
    %261 = vector.broadcast %260 : vector<2x1xi1> to vector<2x32xi1>
    %262 = arith.select %261, %253, %259 : vector<2x32xi1>, vector<2x32xf32>
    %c0_110 = arith.constant 0 : index
    %c0_111 = arith.constant 0 : index
    %263 = vector.load %arg7[%c0_110, %c0_111] : memref<2x32xf32, #tpu.memory_space<vmem>>, vector<2x32xf32>
    tpu.vector_store %arg7[%c0_110, %c0_111], %262 {strides = array<i32>} : memref<2x32xf32, #tpu.memory_space<vmem>>, vector<2x32xf32>,
    %c0_112 = arith.constant 0 : index
    %c0_113 = arith.constant 0 : index
    %264 = vector.load %arg6[%c0_112, %c0_113] : memref<2x32xf32, #tpu.memory_space<vmem>>, vector<2x32xf32>
    %265 = vector.shape_cast %258 : vector<2x1xi1> to vector<2x1xi1>
    %266 = vector.broadcast %265 : vector<2x1xi1> to vector<2x32xi1>
    %267 = arith.select %266, %255, %264 : vector<2x32xi1>, vector<2x32xf32>
    %c0_114 = arith.constant 0 : index
    %c0_115 = arith.constant 0 : index
    %268 = vector.load %arg6[%c0_114, %c0_115] : memref<2x32xf32, #tpu.memory_space<vmem>>, vector<2x32xf32>
    tpu.vector_store %arg6[%c0_114, %c0_115], %267 {strides = array<i32>} : memref<2x32xf32, #tpu.memory_space<vmem>>, vector<2x32xf32>,
    %cst_116 = arith.constant 0.000000e+00 : f32
    %269 = vector.broadcast %cst_116 : f32 to vector<2x32xf32>
    %270 = vector.shape_cast %258 : vector<2x1xi1> to vector<2x1xi1>
    %271 = vector.broadcast %270 : vector<2x1xi1> to vector<2x32xi1>
    %272 = arith.select %271, %255, %269 : vector<2x32xi1>, vector<2x32xf32>
    %c0_117 = arith.constant 0 : index
    %273 = arith.index_cast %c4_i32 : i32 to index
    %c0_118 = arith.constant 0 : index
    %c0_119 = arith.constant 0 : index
    %274 = vector.load %arg5[%c0_117, %273, %c0_118, %c0_119] : memref<1x8x2x32xf32, #tpu.memory_space<vmem>>, vector<1x1x2x32xf32>
    %275 = vector.shape_cast %274 : vector<1x1x2x32xf32> to vector<2x32xf32>
    %276 = vector.shape_cast %272 : vector<2x32xf32> to vector<1x1x2x32xf32>
    tpu.vector_store %arg5[%c0_117, %273, %c0_118, %c0_119], %276 {strides = array<i32>} : memref<1x8x2x32xf32, #tpu.memory_space<vmem>>, vector<1x1x2x32xf32>,
    %c5_i32 = arith.constant 5 : i32
    %c0_120 = arith.constant 0 : index
    %277 = arith.index_cast %c5_i32 : i32 to index
    %c0_121 = arith.constant 0 : index
    %c0_122 = arith.constant 0 : index
    %278 = vector.load %arg2[%c0_120, %277, %c0_121, %c0_122] : memref<1x8x2x128xf32, #tpu.memory_space<vmem>>, vector<1x1x2x128xf32>
    %279 = vector.shape_cast %278 : vector<1x1x2x128xf32> to vector<2x128xf32>
    %c0_123 = arith.constant 0 : index
    %c0_124 = arith.constant 0 : index
    %280 = vector.load %arg6[%c0_123, %c0_124] : memref<2x32xf32, #tpu.memory_space<vmem>>, vector<2x32xf32>
    %281 = arith.truncf %280 : vector<2x32xf32> to vector<2x32xbf16>
    %cst_125 = arith.constant dense<0.000000e+00> : vector<2x128xf32>
    %282 = tpu.matmul %281, %4, %cst_125 {dimension_numbers = #tpu.dot_dimension_numbers<[1], [0], [0], [1], [0, 0, 1, 1], [], []>} : vector<2x32xbf16>, vector<32x128xbf16>, vector<2x128xf32> -> vector<2x128xf32>
    %283 = arith.addf %279, %282 : vector<2x128xf32>
    %284 = vector.extract_strided_slice %283 {offsets = [0, 0], sizes = [2, 32], strides = [1, 1]} : vector<2x128xf32> to vector<2x32xf32>
    %285 = arith.negf %284 : vector<2x32xf32>
    %286 = math.exp %285 : vector<2x32xf32>
    %cst_126 = arith.constant 1.000000e+00 : f32
    %287 = vector.broadcast %cst_126 : f32 to vector<2x32xf32>
    %288 = arith.addf %287, %286 : vector<2x32xf32>
    %289 = arith.divf %287, %288 : vector<2x32xf32>
    %290 = vector.extract_strided_slice %283 {offsets = [0, 32], sizes = [2, 32], strides = [1, 1]} : vector<2x128xf32> to vector<2x32xf32>
    %291 = arith.negf %290 : vector<2x32xf32>
    %292 = math.exp %291 : vector<2x32xf32>
    %cst_127 = arith.constant 1.000000e+00 : f32
    %293 = vector.broadcast %cst_127 : f32 to vector<2x32xf32>
    %294 = arith.addf %293, %292 : vector<2x32xf32>
    %295 = arith.divf %293, %294 : vector<2x32xf32>
    %296 = vector.extract_strided_slice %283 {offsets = [0, 64], sizes = [2, 32], strides = [1, 1]} : vector<2x128xf32> to vector<2x32xf32>
    %297 = math.tanh %296 : vector<2x32xf32>
    %298 = vector.extract_strided_slice %283 {offsets = [0, 96], sizes = [2, 32], strides = [1, 1]} : vector<2x128xf32> to vector<2x32xf32>
    %299 = arith.negf %298 : vector<2x32xf32>
    %300 = math.exp %299 : vector<2x32xf32>
    %cst_128 = arith.constant 1.000000e+00 : f32
    %301 = vector.broadcast %cst_128 : f32 to vector<2x32xf32>
    %302 = arith.addf %301, %300 : vector<2x32xf32>
    %303 = arith.divf %301, %302 : vector<2x32xf32>
    %c0_129 = arith.constant 0 : index
    %c0_130 = arith.constant 0 : index
    %304 = vector.load %arg7[%c0_129, %c0_130] : memref<2x32xf32, #tpu.memory_space<vmem>>, vector<2x32xf32>
    %305 = arith.mulf %295, %304 : vector<2x32xf32>
    %306 = arith.mulf %289, %297 : vector<2x32xf32>
    %307 = arith.addf %305, %306 : vector<2x32xf32>
    %308 = math.tanh %307 : vector<2x32xf32>
    %309 = arith.mulf %303, %308 : vector<2x32xf32>
    %310 = arith.addi %6, %c5_i32 : i32
    %311 = vector.broadcast %310 : i32 to vector<2x1xi32>
    %312 = arith.cmpi sgt, %5, %311 : vector<2x1xi32>
    %c0_131 = arith.constant 0 : index
    %c0_132 = arith.constant 0 : index
    %313 = vector.load %arg7[%c0_131, %c0_132] : memref<2x32xf32, #tpu.memory_space<vmem>>, vector<2x32xf32>
    %314 = vector.shape_cast %312 : vector<2x1xi1> to vector<2x1xi1>
    %315 = vector.broadcast %314 : vector<2x1xi1> to vector<2x32xi1>
    %316 = arith.select %315, %307, %313 : vector<2x32xi1>, vector<2x32xf32>
    %c0_133 = arith.constant 0 : index
    %c0_134 = arith.constant 0 : index
    %317 = vector.load %arg7[%c0_133, %c0_134] : memref<2x32xf32, #tpu.memory_space<vmem>>, vector<2x32xf32>
    tpu.vector_store %arg7[%c0_133, %c0_134], %316 {strides = array<i32>} : memref<2x32xf32, #tpu.memory_space<vmem>>, vector<2x32xf32>,
    %c0_135 = arith.constant 0 : index
    %c0_136 = arith.constant 0 : index
    %318 = vector.load %arg6[%c0_135, %c0_136] : memref<2x32xf32, #tpu.memory_space<vmem>>, vector<2x32xf32>
    %319 = vector.shape_cast %312 : vector<2x1xi1> to vector<2x1xi1>
    %320 = vector.broadcast %319 : vector<2x1xi1> to vector<2x32xi1>
    %321 = arith.select %320, %309, %318 : vector<2x32xi1>, vector<2x32xf32>
    %c0_137 = arith.constant 0 : index
    %c0_138 = arith.constant 0 : index
    %322 = vector.load %arg6[%c0_137, %c0_138] : memref<2x32xf32, #tpu.memory_space<vmem>>, vector<2x32xf32>
    tpu.vector_store %arg6[%c0_137, %c0_138], %321 {strides = array<i32>} : memref<2x32xf32, #tpu.memory_space<vmem>>, vector<2x32xf32>,
    %cst_139 = arith.constant 0.000000e+00 : f32
    %323 = vector.broadcast %cst_139 : f32 to vector<2x32xf32>
    %324 = vector.shape_cast %312 : vector<2x1xi1> to vector<2x1xi1>
    %325 = vector.broadcast %324 : vector<2x1xi1> to vector<2x32xi1>
    %326 = arith.select %325, %309, %323 : vector<2x32xi1>, vector<2x32xf32>
    %c0_140 = arith.constant 0 : index
    %327 = arith.index_cast %c5_i32 : i32 to index
    %c0_141 = arith.constant 0 : index
    %c0_142 = arith.constant 0 : index
    %328 = vector.load %arg5[%c0_140, %327, %c0_141, %c0_142] : memref<1x8x2x32xf32, #tpu.memory_space<vmem>>, vector<1x1x2x32xf32>
    %329 = vector.shape_cast %328 : vector<1x1x2x32xf32> to vector<2x32xf32>
    %330 = vector.shape_cast %326 : vector<2x32xf32> to vector<1x1x2x32xf32>
    tpu.vector_store %arg5[%c0_140, %327, %c0_141, %c0_142], %330 {strides = array<i32>} : memref<1x8x2x32xf32, #tpu.memory_space<vmem>>, vector<1x1x2x32xf32>,
    %c6_i32 = arith.constant 6 : i32
    %c0_143 = arith.constant 0 : index
    %331 = arith.index_cast %c6_i32 : i32 to index
    %c0_144 = arith.constant 0 : index
    %c0_145 = arith.constant 0 : index
    %332 = vector.load %arg2[%c0_143, %331, %c0_144, %c0_145] : memref<1x8x2x128xf32, #tpu.memory_space<vmem>>, vector<1x1x2x128xf32>
    %333 = vector.shape_cast %332 : vector<1x1x2x128xf32> to vector<2x128xf32>
    %c0_146 = arith.constant 0 : index
    %c0_147 = arith.constant 0 : index
    %334 = vector.load %arg6[%c0_146, %c0_147] : memref<2x32xf32, #tpu.memory_space<vmem>>, vector<2x32xf32>
    %335 = arith.truncf %334 : vector<2x32xf32> to vector<2x32xbf16>
    %cst_148 = arith.constant dense<0.000000e+00> : vector<2x128xf32>
    %336 = tpu.matmul %335, %4, %cst_148 {dimension_numbers = #tpu.dot_dimension_numbers<[1], [0], [0], [1], [0, 0, 1, 1], [], []>} : vector<2x32xbf16>, vector<32x128xbf16>, vector<2x128xf32> -> vector<2x128xf32>
    %337 = arith.addf %333, %336 : vector<2x128xf32>
    %338 = vector.extract_strided_slice %337 {offsets = [0, 0], sizes = [2, 32], strides = [1, 1]} : vector<2x128xf32> to vector<2x32xf32>
    %339 = arith.negf %338 : vector<2x32xf32>
    %340 = math.exp %339 : vector<2x32xf32>
    %cst_149 = arith.constant 1.000000e+00 : f32
    %341 = vector.broadcast %cst_149 : f32 to vector<2x32xf32>
    %342 = arith.addf %341, %340 : vector<2x32xf32>
    %343 = arith.divf %341, %342 : vector<2x32xf32>
    %344 = vector.extract_strided_slice %337 {offsets = [0, 32], sizes = [2, 32], strides = [1, 1]} : vector<2x128xf32> to vector<2x32xf32>
    %345 = arith.negf %344 : vector<2x32xf32>
    %346 = math.exp %345 : vector<2x32xf32>
    %cst_150 = arith.constant 1.000000e+00 : f32
    %347 = vector.broadcast %cst_150 : f32 to vector<2x32xf32>
    %348 = arith.addf %347, %346 : vector<2x32xf32>
    %349 = arith.divf %347, %348 : vector<2x32xf32>
    %350 = vector.extract_strided_slice %337 {offsets = [0, 64], sizes = [2, 32], strides = [1, 1]} : vector<2x128xf32> to vector<2x32xf32>
    %351 = math.tanh %350 : vector<2x32xf32>
    %352 = vector.extract_strided_slice %337 {offsets = [0, 96], sizes = [2, 32], strides = [1, 1]} : vector<2x128xf32> to vector<2x32xf32>
    %353 = arith.negf %352 : vector<2x32xf32>
    %354 = math.exp %353 : vector<2x32xf32>
    %cst_151 = arith.constant 1.000000e+00 : f32
    %355 = vector.broadcast %cst_151 : f32 to vector<2x32xf32>
    %356 = arith.addf %355, %354 : vector<2x32xf32>
    %357 = arith.divf %355, %356 : vector<2x32xf32>
    %c0_152 = arith.constant 0 : index
    %c0_153 = arith.constant 0 : index
    %358 = vector.load %arg7[%c0_152, %c0_153] : memref<2x32xf32, #tpu.memory_space<vmem>>, vector<2x32xf32>
    %359 = arith.mulf %349, %358 : vector<2x32xf32>
    %360 = arith.mulf %343, %351 : vector<2x32xf32>
    %361 = arith.addf %359, %360 : vector<2x32xf32>
    %362 = math.tanh %361 : vector<2x32xf32>
    %363 = arith.mulf %357, %362 : vector<2x32xf32>
    %364 = arith.addi %6, %c6_i32 : i32
    %365 = vector.broadcast %364 : i32 to vector<2x1xi32>
    %366 = arith.cmpi sgt, %5, %365 : vector<2x1xi32>
    %c0_154 = arith.constant 0 : index
    %c0_155 = arith.constant 0 : index
    %367 = vector.load %arg7[%c0_154, %c0_155] : memref<2x32xf32, #tpu.memory_space<vmem>>, vector<2x32xf32>
    %368 = vector.shape_cast %366 : vector<2x1xi1> to vector<2x1xi1>
    %369 = vector.broadcast %368 : vector<2x1xi1> to vector<2x32xi1>
    %370 = arith.select %369, %361, %367 : vector<2x32xi1>, vector<2x32xf32>
    %c0_156 = arith.constant 0 : index
    %c0_157 = arith.constant 0 : index
    %371 = vector.load %arg7[%c0_156, %c0_157] : memref<2x32xf32, #tpu.memory_space<vmem>>, vector<2x32xf32>
    tpu.vector_store %arg7[%c0_156, %c0_157], %370 {strides = array<i32>} : memref<2x32xf32, #tpu.memory_space<vmem>>, vector<2x32xf32>,
    %c0_158 = arith.constant 0 : index
    %c0_159 = arith.constant 0 : index
    %372 = vector.load %arg6[%c0_158, %c0_159] : memref<2x32xf32, #tpu.memory_space<vmem>>, vector<2x32xf32>
    %373 = vector.shape_cast %366 : vector<2x1xi1> to vector<2x1xi1>
    %374 = vector.broadcast %373 : vector<2x1xi1> to vector<2x32xi1>
    %375 = arith.select %374, %363, %372 : vector<2x32xi1>, vector<2x32xf32>
    %c0_160 = arith.constant 0 : index
    %c0_161 = arith.constant 0 : index
    %376 = vector.load %arg6[%c0_160, %c0_161] : memref<2x32xf32, #tpu.memory_space<vmem>>, vector<2x32xf32>
    tpu.vector_store %arg6[%c0_160, %c0_161], %375 {strides = array<i32>} : memref<2x32xf32, #tpu.memory_space<vmem>>, vector<2x32xf32>,
    %cst_162 = arith.constant 0.000000e+00 : f32
    %377 = vector.broadcast %cst_162 : f32 to vector<2x32xf32>
    %378 = vector.shape_cast %366 : vector<2x1xi1> to vector<2x1xi1>
    %379 = vector.broadcast %378 : vector<2x1xi1> to vector<2x32xi1>
    %380 = arith.select %379, %363, %377 : vector<2x32xi1>, vector<2x32xf32>
    %c0_163 = arith.constant 0 : index
    %381 = arith.index_cast %c6_i32 : i32 to index
    %c0_164 = arith.constant 0 : index
    %c0_165 = arith.constant 0 : index
    %382 = vector.load %arg5[%c0_163, %381, %c0_164, %c0_165] : memref<1x8x2x32xf32, #tpu.memory_space<vmem>>, vector<1x1x2x32xf32>
    %383 = vector.shape_cast %382 : vector<1x1x2x32xf32> to vector<2x32xf32>
    %384 = vector.shape_cast %380 : vector<2x32xf32> to vector<1x1x2x32xf32>
    tpu.vector_store %arg5[%c0_163, %381, %c0_164, %c0_165], %384 {strides = array<i32>} : memref<1x8x2x32xf32, #tpu.memory_space<vmem>>, vector<1x1x2x32xf32>,
    %c7_i32 = arith.constant 7 : i32
    %c0_166 = arith.constant 0 : index
    %385 = arith.index_cast %c7_i32 : i32 to index
    %c0_167 = arith.constant 0 : index
    %c0_168 = arith.constant 0 : index
    %386 = vector.load %arg2[%c0_166, %385, %c0_167, %c0_168] : memref<1x8x2x128xf32, #tpu.memory_space<vmem>>, vector<1x1x2x128xf32>
    %387 = vector.shape_cast %386 : vector<1x1x2x128xf32> to vector<2x128xf32>
    %c0_169 = arith.constant 0 : index
    %c0_170 = arith.constant 0 : index
    %388 = vector.load %arg6[%c0_169, %c0_170] : memref<2x32xf32, #tpu.memory_space<vmem>>, vector<2x32xf32>
    %389 = arith.truncf %388 : vector<2x32xf32> to vector<2x32xbf16>
    %cst_171 = arith.constant dense<0.000000e+00> : vector<2x128xf32>
    %390 = tpu.matmul %389, %4, %cst_171 {dimension_numbers = #tpu.dot_dimension_numbers<[1], [0], [0], [1], [0, 0, 1, 1], [], []>} : vector<2x32xbf16>, vector<32x128xbf16>, vector<2x128xf32> -> vector<2x128xf32>
    %391 = arith.addf %387, %390 : vector<2x128xf32>
    %392 = vector.extract_strided_slice %391 {offsets = [0, 0], sizes = [2, 32], strides = [1, 1]} : vector<2x128xf32> to vector<2x32xf32>
    %393 = arith.negf %392 : vector<2x32xf32>
    %394 = math.exp %393 : vector<2x32xf32>
    %cst_172 = arith.constant 1.000000e+00 : f32
    %395 = vector.broadcast %cst_172 : f32 to vector<2x32xf32>
    %396 = arith.addf %395, %394 : vector<2x32xf32>
    %397 = arith.divf %395, %396 : vector<2x32xf32>
    %398 = vector.extract_strided_slice %391 {offsets = [0, 32], sizes = [2, 32], strides = [1, 1]} : vector<2x128xf32> to vector<2x32xf32>
    %399 = arith.negf %398 : vector<2x32xf32>
    %400 = math.exp %399 : vector<2x32xf32>
    %cst_173 = arith.constant 1.000000e+00 : f32
    %401 = vector.broadcast %cst_173 : f32 to vector<2x32xf32>
    %402 = arith.addf %401, %400 : vector<2x32xf32>
    %403 = arith.divf %401, %402 : vector<2x32xf32>
    %404 = vector.extract_strided_slice %391 {offsets = [0, 64], sizes = [2, 32], strides = [1, 1]} : vector<2x128xf32> to vector<2x32xf32>
    %405 = math.tanh %404 : vector<2x32xf32>
    %406 = vector.extract_strided_slice %391 {offsets = [0, 96], sizes = [2, 32], strides = [1, 1]} : vector<2x128xf32> to vector<2x32xf32>
    %407 = arith.negf %406 : vector<2x32xf32>
    %408 = math.exp %407 : vector<2x32xf32>
    %cst_174 = arith.constant 1.000000e+00 : f32
    %409 = vector.broadcast %cst_174 : f32 to vector<2x32xf32>
    %410 = arith.addf %409, %408 : vector<2x32xf32>
    %411 = arith.divf %409, %410 : vector<2x32xf32>
    %c0_175 = arith.constant 0 : index
    %c0_176 = arith.constant 0 : index
    %412 = vector.load %arg7[%c0_175, %c0_176] : memref<2x32xf32, #tpu.memory_space<vmem>>, vector<2x32xf32>
    %413 = arith.mulf %403, %412 : vector<2x32xf32>
    %414 = arith.mulf %397, %405 : vector<2x32xf32>
    %415 = arith.addf %413, %414 : vector<2x32xf32>
    %416 = math.tanh %415 : vector<2x32xf32>
    %417 = arith.mulf %411, %416 : vector<2x32xf32>
    %418 = arith.addi %6, %c7_i32 : i32
    %419 = vector.broadcast %418 : i32 to vector<2x1xi32>
    %420 = arith.cmpi sgt, %5, %419 : vector<2x1xi32>
    %c0_177 = arith.constant 0 : index
    %c0_178 = arith.constant 0 : index
    %421 = vector.load %arg7[%c0_177, %c0_178] : memref<2x32xf32, #tpu.memory_space<vmem>>, vector<2x32xf32>
    %422 = vector.shape_cast %420 : vector<2x1xi1> to vector<2x1xi1>
    %423 = vector.broadcast %422 : vector<2x1xi1> to vector<2x32xi1>
    %424 = arith.select %423, %415, %421 : vector<2x32xi1>, vector<2x32xf32>
    %c0_179 = arith.constant 0 : index
    %c0_180 = arith.constant 0 : index
    %425 = vector.load %arg7[%c0_179, %c0_180] : memref<2x32xf32, #tpu.memory_space<vmem>>, vector<2x32xf32>
    tpu.vector_store %arg7[%c0_179, %c0_180], %424 {strides = array<i32>} : memref<2x32xf32, #tpu.memory_space<vmem>>, vector<2x32xf32>,
    %c0_181 = arith.constant 0 : index
    %c0_182 = arith.constant 0 : index
    %426 = vector.load %arg6[%c0_181, %c0_182] : memref<2x32xf32, #tpu.memory_space<vmem>>, vector<2x32xf32>
    %427 = vector.shape_cast %420 : vector<2x1xi1> to vector<2x1xi1>
    %428 = vector.broadcast %427 : vector<2x1xi1> to vector<2x32xi1>
    %429 = arith.select %428, %417, %426 : vector<2x32xi1>, vector<2x32xf32>
    %c0_183 = arith.constant 0 : index
    %c0_184 = arith.constant 0 : index
    %430 = vector.load %arg6[%c0_183, %c0_184] : memref<2x32xf32, #tpu.memory_space<vmem>>, vector<2x32xf32>
    tpu.vector_store %arg6[%c0_183, %c0_184], %429 {strides = array<i32>} : memref<2x32xf32, #tpu.memory_space<vmem>>, vector<2x32xf32>,
    %cst_185 = arith.constant 0.000000e+00 : f32
    %431 = vector.broadcast %cst_185 : f32 to vector<2x32xf32>
    %432 = vector.shape_cast %420 : vector<2x1xi1> to vector<2x1xi1>
    %433 = vector.broadcast %432 : vector<2x1xi1> to vector<2x32xi1>
    %434 = arith.select %433, %417, %431 : vector<2x32xi1>, vector<2x32xf32>
    %c0_186 = arith.constant 0 : index
    %435 = arith.index_cast %c7_i32 : i32 to index
    %c0_187 = arith.constant 0 : index
    %c0_188 = arith.constant 0 : index
    %436 = vector.load %arg5[%c0_186, %435, %c0_187, %c0_188] : memref<1x8x2x32xf32, #tpu.memory_space<vmem>>, vector<1x1x2x32xf32>
    %437 = vector.shape_cast %436 : vector<1x1x2x32xf32> to vector<2x32xf32>
    %438 = vector.shape_cast %434 : vector<2x32xf32> to vector<1x1x2x32xf32>
    tpu.vector_store %arg5[%c0_186, %435, %c0_187, %c0_188], %438 {strides = array<i32>} : memref<1x8x2x32xf32, #tpu.memory_space<vmem>>, vector<1x1x2x32xf32>,
    %c8_i32_189 = arith.constant 8 : i32
    return
  }
  func.func @transform_0(%arg0: i32, %arg1: i32) -> (i32, i32, i32, i32) {
    %c0_i32 = arith.constant 0 : i32
    %c0_i32_0 = arith.constant 0 : i32
    %c0_i32_1 = arith.constant 0 : i32
    return %arg0, %arg1, %c0_i32, %c0_i32_0 : i32, i32, i32, i32
  }
  func.func @transform_1(%arg0: i32, %arg1: i32) -> (i32, i32, i32) {
    %c0_i32 = arith.constant 0 : i32
    %c0_i32_0 = arith.constant 0 : i32
    %c0_i32_1 = arith.constant 0 : i32
    return %arg0, %c0_i32, %c0_i32_0 : i32, i32, i32
  }
  func.func @transform_2(%arg0: i32, %arg1: i32) -> (i32, i32) {
    %c0_i32 = arith.constant 0 : i32
    %c0_i32_0 = arith.constant 0 : i32
    %c0_i32_1 = arith.constant 0 : i32
    return %c0_i32, %c0_i32_0 : i32, i32
  }
  func.func @transform_3(%arg0: i32, %arg1: i32) -> (i32, i32, i32, i32) {
    %c0_i32 = arith.constant 0 : i32
    %c0_i32_0 = arith.constant 0 : i32
    %c0_i32_1 = arith.constant 0 : i32
    return %arg0, %arg1, %c0_i32, %c0_i32_0 : i32, i32, i32, i32
  }
}

module attributes {stable_mosaic.version = 11 : i64} {
  func.func @_matmul_bias_kernel(%arg0: i32, %arg1: memref<32x64xf32, #tpu.memory_space<vmem>>, %arg2: memref<64x256xbf16, #tpu.memory_space<vmem>>, %arg3: memref<1x256xf32, #tpu.memory_space<vmem>>, %arg4: memref<32x256xf32, #tpu.memory_space<vmem>>) attributes {dimension_semantics = [#tpu.dimension_semantics<parallel>], iteration_bounds = array<i64: 1>, scalar_prefetch = 0 : i64, scratch_operands = 0 : i64, tpu.core_type = #tpu.core_type<tc>, window_params = [{transform_indices = @transform_0, window_bounds = array<i64: 32, 64>}, {pipeline_mode = #tpu.pipeline_mode<synchronous>, transform_indices = @transform_1, window_bounds = array<i64: 64, 256>}, {pipeline_mode = #tpu.pipeline_mode<synchronous>, transform_indices = @transform_2, window_bounds = array<i64: 1, 256>}, {transform_indices = @transform_3, window_bounds = array<i64: 32, 256>}]} {
    %c0 = arith.constant 0 : index
    %c0_0 = arith.constant 0 : index
    %0 = vector.load %arg1[%c0, %c0_0] : memref<32x64xf32, #tpu.memory_space<vmem>>, vector<32x64xf32>
    %1 = arith.truncf %0 : vector<32x64xf32> to vector<32x64xbf16>
    %c0_1 = arith.constant 0 : index
    %c0_2 = arith.constant 0 : index
    %2 = vector.load %arg2[%c0_1, %c0_2] : memref<64x256xbf16, #tpu.memory_space<vmem>>, vector<64x256xbf16>
    %cst = arith.constant dense<0.000000e+00> : vector<32x256xf32>
    %3 = tpu.matmul %1, %2, %cst {dimension_numbers = #tpu.dot_dimension_numbers<[1], [0], [0], [1], [0, 0, 1, 1], [], []>} : vector<32x64xbf16>, vector<64x256xbf16>, vector<32x256xf32> -> vector<32x256xf32>
    %c0_3 = arith.constant 0 : index
    %c0_4 = arith.constant 0 : index
    %4 = vector.load %arg3[%c0_3, %c0_4] : memref<1x256xf32, #tpu.memory_space<vmem>>, vector<1x256xf32>
    %5 = vector.broadcast %4 : vector<1x256xf32> to vector<32x256xf32>
    %6 = arith.addf %3, %5 : vector<32x256xf32>
    %c0_5 = arith.constant 0 : index
    %c0_6 = arith.constant 0 : index
    %7 = vector.load %arg4[%c0_5, %c0_6] : memref<32x256xf32, #tpu.memory_space<vmem>>, vector<32x256xf32>
    tpu.vector_store %arg4[%c0_5, %c0_6], %6 {strides = array<i32>} : memref<32x256xf32, #tpu.memory_space<vmem>>, vector<32x256xf32>,
    return
  }
  func.func @transform_0(%arg0: i32) -> (i32, i32) {
    %c0_i32 = arith.constant 0 : i32
    %c0_i32_0 = arith.constant 0 : i32
    return %arg0, %c0_i32 : i32, i32
  }
  func.func @transform_1(%arg0: i32) -> (i32, i32) {
    %c0_i32 = arith.constant 0 : i32
    %c0_i32_0 = arith.constant 0 : i32
    %c0_i32_1 = arith.constant 0 : i32
    return %c0_i32, %c0_i32_0 : i32, i32
  }
  func.func @transform_2(%arg0: i32) -> (i32, i32) {
    %c0_i32 = arith.constant 0 : i32
    %c0_i32_0 = arith.constant 0 : i32
    %c0_i32_1 = arith.constant 0 : i32
    return %c0_i32, %c0_i32_0 : i32, i32
  }
  func.func @transform_3(%arg0: i32) -> (i32, i32) {
    %c0_i32 = arith.constant 0 : i32
    %c0_i32_0 = arith.constant 0 : i32
    return %arg0, %c0_i32 : i32, i32
  }
}

module attributes {stable_mosaic.version = 11 : i64} {
  func.func @_pairmax_proj_kernel(%arg0: i32, %arg1: memref<16x64xf32, #tpu.memory_space<vmem>>, %arg2: memref<16x64xf32, #tpu.memory_space<vmem>>, %arg3: memref<16x1xf32, #tpu.memory_space<vmem>>, %arg4: memref<64x256xbf16, #tpu.memory_space<vmem>>, %arg5: memref<1x256xf32, #tpu.memory_space<vmem>>, %arg6: memref<16x256xf32, #tpu.memory_space<vmem>>) attributes {dimension_semantics = [#tpu.dimension_semantics<parallel>], iteration_bounds = array<i64: 1>, scalar_prefetch = 0 : i64, scratch_operands = 0 : i64, tpu.core_type = #tpu.core_type<tc>, window_params = [{transform_indices = @transform_0, window_bounds = array<i64: 16, 64>}, {transform_indices = @transform_1, window_bounds = array<i64: 16, 64>}, {transform_indices = @transform_2, window_bounds = array<i64: 16, 1>}, {pipeline_mode = #tpu.pipeline_mode<synchronous>, transform_indices = @transform_3, window_bounds = array<i64: 64, 256>}, {pipeline_mode = #tpu.pipeline_mode<synchronous>, transform_indices = @transform_4, window_bounds = array<i64: 1, 256>}, {transform_indices = @transform_5, window_bounds = array<i64: 16, 256>}]} {
    %c0 = arith.constant 0 : index
    %c0_0 = arith.constant 0 : index
    %0 = vector.load %arg1[%c0, %c0_0] : memref<16x64xf32, #tpu.memory_space<vmem>>, vector<16x64xf32>
    %c0_1 = arith.constant 0 : index
    %c0_2 = arith.constant 0 : index
    %1 = vector.load %arg2[%c0_1, %c0_2] : memref<16x64xf32, #tpu.memory_space<vmem>>, vector<16x64xf32>
    %2 = arith.maximumf %0, %1 : vector<16x64xf32>
    %c0_3 = arith.constant 0 : index
    %c0_4 = arith.constant 0 : index
    %3 = vector.load %arg3[%c0_3, %c0_4] : memref<16x1xf32, #tpu.memory_space<vmem>>, vector<16x1xf32>
    %4 = vector.broadcast %3 : vector<16x1xf32> to vector<16x64xf32>
    %5 = arith.mulf %2, %4 : vector<16x64xf32>
    %6 = arith.truncf %5 : vector<16x64xf32> to vector<16x64xbf16>
    %c0_5 = arith.constant 0 : index
    %c0_6 = arith.constant 0 : index
    %7 = vector.load %arg4[%c0_5, %c0_6] : memref<64x256xbf16, #tpu.memory_space<vmem>>, vector<64x256xbf16>
    %cst = arith.constant dense<0.000000e+00> : vector<16x256xf32>
    %8 = tpu.matmul %6, %7, %cst {dimension_numbers = #tpu.dot_dimension_numbers<[1], [0], [0], [1], [0, 0, 1, 1], [], []>} : vector<16x64xbf16>, vector<64x256xbf16>, vector<16x256xf32> -> vector<16x256xf32>
    %c0_7 = arith.constant 0 : index
    %c0_8 = arith.constant 0 : index
    %9 = vector.load %arg5[%c0_7, %c0_8] : memref<1x256xf32, #tpu.memory_space<vmem>>, vector<1x256xf32>
    %10 = vector.broadcast %9 : vector<1x256xf32> to vector<16x256xf32>
    %11 = arith.addf %8, %10 : vector<16x256xf32>
    %c0_9 = arith.constant 0 : index
    %c0_10 = arith.constant 0 : index
    %12 = vector.load %arg6[%c0_9, %c0_10] : memref<16x256xf32, #tpu.memory_space<vmem>>, vector<16x256xf32>
    tpu.vector_store %arg6[%c0_9, %c0_10], %11 {strides = array<i32>} : memref<16x256xf32, #tpu.memory_space<vmem>>, vector<16x256xf32>,
    return
  }
  func.func @transform_0(%arg0: i32) -> (i32, i32) {
    %c0_i32 = arith.constant 0 : i32
    %c0_i32_0 = arith.constant 0 : i32
    return %arg0, %c0_i32 : i32, i32
  }
  func.func @transform_1(%arg0: i32) -> (i32, i32) {
    %c0_i32 = arith.constant 0 : i32
    %c0_i32_0 = arith.constant 0 : i32
    return %arg0, %c0_i32 : i32, i32
  }
  func.func @transform_2(%arg0: i32) -> (i32, i32) {
    %c0_i32 = arith.constant 0 : i32
    %c0_i32_0 = arith.constant 0 : i32
    return %arg0, %c0_i32 : i32, i32
  }
  func.func @transform_3(%arg0: i32) -> (i32, i32) {
    %c0_i32 = arith.constant 0 : i32
    %c0_i32_0 = arith.constant 0 : i32
    %c0_i32_1 = arith.constant 0 : i32
    return %c0_i32, %c0_i32_0 : i32, i32
  }
  func.func @transform_4(%arg0: i32) -> (i32, i32) {
    %c0_i32 = arith.constant 0 : i32
    %c0_i32_0 = arith.constant 0 : i32
    %c0_i32_1 = arith.constant 0 : i32
    return %c0_i32, %c0_i32_0 : i32, i32
  }
  func.func @transform_5(%arg0: i32) -> (i32, i32) {
    %c0_i32 = arith.constant 0 : i32
    %c0_i32_0 = arith.constant 0 : i32
    return %arg0, %c0_i32 : i32, i32
  }
}

module attributes {stable_mosaic.version = 11 : i64} {
  func.func @_bilstm_chunk_kernel(%arg0: i32, %arg1: i32, %arg2: memref<1x8x2x128xf32, #tpu.memory_space<vmem>>, %arg3: memref<1x32x128xbf16, #tpu.memory_space<vmem>>, %arg4: memref<2x1xi32, #tpu.memory_space<vmem>>, %arg5: memref<1x8x2x32xf32, #tpu.memory_space<vmem>>, %arg6: memref<2x32xf32, #tpu.memory_space<vmem>>, %arg7: memref<2x32xf32, #tpu.memory_space<vmem>>) attributes {dimension_semantics = [#tpu.dimension_semantics<parallel>, #tpu.dimension_semantics<arbitrary>], iteration_bounds = array<i64: 2, 1>, scalar_prefetch = 0 : i64, scratch_operands = 2 : i64, tpu.core_type = #tpu.core_type<tc>, window_params = [{transform_indices = @transform_0, window_bounds = array<i64: 1, 8, 2, 128>}, {transform_indices = @transform_1, window_bounds = array<i64: 1, 32, 128>}, {pipeline_mode = #tpu.pipeline_mode<synchronous>, transform_indices = @transform_2, window_bounds = array<i64: 2, 1>}, {transform_indices = @transform_3, window_bounds = array<i64: 1, 8, 2, 32>}]} {
    %c0_i32 = arith.constant 0 : i32
    %0 = arith.cmpi eq, %arg1, %c0_i32 : i32
    %1 = arith.extui %0 : i1 to i32
    %c0_i32_0 = arith.constant 0 : i32
    %2 = arith.cmpi ne, %1, %c0_i32_0 : i32
    scf.if %2 {
      %cst_190 = arith.constant 0.000000e+00 : f32
      %439 = vector.broadcast %cst_190 : f32 to vector<2x32xf32>
      %c0_191 = arith.constant 0 : index
      %c0_192 = arith.constant 0 : index
      %440 = vector.load %arg6[%c0_191, %c0_192] : memref<2x32xf32, #tpu.memory_space<vmem>>, vector<2x32xf32>
      tpu.vector_store %arg6[%c0_191, %c0_192], %439 {strides = array<i32>} : memref<2x32xf32, #tpu.memory_space<vmem>>, vector<2x32xf32>,
      %cst_193 = arith.constant 0.000000e+00 : f32
      %441 = vector.broadcast %cst_193 : f32 to vector<2x32xf32>
      %c0_194 = arith.constant 0 : index
      %c0_195 = arith.constant 0 : index
      %442 = vector.load %arg7[%c0_194, %c0_195] : memref<2x32xf32, #tpu.memory_space<vmem>>, vector<2x32xf32>
      tpu.vector_store %arg7[%c0_194, %c0_195], %441 {strides = array<i32>} : memref<2x32xf32, #tpu.memory_space<vmem>>, vector<2x32xf32>,
    } else {
    }
    %c0 = arith.constant 0 : index
    %c0_1 = arith.constant 0 : index
    %c0_2 = arith.constant 0 : index
    %3 = vector.load %arg3[%c0, %c0_1, %c0_2] : memref<1x32x128xbf16, #tpu.memory_space<vmem>>, vector<1x32x128xbf16>
    %4 = vector.shape_cast %3 : vector<1x32x128xbf16> to vector<32x128xbf16>
    %c0_3 = arith.constant 0 : index
    %c0_4 = arith.constant 0 : index
    %5 = vector.load %arg4[%c0_3, %c0_4] : memref<2x1xi32, #tpu.memory_space<vmem>>, vector<2x1xi32>
    %c8_i32 = arith.constant 8 : i32
    %6 = arith.muli %arg1, %c8_i32 : i32
    %c0_i32_5 = arith.constant 0 : i32
    %c0_6 = arith.constant 0 : index
    %7 = arith.index_cast %c0_i32_5 : i32 to index
    %c0_7 = arith.constant 0 : index
    %c0_8 = arith.constant 0 : index
    %8 = vector.load %arg2[%c0_6, %7, %c0_7, %c0_8] : memref<1x8x2x128xf32, #tpu.memory_space<vmem>>, vector<1x1x2x128xf32>
    %9 = vector.shape_cast %8 : vector<1x1x2x128xf32> to vector<2x128xf32>
    %c0_9 = arith.constant 0 : index
    %c0_10 = arith.constant 0 : index
    %10 = vector.load %arg6[%c0_9, %c0_10] : memref<2x32xf32, #tpu.memory_space<vmem>>, vector<2x32xf32>
    %11 = arith.truncf %10 : vector<2x32xf32> to vector<2x32xbf16>
    %cst = arith.constant dense<0.000000e+00> : vector<2x128xf32>
    %12 = tpu.matmul %11, %4, %cst {dimension_numbers = #tpu.dot_dimension_numbers<[1], [0], [0], [1], [0, 0, 1, 1], [], []>} : vector<2x32xbf16>, vector<32x128xbf16>, vector<2x128xf32> -> vector<2x128xf32>
    %13 = arith.addf %9, %12 : vector<2x128xf32>
    %14 = vector.extract_strided_slice %13 {offsets = [0, 0], sizes = [2, 32], strides = [1, 1]} : vector<2x128xf32> to vector<2x32xf32>
    %15 = arith.negf %14 : vector<2x32xf32>
    %16 = math.exp %15 : vector<2x32xf32>
    %cst_11 = arith.constant 1.000000e+00 : f32
    %17 = vector.broadcast %cst_11 : f32 to vector<2x32xf32>
    %18 = arith.addf %17, %16 : vector<2x32xf32>
    %19 = arith.divf %17, %18 : vector<2x32xf32>
    %20 = vector.extract_strided_slice %13 {offsets = [0, 32], sizes = [2, 32], strides = [1, 1]} : vector<2x128xf32> to vector<2x32xf32>
    %21 = arith.negf %20 : vector<2x32xf32>
    %22 = math.exp %21 : vector<2x32xf32>
    %cst_12 = arith.constant 1.000000e+00 : f32
    %23 = vector.broadcast %cst_12 : f32 to vector<2x32xf32>
    %24 = arith.addf %23, %22 : vector<2x32xf32>
    %25 = arith.divf %23, %24 : vector<2x32xf32>
    %26 = vector.extract_strided_slice %13 {offsets = [0, 64], sizes = [2, 32], strides = [1, 1]} : vector<2x128xf32> to vector<2x32xf32>
    %27 = math.tanh %26 : vector<2x32xf32>
    %28 = vector.extract_strided_slice %13 {offsets = [0, 96], sizes = [2, 32], strides = [1, 1]} : vector<2x128xf32> to vector<2x32xf32>
    %29 = arith.negf %28 : vector<2x32xf32>
    %30 = math.exp %29 : vector<2x32xf32>
    %cst_13 = arith.constant 1.000000e+00 : f32
    %31 = vector.broadcast %cst_13 : f32 to vector<2x32xf32>
    %32 = arith.addf %31, %30 : vector<2x32xf32>
    %33 = arith.divf %31, %32 : vector<2x32xf32>
    %c0_14 = arith.constant 0 : index
    %c0_15 = arith.constant 0 : index
    %34 = vector.load %arg7[%c0_14, %c0_15] : memref<2x32xf32, #tpu.memory_space<vmem>>, vector<2x32xf32>
    %35 = arith.mulf %25, %34 : vector<2x32xf32>
    %36 = arith.mulf %19, %27 : vector<2x32xf32>
    %37 = arith.addf %35, %36 : vector<2x32xf32>
    %38 = math.tanh %37 : vector<2x32xf32>
    %39 = arith.mulf %33, %38 : vector<2x32xf32>
    %40 = arith.addi %6, %c0_i32_5 : i32
    %41 = vector.broadcast %40 : i32 to vector<2x1xi32>
    %42 = arith.cmpi sgt, %5, %41 : vector<2x1xi32>
    %c0_16 = arith.constant 0 : index
    %c0_17 = arith.constant 0 : index
    %43 = vector.load %arg7[%c0_16, %c0_17] : memref<2x32xf32, #tpu.memory_space<vmem>>, vector<2x32xf32>
    %44 = vector.shape_cast %42 : vector<2x1xi1> to vector<2x1xi1>
    %45 = vector.broadcast %44 : vector<2x1xi1> to vector<2x32xi1>
    %46 = arith.select %45, %37, %43 : vector<2x32xi1>, vector<2x32xf32>
    %c0_18 = arith.constant 0 : index
    %c0_19 = arith.constant 0 : index
    %47 = vector.load %arg7[%c0_18, %c0_19] : memref<2x32xf32, #tpu.memory_space<vmem>>, vector<2x32xf32>
    tpu.vector_store %arg7[%c0_18, %c0_19], %46 {strides = array<i32>} : memref<2x32xf32, #tpu.memory_space<vmem>>, vector<2x32xf32>,
    %c0_20 = arith.constant 0 : index
    %c0_21 = arith.constant 0 : index
    %48 = vector.load %arg6[%c0_20, %c0_21] : memref<2x32xf32, #tpu.memory_space<vmem>>, vector<2x32xf32>
    %49 = vector.shape_cast %42 : vector<2x1xi1> to vector<2x1xi1>
    %50 = vector.broadcast %49 : vector<2x1xi1> to vector<2x32xi1>
    %51 = arith.select %50, %39, %48 : vector<2x32xi1>, vector<2x32xf32>
    %c0_22 = arith.constant 0 : index
    %c0_23 = arith.constant 0 : index
    %52 = vector.load %arg6[%c0_22, %c0_23] : memref<2x32xf32, #tpu.memory_space<vmem>>, vector<2x32xf32>
    tpu.vector_store %arg6[%c0_22, %c0_23], %51 {strides = array<i32>} : memref<2x32xf32, #tpu.memory_space<vmem>>, vector<2x32xf32>,
    %cst_24 = arith.constant 0.000000e+00 : f32
    %53 = vector.broadcast %cst_24 : f32 to vector<2x32xf32>
    %54 = vector.shape_cast %42 : vector<2x1xi1> to vector<2x1xi1>
    %55 = vector.broadcast %54 : vector<2x1xi1> to vector<2x32xi1>
    %56 = arith.select %55, %39, %53 : vector<2x32xi1>, vector<2x32xf32>
    %c0_25 = arith.constant 0 : index
    %57 = arith.index_cast %c0_i32_5 : i32 to index
    %c0_26 = arith.constant 0 : index
    %c0_27 = arith.constant 0 : index
    %58 = vector.load %arg5[%c0_25, %57, %c0_26, %c0_27] : memref<1x8x2x32xf32, #tpu.memory_space<vmem>>, vector<1x1x2x32xf32>
    %59 = vector.shape_cast %58 : vector<1x1x2x32xf32> to vector<2x32xf32>
    %60 = vector.shape_cast %56 : vector<2x32xf32> to vector<1x1x2x32xf32>
    tpu.vector_store %arg5[%c0_25, %57, %c0_26, %c0_27], %60 {strides = array<i32>} : memref<1x8x2x32xf32, #tpu.memory_space<vmem>>, vector<1x1x2x32xf32>,
    %c1_i32 = arith.constant 1 : i32
    %c0_28 = arith.constant 0 : index
    %61 = arith.index_cast %c1_i32 : i32 to index
    %c0_29 = arith.constant 0 : index
    %c0_30 = arith.constant 0 : index
    %62 = vector.load %arg2[%c0_28, %61, %c0_29, %c0_30] : memref<1x8x2x128xf32, #tpu.memory_space<vmem>>, vector<1x1x2x128xf32>
    %63 = vector.shape_cast %62 : vector<1x1x2x128xf32> to vector<2x128xf32>
    %c0_31 = arith.constant 0 : index
    %c0_32 = arith.constant 0 : index
    %64 = vector.load %arg6[%c0_31, %c0_32] : memref<2x32xf32, #tpu.memory_space<vmem>>, vector<2x32xf32>
    %65 = arith.truncf %64 : vector<2x32xf32> to vector<2x32xbf16>
    %cst_33 = arith.constant dense<0.000000e+00> : vector<2x128xf32>
    %66 = tpu.matmul %65, %4, %cst_33 {dimension_numbers = #tpu.dot_dimension_numbers<[1], [0], [0], [1], [0, 0, 1, 1], [], []>} : vector<2x32xbf16>, vector<32x128xbf16>, vector<2x128xf32> -> vector<2x128xf32>
    %67 = arith.addf %63, %66 : vector<2x128xf32>
    %68 = vector.extract_strided_slice %67 {offsets = [0, 0], sizes = [2, 32], strides = [1, 1]} : vector<2x128xf32> to vector<2x32xf32>
    %69 = arith.negf %68 : vector<2x32xf32>
    %70 = math.exp %69 : vector<2x32xf32>
    %cst_34 = arith.constant 1.000000e+00 : f32
    %71 = vector.broadcast %cst_34 : f32 to vector<2x32xf32>
    %72 = arith.addf %71, %70 : vector<2x32xf32>
    %73 = arith.divf %71, %72 : vector<2x32xf32>
    %74 = vector.extract_strided_slice %67 {offsets = [0, 32], sizes = [2, 32], strides = [1, 1]} : vector<2x128xf32> to vector<2x32xf32>
    %75 = arith.negf %74 : vector<2x32xf32>
    %76 = math.exp %75 : vector<2x32xf32>
    %cst_35 = arith.constant 1.000000e+00 : f32
    %77 = vector.broadcast %cst_35 : f32 to vector<2x32xf32>
    %78 = arith.addf %77, %76 : vector<2x32xf32>
    %79 = arith.divf %77, %78 : vector<2x32xf32>
    %80 = vector.extract_strided_slice %67 {offsets = [0, 64], sizes = [2, 32], strides = [1, 1]} : vector<2x128xf32> to vector<2x32xf32>
    %81 = math.tanh %80 : vector<2x32xf32>
    %82 = vector.extract_strided_slice %67 {offsets = [0, 96], sizes = [2, 32], strides = [1, 1]} : vector<2x128xf32> to vector<2x32xf32>
    %83 = arith.negf %82 : vector<2x32xf32>
    %84 = math.exp %83 : vector<2x32xf32>
    %cst_36 = arith.constant 1.000000e+00 : f32
    %85 = vector.broadcast %cst_36 : f32 to vector<2x32xf32>
    %86 = arith.addf %85, %84 : vector<2x32xf32>
    %87 = arith.divf %85, %86 : vector<2x32xf32>
    %c0_37 = arith.constant 0 : index
    %c0_38 = arith.constant 0 : index
    %88 = vector.load %arg7[%c0_37, %c0_38] : memref<2x32xf32, #tpu.memory_space<vmem>>, vector<2x32xf32>
    %89 = arith.mulf %79, %88 : vector<2x32xf32>
    %90 = arith.mulf %73, %81 : vector<2x32xf32>
    %91 = arith.addf %89, %90 : vector<2x32xf32>
    %92 = math.tanh %91 : vector<2x32xf32>
    %93 = arith.mulf %87, %92 : vector<2x32xf32>
    %94 = arith.addi %6, %c1_i32 : i32
    %95 = vector.broadcast %94 : i32 to vector<2x1xi32>
    %96 = arith.cmpi sgt, %5, %95 : vector<2x1xi32>
    %c0_39 = arith.constant 0 : index
    %c0_40 = arith.constant 0 : index
    %97 = vector.load %arg7[%c0_39, %c0_40] : memref<2x32xf32, #tpu.memory_space<vmem>>, vector<2x32xf32>
    %98 = vector.shape_cast %96 : vector<2x1xi1> to vector<2x1xi1>
    %99 = vector.broadcast %98 : vector<2x1xi1> to vector<2x32xi1>
    %100 = arith.select %99, %91, %97 : vector<2x32xi1>, vector<2x32xf32>
    %c0_41 = arith.constant 0 : index
    %c0_42 = arith.constant 0 : index
    %101 = vector.load %arg7[%c0_41, %c0_42] : memref<2x32xf32, #tpu.memory_space<vmem>>, vector<2x32xf32>
    tpu.vector_store %arg7[%c0_41, %c0_42], %100 {strides = array<i32>} : memref<2x32xf32, #tpu.memory_space<vmem>>, vector<2x32xf32>,
    %c0_43 = arith.constant 0 : index
    %c0_44 = arith.constant 0 : index
    %102 = vector.load %arg6[%c0_43, %c0_44] : memref<2x32xf32, #tpu.memory_space<vmem>>, vector<2x32xf32>
    %103 = vector.shape_cast %96 : vector<2x1xi1> to vector<2x1xi1>
    %104 = vector.broadcast %103 : vector<2x1xi1> to vector<2x32xi1>
    %105 = arith.select %104, %93, %102 : vector<2x32xi1>, vector<2x32xf32>
    %c0_45 = arith.constant 0 : index
    %c0_46 = arith.constant 0 : index
    %106 = vector.load %arg6[%c0_45, %c0_46] : memref<2x32xf32, #tpu.memory_space<vmem>>, vector<2x32xf32>
    tpu.vector_store %arg6[%c0_45, %c0_46], %105 {strides = array<i32>} : memref<2x32xf32, #tpu.memory_space<vmem>>, vector<2x32xf32>,
    %cst_47 = arith.constant 0.000000e+00 : f32
    %107 = vector.broadcast %cst_47 : f32 to vector<2x32xf32>
    %108 = vector.shape_cast %96 : vector<2x1xi1> to vector<2x1xi1>
    %109 = vector.broadcast %108 : vector<2x1xi1> to vector<2x32xi1>
    %110 = arith.select %109, %93, %107 : vector<2x32xi1>, vector<2x32xf32>
    %c0_48 = arith.constant 0 : index
    %111 = arith.index_cast %c1_i32 : i32 to index
    %c0_49 = arith.constant 0 : index
    %c0_50 = arith.constant 0 : index
    %112 = vector.load %arg5[%c0_48, %111, %c0_49, %c0_50] : memref<1x8x2x32xf32, #tpu.memory_space<vmem>>, vector<1x1x2x32xf32>
    %113 = vector.shape_cast %112 : vector<1x1x2x32xf32> to vector<2x32xf32>
    %114 = vector.shape_cast %110 : vector<2x32xf32> to vector<1x1x2x32xf32>
    tpu.vector_store %arg5[%c0_48, %111, %c0_49, %c0_50], %114 {strides = array<i32>} : memref<1x8x2x32xf32, #tpu.memory_space<vmem>>, vector<1x1x2x32xf32>,
    %c2_i32 = arith.constant 2 : i32
    %c0_51 = arith.constant 0 : index
    %115 = arith.index_cast %c2_i32 : i32 to index
    %c0_52 = arith.constant 0 : index
    %c0_53 = arith.constant 0 : index
    %116 = vector.load %arg2[%c0_51, %115, %c0_52, %c0_53] : memref<1x8x2x128xf32, #tpu.memory_space<vmem>>, vector<1x1x2x128xf32>
    %117 = vector.shape_cast %116 : vector<1x1x2x128xf32> to vector<2x128xf32>
    %c0_54 = arith.constant 0 : index
    %c0_55 = arith.constant 0 : index
    %118 = vector.load %arg6[%c0_54, %c0_55] : memref<2x32xf32, #tpu.memory_space<vmem>>, vector<2x32xf32>
    %119 = arith.truncf %118 : vector<2x32xf32> to vector<2x32xbf16>
    %cst_56 = arith.constant dense<0.000000e+00> : vector<2x128xf32>
    %120 = tpu.matmul %119, %4, %cst_56 {dimension_numbers = #tpu.dot_dimension_numbers<[1], [0], [0], [1], [0, 0, 1, 1], [], []>} : vector<2x32xbf16>, vector<32x128xbf16>, vector<2x128xf32> -> vector<2x128xf32>
    %121 = arith.addf %117, %120 : vector<2x128xf32>
    %122 = vector.extract_strided_slice %121 {offsets = [0, 0], sizes = [2, 32], strides = [1, 1]} : vector<2x128xf32> to vector<2x32xf32>
    %123 = arith.negf %122 : vector<2x32xf32>
    %124 = math.exp %123 : vector<2x32xf32>
    %cst_57 = arith.constant 1.000000e+00 : f32
    %125 = vector.broadcast %cst_57 : f32 to vector<2x32xf32>
    %126 = arith.addf %125, %124 : vector<2x32xf32>
    %127 = arith.divf %125, %126 : vector<2x32xf32>
    %128 = vector.extract_strided_slice %121 {offsets = [0, 32], sizes = [2, 32], strides = [1, 1]} : vector<2x128xf32> to vector<2x32xf32>
    %129 = arith.negf %128 : vector<2x32xf32>
    %130 = math.exp %129 : vector<2x32xf32>
    %cst_58 = arith.constant 1.000000e+00 : f32
    %131 = vector.broadcast %cst_58 : f32 to vector<2x32xf32>
    %132 = arith.addf %131, %130 : vector<2x32xf32>
    %133 = arith.divf %131, %132 : vector<2x32xf32>
    %134 = vector.extract_strided_slice %121 {offsets = [0, 64], sizes = [2, 32], strides = [1, 1]} : vector<2x128xf32> to vector<2x32xf32>
    %135 = math.tanh %134 : vector<2x32xf32>
    %136 = vector.extract_strided_slice %121 {offsets = [0, 96], sizes = [2, 32], strides = [1, 1]} : vector<2x128xf32> to vector<2x32xf32>
    %137 = arith.negf %136 : vector<2x32xf32>
    %138 = math.exp %137 : vector<2x32xf32>
    %cst_59 = arith.constant 1.000000e+00 : f32
    %139 = vector.broadcast %cst_59 : f32 to vector<2x32xf32>
    %140 = arith.addf %139, %138 : vector<2x32xf32>
    %141 = arith.divf %139, %140 : vector<2x32xf32>
    %c0_60 = arith.constant 0 : index
    %c0_61 = arith.constant 0 : index
    %142 = vector.load %arg7[%c0_60, %c0_61] : memref<2x32xf32, #tpu.memory_space<vmem>>, vector<2x32xf32>
    %143 = arith.mulf %133, %142 : vector<2x32xf32>
    %144 = arith.mulf %127, %135 : vector<2x32xf32>
    %145 = arith.addf %143, %144 : vector<2x32xf32>
    %146 = math.tanh %145 : vector<2x32xf32>
    %147 = arith.mulf %141, %146 : vector<2x32xf32>
    %148 = arith.addi %6, %c2_i32 : i32
    %149 = vector.broadcast %148 : i32 to vector<2x1xi32>
    %150 = arith.cmpi sgt, %5, %149 : vector<2x1xi32>
    %c0_62 = arith.constant 0 : index
    %c0_63 = arith.constant 0 : index
    %151 = vector.load %arg7[%c0_62, %c0_63] : memref<2x32xf32, #tpu.memory_space<vmem>>, vector<2x32xf32>
    %152 = vector.shape_cast %150 : vector<2x1xi1> to vector<2x1xi1>
    %153 = vector.broadcast %152 : vector<2x1xi1> to vector<2x32xi1>
    %154 = arith.select %153, %145, %151 : vector<2x32xi1>, vector<2x32xf32>
    %c0_64 = arith.constant 0 : index
    %c0_65 = arith.constant 0 : index
    %155 = vector.load %arg7[%c0_64, %c0_65] : memref<2x32xf32, #tpu.memory_space<vmem>>, vector<2x32xf32>
    tpu.vector_store %arg7[%c0_64, %c0_65], %154 {strides = array<i32>} : memref<2x32xf32, #tpu.memory_space<vmem>>, vector<2x32xf32>,
    %c0_66 = arith.constant 0 : index
    %c0_67 = arith.constant 0 : index
    %156 = vector.load %arg6[%c0_66, %c0_67] : memref<2x32xf32, #tpu.memory_space<vmem>>, vector<2x32xf32>
    %157 = vector.shape_cast %150 : vector<2x1xi1> to vector<2x1xi1>
    %158 = vector.broadcast %157 : vector<2x1xi1> to vector<2x32xi1>
    %159 = arith.select %158, %147, %156 : vector<2x32xi1>, vector<2x32xf32>
    %c0_68 = arith.constant 0 : index
    %c0_69 = arith.constant 0 : index
    %160 = vector.load %arg6[%c0_68, %c0_69] : memref<2x32xf32, #tpu.memory_space<vmem>>, vector<2x32xf32>
    tpu.vector_store %arg6[%c0_68, %c0_69], %159 {strides = array<i32>} : memref<2x32xf32, #tpu.memory_space<vmem>>, vector<2x32xf32>,
    %cst_70 = arith.constant 0.000000e+00 : f32
    %161 = vector.broadcast %cst_70 : f32 to vector<2x32xf32>
    %162 = vector.shape_cast %150 : vector<2x1xi1> to vector<2x1xi1>
    %163 = vector.broadcast %162 : vector<2x1xi1> to vector<2x32xi1>
    %164 = arith.select %163, %147, %161 : vector<2x32xi1>, vector<2x32xf32>
    %c0_71 = arith.constant 0 : index
    %165 = arith.index_cast %c2_i32 : i32 to index
    %c0_72 = arith.constant 0 : index
    %c0_73 = arith.constant 0 : index
    %166 = vector.load %arg5[%c0_71, %165, %c0_72, %c0_73] : memref<1x8x2x32xf32, #tpu.memory_space<vmem>>, vector<1x1x2x32xf32>
    %167 = vector.shape_cast %166 : vector<1x1x2x32xf32> to vector<2x32xf32>
    %168 = vector.shape_cast %164 : vector<2x32xf32> to vector<1x1x2x32xf32>
    tpu.vector_store %arg5[%c0_71, %165, %c0_72, %c0_73], %168 {strides = array<i32>} : memref<1x8x2x32xf32, #tpu.memory_space<vmem>>, vector<1x1x2x32xf32>,
    %c3_i32 = arith.constant 3 : i32
    %c0_74 = arith.constant 0 : index
    %169 = arith.index_cast %c3_i32 : i32 to index
    %c0_75 = arith.constant 0 : index
    %c0_76 = arith.constant 0 : index
    %170 = vector.load %arg2[%c0_74, %169, %c0_75, %c0_76] : memref<1x8x2x128xf32, #tpu.memory_space<vmem>>, vector<1x1x2x128xf32>
    %171 = vector.shape_cast %170 : vector<1x1x2x128xf32> to vector<2x128xf32>
    %c0_77 = arith.constant 0 : index
    %c0_78 = arith.constant 0 : index
    %172 = vector.load %arg6[%c0_77, %c0_78] : memref<2x32xf32, #tpu.memory_space<vmem>>, vector<2x32xf32>
    %173 = arith.truncf %172 : vector<2x32xf32> to vector<2x32xbf16>
    %cst_79 = arith.constant dense<0.000000e+00> : vector<2x128xf32>
    %174 = tpu.matmul %173, %4, %cst_79 {dimension_numbers = #tpu.dot_dimension_numbers<[1], [0], [0], [1], [0, 0, 1, 1], [], []>} : vector<2x32xbf16>, vector<32x128xbf16>, vector<2x128xf32> -> vector<2x128xf32>
    %175 = arith.addf %171, %174 : vector<2x128xf32>
    %176 = vector.extract_strided_slice %175 {offsets = [0, 0], sizes = [2, 32], strides = [1, 1]} : vector<2x128xf32> to vector<2x32xf32>
    %177 = arith.negf %176 : vector<2x32xf32>
    %178 = math.exp %177 : vector<2x32xf32>
    %cst_80 = arith.constant 1.000000e+00 : f32
    %179 = vector.broadcast %cst_80 : f32 to vector<2x32xf32>
    %180 = arith.addf %179, %178 : vector<2x32xf32>
    %181 = arith.divf %179, %180 : vector<2x32xf32>
    %182 = vector.extract_strided_slice %175 {offsets = [0, 32], sizes = [2, 32], strides = [1, 1]} : vector<2x128xf32> to vector<2x32xf32>
    %183 = arith.negf %182 : vector<2x32xf32>
    %184 = math.exp %183 : vector<2x32xf32>
    %cst_81 = arith.constant 1.000000e+00 : f32
    %185 = vector.broadcast %cst_81 : f32 to vector<2x32xf32>
    %186 = arith.addf %185, %184 : vector<2x32xf32>
    %187 = arith.divf %185, %186 : vector<2x32xf32>
    %188 = vector.extract_strided_slice %175 {offsets = [0, 64], sizes = [2, 32], strides = [1, 1]} : vector<2x128xf32> to vector<2x32xf32>
    %189 = math.tanh %188 : vector<2x32xf32>
    %190 = vector.extract_strided_slice %175 {offsets = [0, 96], sizes = [2, 32], strides = [1, 1]} : vector<2x128xf32> to vector<2x32xf32>
    %191 = arith.negf %190 : vector<2x32xf32>
    %192 = math.exp %191 : vector<2x32xf32>
    %cst_82 = arith.constant 1.000000e+00 : f32
    %193 = vector.broadcast %cst_82 : f32 to vector<2x32xf32>
    %194 = arith.addf %193, %192 : vector<2x32xf32>
    %195 = arith.divf %193, %194 : vector<2x32xf32>
    %c0_83 = arith.constant 0 : index
    %c0_84 = arith.constant 0 : index
    %196 = vector.load %arg7[%c0_83, %c0_84] : memref<2x32xf32, #tpu.memory_space<vmem>>, vector<2x32xf32>
    %197 = arith.mulf %187, %196 : vector<2x32xf32>
    %198 = arith.mulf %181, %189 : vector<2x32xf32>
    %199 = arith.addf %197, %198 : vector<2x32xf32>
    %200 = math.tanh %199 : vector<2x32xf32>
    %201 = arith.mulf %195, %200 : vector<2x32xf32>
    %202 = arith.addi %6, %c3_i32 : i32
    %203 = vector.broadcast %202 : i32 to vector<2x1xi32>
    %204 = arith.cmpi sgt, %5, %203 : vector<2x1xi32>
    %c0_85 = arith.constant 0 : index
    %c0_86 = arith.constant 0 : index
    %205 = vector.load %arg7[%c0_85, %c0_86] : memref<2x32xf32, #tpu.memory_space<vmem>>, vector<2x32xf32>
    %206 = vector.shape_cast %204 : vector<2x1xi1> to vector<2x1xi1>
    %207 = vector.broadcast %206 : vector<2x1xi1> to vector<2x32xi1>
    %208 = arith.select %207, %199, %205 : vector<2x32xi1>, vector<2x32xf32>
    %c0_87 = arith.constant 0 : index
    %c0_88 = arith.constant 0 : index
    %209 = vector.load %arg7[%c0_87, %c0_88] : memref<2x32xf32, #tpu.memory_space<vmem>>, vector<2x32xf32>
    tpu.vector_store %arg7[%c0_87, %c0_88], %208 {strides = array<i32>} : memref<2x32xf32, #tpu.memory_space<vmem>>, vector<2x32xf32>,
    %c0_89 = arith.constant 0 : index
    %c0_90 = arith.constant 0 : index
    %210 = vector.load %arg6[%c0_89, %c0_90] : memref<2x32xf32, #tpu.memory_space<vmem>>, vector<2x32xf32>
    %211 = vector.shape_cast %204 : vector<2x1xi1> to vector<2x1xi1>
    %212 = vector.broadcast %211 : vector<2x1xi1> to vector<2x32xi1>
    %213 = arith.select %212, %201, %210 : vector<2x32xi1>, vector<2x32xf32>
    %c0_91 = arith.constant 0 : index
    %c0_92 = arith.constant 0 : index
    %214 = vector.load %arg6[%c0_91, %c0_92] : memref<2x32xf32, #tpu.memory_space<vmem>>, vector<2x32xf32>
    tpu.vector_store %arg6[%c0_91, %c0_92], %213 {strides = array<i32>} : memref<2x32xf32, #tpu.memory_space<vmem>>, vector<2x32xf32>,
    %cst_93 = arith.constant 0.000000e+00 : f32
    %215 = vector.broadcast %cst_93 : f32 to vector<2x32xf32>
    %216 = vector.shape_cast %204 : vector<2x1xi1> to vector<2x1xi1>
    %217 = vector.broadcast %216 : vector<2x1xi1> to vector<2x32xi1>
    %218 = arith.select %217, %201, %215 : vector<2x32xi1>, vector<2x32xf32>
    %c0_94 = arith.constant 0 : index
    %219 = arith.index_cast %c3_i32 : i32 to index
    %c0_95 = arith.constant 0 : index
    %c0_96 = arith.constant 0 : index
    %220 = vector.load %arg5[%c0_94, %219, %c0_95, %c0_96] : memref<1x8x2x32xf32, #tpu.memory_space<vmem>>, vector<1x1x2x32xf32>
    %221 = vector.shape_cast %220 : vector<1x1x2x32xf32> to vector<2x32xf32>
    %222 = vector.shape_cast %218 : vector<2x32xf32> to vector<1x1x2x32xf32>
    tpu.vector_store %arg5[%c0_94, %219, %c0_95, %c0_96], %222 {strides = array<i32>} : memref<1x8x2x32xf32, #tpu.memory_space<vmem>>, vector<1x1x2x32xf32>,
    %c4_i32 = arith.constant 4 : i32
    %c0_97 = arith.constant 0 : index
    %223 = arith.index_cast %c4_i32 : i32 to index
    %c0_98 = arith.constant 0 : index
    %c0_99 = arith.constant 0 : index
    %224 = vector.load %arg2[%c0_97, %223, %c0_98, %c0_99] : memref<1x8x2x128xf32, #tpu.memory_space<vmem>>, vector<1x1x2x128xf32>
    %225 = vector.shape_cast %224 : vector<1x1x2x128xf32> to vector<2x128xf32>
    %c0_100 = arith.constant 0 : index
    %c0_101 = arith.constant 0 : index
    %226 = vector.load %arg6[%c0_100, %c0_101] : memref<2x32xf32, #tpu.memory_space<vmem>>, vector<2x32xf32>
    %227 = arith.truncf %226 : vector<2x32xf32> to vector<2x32xbf16>
    %cst_102 = arith.constant dense<0.000000e+00> : vector<2x128xf32>
    %228 = tpu.matmul %227, %4, %cst_102 {dimension_numbers = #tpu.dot_dimension_numbers<[1], [0], [0], [1], [0, 0, 1, 1], [], []>} : vector<2x32xbf16>, vector<32x128xbf16>, vector<2x128xf32> -> vector<2x128xf32>
    %229 = arith.addf %225, %228 : vector<2x128xf32>
    %230 = vector.extract_strided_slice %229 {offsets = [0, 0], sizes = [2, 32], strides = [1, 1]} : vector<2x128xf32> to vector<2x32xf32>
    %231 = arith.negf %230 : vector<2x32xf32>
    %232 = math.exp %231 : vector<2x32xf32>
    %cst_103 = arith.constant 1.000000e+00 : f32
    %233 = vector.broadcast %cst_103 : f32 to vector<2x32xf32>
    %234 = arith.addf %233, %232 : vector<2x32xf32>
    %235 = arith.divf %233, %234 : vector<2x32xf32>
    %236 = vector.extract_strided_slice %229 {offsets = [0, 32], sizes = [2, 32], strides = [1, 1]} : vector<2x128xf32> to vector<2x32xf32>
    %237 = arith.negf %236 : vector<2x32xf32>
    %238 = math.exp %237 : vector<2x32xf32>
    %cst_104 = arith.constant 1.000000e+00 : f32
    %239 = vector.broadcast %cst_104 : f32 to vector<2x32xf32>
    %240 = arith.addf %239, %238 : vector<2x32xf32>
    %241 = arith.divf %239, %240 : vector<2x32xf32>
    %242 = vector.extract_strided_slice %229 {offsets = [0, 64], sizes = [2, 32], strides = [1, 1]} : vector<2x128xf32> to vector<2x32xf32>
    %243 = math.tanh %242 : vector<2x32xf32>
    %244 = vector.extract_strided_slice %229 {offsets = [0, 96], sizes = [2, 32], strides = [1, 1]} : vector<2x128xf32> to vector<2x32xf32>
    %245 = arith.negf %244 : vector<2x32xf32>
    %246 = math.exp %245 : vector<2x32xf32>
    %cst_105 = arith.constant 1.000000e+00 : f32
    %247 = vector.broadcast %cst_105 : f32 to vector<2x32xf32>
    %248 = arith.addf %247, %246 : vector<2x32xf32>
    %249 = arith.divf %247, %248 : vector<2x32xf32>
    %c0_106 = arith.constant 0 : index
    %c0_107 = arith.constant 0 : index
    %250 = vector.load %arg7[%c0_106, %c0_107] : memref<2x32xf32, #tpu.memory_space<vmem>>, vector<2x32xf32>
    %251 = arith.mulf %241, %250 : vector<2x32xf32>
    %252 = arith.mulf %235, %243 : vector<2x32xf32>
    %253 = arith.addf %251, %252 : vector<2x32xf32>
    %254 = math.tanh %253 : vector<2x32xf32>
    %255 = arith.mulf %249, %254 : vector<2x32xf32>
    %256 = arith.addi %6, %c4_i32 : i32
    %257 = vector.broadcast %256 : i32 to vector<2x1xi32>
    %258 = arith.cmpi sgt, %5, %257 : vector<2x1xi32>
    %c0_108 = arith.constant 0 : index
    %c0_109 = arith.constant 0 : index
    %259 = vector.load %arg7[%c0_108, %c0_109] : memref<2x32xf32, #tpu.memory_space<vmem>>, vector<2x32xf32>
    %260 = vector.shape_cast %258 : vector<2x1xi1> to vector<2x1xi1>
    %261 = vector.broadcast %260 : vector<2x1xi1> to vector<2x32xi1>
    %262 = arith.select %261, %253, %259 : vector<2x32xi1>, vector<2x32xf32>
    %c0_110 = arith.constant 0 : index
    %c0_111 = arith.constant 0 : index
    %263 = vector.load %arg7[%c0_110, %c0_111] : memref<2x32xf32, #tpu.memory_space<vmem>>, vector<2x32xf32>
    tpu.vector_store %arg7[%c0_110, %c0_111], %262 {strides = array<i32>} : memref<2x32xf32, #tpu.memory_space<vmem>>, vector<2x32xf32>,
    %c0_112 = arith.constant 0 : index
    %c0_113 = arith.constant 0 : index
    %264 = vector.load %arg6[%c0_112, %c0_113] : memref<2x32xf32, #tpu.memory_space<vmem>>, vector<2x32xf32>
    %265 = vector.shape_cast %258 : vector<2x1xi1> to vector<2x1xi1>
    %266 = vector.broadcast %265 : vector<2x1xi1> to vector<2x32xi1>
    %267 = arith.select %266, %255, %264 : vector<2x32xi1>, vector<2x32xf32>
    %c0_114 = arith.constant 0 : index
    %c0_115 = arith.constant 0 : index
    %268 = vector.load %arg6[%c0_114, %c0_115] : memref<2x32xf32, #tpu.memory_space<vmem>>, vector<2x32xf32>
    tpu.vector_store %arg6[%c0_114, %c0_115], %267 {strides = array<i32>} : memref<2x32xf32, #tpu.memory_space<vmem>>, vector<2x32xf32>,
    %cst_116 = arith.constant 0.000000e+00 : f32
    %269 = vector.broadcast %cst_116 : f32 to vector<2x32xf32>
    %270 = vector.shape_cast %258 : vector<2x1xi1> to vector<2x1xi1>
    %271 = vector.broadcast %270 : vector<2x1xi1> to vector<2x32xi1>
    %272 = arith.select %271, %255, %269 : vector<2x32xi1>, vector<2x32xf32>
    %c0_117 = arith.constant 0 : index
    %273 = arith.index_cast %c4_i32 : i32 to index
    %c0_118 = arith.constant 0 : index
    %c0_119 = arith.constant 0 : index
    %274 = vector.load %arg5[%c0_117, %273, %c0_118, %c0_119] : memref<1x8x2x32xf32, #tpu.memory_space<vmem>>, vector<1x1x2x32xf32>
    %275 = vector.shape_cast %274 : vector<1x1x2x32xf32> to vector<2x32xf32>
    %276 = vector.shape_cast %272 : vector<2x32xf32> to vector<1x1x2x32xf32>
    tpu.vector_store %arg5[%c0_117, %273, %c0_118, %c0_119], %276 {strides = array<i32>} : memref<1x8x2x32xf32, #tpu.memory_space<vmem>>, vector<1x1x2x32xf32>,
    %c5_i32 = arith.constant 5 : i32
    %c0_120 = arith.constant 0 : index
    %277 = arith.index_cast %c5_i32 : i32 to index
    %c0_121 = arith.constant 0 : index
    %c0_122 = arith.constant 0 : index
    %278 = vector.load %arg2[%c0_120, %277, %c0_121, %c0_122] : memref<1x8x2x128xf32, #tpu.memory_space<vmem>>, vector<1x1x2x128xf32>
    %279 = vector.shape_cast %278 : vector<1x1x2x128xf32> to vector<2x128xf32>
    %c0_123 = arith.constant 0 : index
    %c0_124 = arith.constant 0 : index
    %280 = vector.load %arg6[%c0_123, %c0_124] : memref<2x32xf32, #tpu.memory_space<vmem>>, vector<2x32xf32>
    %281 = arith.truncf %280 : vector<2x32xf32> to vector<2x32xbf16>
    %cst_125 = arith.constant dense<0.000000e+00> : vector<2x128xf32>
    %282 = tpu.matmul %281, %4, %cst_125 {dimension_numbers = #tpu.dot_dimension_numbers<[1], [0], [0], [1], [0, 0, 1, 1], [], []>} : vector<2x32xbf16>, vector<32x128xbf16>, vector<2x128xf32> -> vector<2x128xf32>
    %283 = arith.addf %279, %282 : vector<2x128xf32>
    %284 = vector.extract_strided_slice %283 {offsets = [0, 0], sizes = [2, 32], strides = [1, 1]} : vector<2x128xf32> to vector<2x32xf32>
    %285 = arith.negf %284 : vector<2x32xf32>
    %286 = math.exp %285 : vector<2x32xf32>
    %cst_126 = arith.constant 1.000000e+00 : f32
    %287 = vector.broadcast %cst_126 : f32 to vector<2x32xf32>
    %288 = arith.addf %287, %286 : vector<2x32xf32>
    %289 = arith.divf %287, %288 : vector<2x32xf32>
    %290 = vector.extract_strided_slice %283 {offsets = [0, 32], sizes = [2, 32], strides = [1, 1]} : vector<2x128xf32> to vector<2x32xf32>
    %291 = arith.negf %290 : vector<2x32xf32>
    %292 = math.exp %291 : vector<2x32xf32>
    %cst_127 = arith.constant 1.000000e+00 : f32
    %293 = vector.broadcast %cst_127 : f32 to vector<2x32xf32>
    %294 = arith.addf %293, %292 : vector<2x32xf32>
    %295 = arith.divf %293, %294 : vector<2x32xf32>
    %296 = vector.extract_strided_slice %283 {offsets = [0, 64], sizes = [2, 32], strides = [1, 1]} : vector<2x128xf32> to vector<2x32xf32>
    %297 = math.tanh %296 : vector<2x32xf32>
    %298 = vector.extract_strided_slice %283 {offsets = [0, 96], sizes = [2, 32], strides = [1, 1]} : vector<2x128xf32> to vector<2x32xf32>
    %299 = arith.negf %298 : vector<2x32xf32>
    %300 = math.exp %299 : vector<2x32xf32>
    %cst_128 = arith.constant 1.000000e+00 : f32
    %301 = vector.broadcast %cst_128 : f32 to vector<2x32xf32>
    %302 = arith.addf %301, %300 : vector<2x32xf32>
    %303 = arith.divf %301, %302 : vector<2x32xf32>
    %c0_129 = arith.constant 0 : index
    %c0_130 = arith.constant 0 : index
    %304 = vector.load %arg7[%c0_129, %c0_130] : memref<2x32xf32, #tpu.memory_space<vmem>>, vector<2x32xf32>
    %305 = arith.mulf %295, %304 : vector<2x32xf32>
    %306 = arith.mulf %289, %297 : vector<2x32xf32>
    %307 = arith.addf %305, %306 : vector<2x32xf32>
    %308 = math.tanh %307 : vector<2x32xf32>
    %309 = arith.mulf %303, %308 : vector<2x32xf32>
    %310 = arith.addi %6, %c5_i32 : i32
    %311 = vector.broadcast %310 : i32 to vector<2x1xi32>
    %312 = arith.cmpi sgt, %5, %311 : vector<2x1xi32>
    %c0_131 = arith.constant 0 : index
    %c0_132 = arith.constant 0 : index
    %313 = vector.load %arg7[%c0_131, %c0_132] : memref<2x32xf32, #tpu.memory_space<vmem>>, vector<2x32xf32>
    %314 = vector.shape_cast %312 : vector<2x1xi1> to vector<2x1xi1>
    %315 = vector.broadcast %314 : vector<2x1xi1> to vector<2x32xi1>
    %316 = arith.select %315, %307, %313 : vector<2x32xi1>, vector<2x32xf32>
    %c0_133 = arith.constant 0 : index
    %c0_134 = arith.constant 0 : index
    %317 = vector.load %arg7[%c0_133, %c0_134] : memref<2x32xf32, #tpu.memory_space<vmem>>, vector<2x32xf32>
    tpu.vector_store %arg7[%c0_133, %c0_134], %316 {strides = array<i32>} : memref<2x32xf32, #tpu.memory_space<vmem>>, vector<2x32xf32>,
    %c0_135 = arith.constant 0 : index
    %c0_136 = arith.constant 0 : index
    %318 = vector.load %arg6[%c0_135, %c0_136] : memref<2x32xf32, #tpu.memory_space<vmem>>, vector<2x32xf32>
    %319 = vector.shape_cast %312 : vector<2x1xi1> to vector<2x1xi1>
    %320 = vector.broadcast %319 : vector<2x1xi1> to vector<2x32xi1>
    %321 = arith.select %320, %309, %318 : vector<2x32xi1>, vector<2x32xf32>
    %c0_137 = arith.constant 0 : index
    %c0_138 = arith.constant 0 : index
    %322 = vector.load %arg6[%c0_137, %c0_138] : memref<2x32xf32, #tpu.memory_space<vmem>>, vector<2x32xf32>
    tpu.vector_store %arg6[%c0_137, %c0_138], %321 {strides = array<i32>} : memref<2x32xf32, #tpu.memory_space<vmem>>, vector<2x32xf32>,
    %cst_139 = arith.constant 0.000000e+00 : f32
    %323 = vector.broadcast %cst_139 : f32 to vector<2x32xf32>
    %324 = vector.shape_cast %312 : vector<2x1xi1> to vector<2x1xi1>
    %325 = vector.broadcast %324 : vector<2x1xi1> to vector<2x32xi1>
    %326 = arith.select %325, %309, %323 : vector<2x32xi1>, vector<2x32xf32>
    %c0_140 = arith.constant 0 : index
    %327 = arith.index_cast %c5_i32 : i32 to index
    %c0_141 = arith.constant 0 : index
    %c0_142 = arith.constant 0 : index
    %328 = vector.load %arg5[%c0_140, %327, %c0_141, %c0_142] : memref<1x8x2x32xf32, #tpu.memory_space<vmem>>, vector<1x1x2x32xf32>
    %329 = vector.shape_cast %328 : vector<1x1x2x32xf32> to vector<2x32xf32>
    %330 = vector.shape_cast %326 : vector<2x32xf32> to vector<1x1x2x32xf32>
    tpu.vector_store %arg5[%c0_140, %327, %c0_141, %c0_142], %330 {strides = array<i32>} : memref<1x8x2x32xf32, #tpu.memory_space<vmem>>, vector<1x1x2x32xf32>,
    %c6_i32 = arith.constant 6 : i32
    %c0_143 = arith.constant 0 : index
    %331 = arith.index_cast %c6_i32 : i32 to index
    %c0_144 = arith.constant 0 : index
    %c0_145 = arith.constant 0 : index
    %332 = vector.load %arg2[%c0_143, %331, %c0_144, %c0_145] : memref<1x8x2x128xf32, #tpu.memory_space<vmem>>, vector<1x1x2x128xf32>
    %333 = vector.shape_cast %332 : vector<1x1x2x128xf32> to vector<2x128xf32>
    %c0_146 = arith.constant 0 : index
    %c0_147 = arith.constant 0 : index
    %334 = vector.load %arg6[%c0_146, %c0_147] : memref<2x32xf32, #tpu.memory_space<vmem>>, vector<2x32xf32>
    %335 = arith.truncf %334 : vector<2x32xf32> to vector<2x32xbf16>
    %cst_148 = arith.constant dense<0.000000e+00> : vector<2x128xf32>
    %336 = tpu.matmul %335, %4, %cst_148 {dimension_numbers = #tpu.dot_dimension_numbers<[1], [0], [0], [1], [0, 0, 1, 1], [], []>} : vector<2x32xbf16>, vector<32x128xbf16>, vector<2x128xf32> -> vector<2x128xf32>
    %337 = arith.addf %333, %336 : vector<2x128xf32>
    %338 = vector.extract_strided_slice %337 {offsets = [0, 0], sizes = [2, 32], strides = [1, 1]} : vector<2x128xf32> to vector<2x32xf32>
    %339 = arith.negf %338 : vector<2x32xf32>
    %340 = math.exp %339 : vector<2x32xf32>
    %cst_149 = arith.constant 1.000000e+00 : f32
    %341 = vector.broadcast %cst_149 : f32 to vector<2x32xf32>
    %342 = arith.addf %341, %340 : vector<2x32xf32>
    %343 = arith.divf %341, %342 : vector<2x32xf32>
    %344 = vector.extract_strided_slice %337 {offsets = [0, 32], sizes = [2, 32], strides = [1, 1]} : vector<2x128xf32> to vector<2x32xf32>
    %345 = arith.negf %344 : vector<2x32xf32>
    %346 = math.exp %345 : vector<2x32xf32>
    %cst_150 = arith.constant 1.000000e+00 : f32
    %347 = vector.broadcast %cst_150 : f32 to vector<2x32xf32>
    %348 = arith.addf %347, %346 : vector<2x32xf32>
    %349 = arith.divf %347, %348 : vector<2x32xf32>
    %350 = vector.extract_strided_slice %337 {offsets = [0, 64], sizes = [2, 32], strides = [1, 1]} : vector<2x128xf32> to vector<2x32xf32>
    %351 = math.tanh %350 : vector<2x32xf32>
    %352 = vector.extract_strided_slice %337 {offsets = [0, 96], sizes = [2, 32], strides = [1, 1]} : vector<2x128xf32> to vector<2x32xf32>
    %353 = arith.negf %352 : vector<2x32xf32>
    %354 = math.exp %353 : vector<2x32xf32>
    %cst_151 = arith.constant 1.000000e+00 : f32
    %355 = vector.broadcast %cst_151 : f32 to vector<2x32xf32>
    %356 = arith.addf %355, %354 : vector<2x32xf32>
    %357 = arith.divf %355, %356 : vector<2x32xf32>
    %c0_152 = arith.constant 0 : index
    %c0_153 = arith.constant 0 : index
    %358 = vector.load %arg7[%c0_152, %c0_153] : memref<2x32xf32, #tpu.memory_space<vmem>>, vector<2x32xf32>
    %359 = arith.mulf %349, %358 : vector<2x32xf32>
    %360 = arith.mulf %343, %351 : vector<2x32xf32>
    %361 = arith.addf %359, %360 : vector<2x32xf32>
    %362 = math.tanh %361 : vector<2x32xf32>
    %363 = arith.mulf %357, %362 : vector<2x32xf32>
    %364 = arith.addi %6, %c6_i32 : i32
    %365 = vector.broadcast %364 : i32 to vector<2x1xi32>
    %366 = arith.cmpi sgt, %5, %365 : vector<2x1xi32>
    %c0_154 = arith.constant 0 : index
    %c0_155 = arith.constant 0 : index
    %367 = vector.load %arg7[%c0_154, %c0_155] : memref<2x32xf32, #tpu.memory_space<vmem>>, vector<2x32xf32>
    %368 = vector.shape_cast %366 : vector<2x1xi1> to vector<2x1xi1>
    %369 = vector.broadcast %368 : vector<2x1xi1> to vector<2x32xi1>
    %370 = arith.select %369, %361, %367 : vector<2x32xi1>, vector<2x32xf32>
    %c0_156 = arith.constant 0 : index
    %c0_157 = arith.constant 0 : index
    %371 = vector.load %arg7[%c0_156, %c0_157] : memref<2x32xf32, #tpu.memory_space<vmem>>, vector<2x32xf32>
    tpu.vector_store %arg7[%c0_156, %c0_157], %370 {strides = array<i32>} : memref<2x32xf32, #tpu.memory_space<vmem>>, vector<2x32xf32>,
    %c0_158 = arith.constant 0 : index
    %c0_159 = arith.constant 0 : index
    %372 = vector.load %arg6[%c0_158, %c0_159] : memref<2x32xf32, #tpu.memory_space<vmem>>, vector<2x32xf32>
    %373 = vector.shape_cast %366 : vector<2x1xi1> to vector<2x1xi1>
    %374 = vector.broadcast %373 : vector<2x1xi1> to vector<2x32xi1>
    %375 = arith.select %374, %363, %372 : vector<2x32xi1>, vector<2x32xf32>
    %c0_160 = arith.constant 0 : index
    %c0_161 = arith.constant 0 : index
    %376 = vector.load %arg6[%c0_160, %c0_161] : memref<2x32xf32, #tpu.memory_space<vmem>>, vector<2x32xf32>
    tpu.vector_store %arg6[%c0_160, %c0_161], %375 {strides = array<i32>} : memref<2x32xf32, #tpu.memory_space<vmem>>, vector<2x32xf32>,
    %cst_162 = arith.constant 0.000000e+00 : f32
    %377 = vector.broadcast %cst_162 : f32 to vector<2x32xf32>
    %378 = vector.shape_cast %366 : vector<2x1xi1> to vector<2x1xi1>
    %379 = vector.broadcast %378 : vector<2x1xi1> to vector<2x32xi1>
    %380 = arith.select %379, %363, %377 : vector<2x32xi1>, vector<2x32xf32>
    %c0_163 = arith.constant 0 : index
    %381 = arith.index_cast %c6_i32 : i32 to index
    %c0_164 = arith.constant 0 : index
    %c0_165 = arith.constant 0 : index
    %382 = vector.load %arg5[%c0_163, %381, %c0_164, %c0_165] : memref<1x8x2x32xf32, #tpu.memory_space<vmem>>, vector<1x1x2x32xf32>
    %383 = vector.shape_cast %382 : vector<1x1x2x32xf32> to vector<2x32xf32>
    %384 = vector.shape_cast %380 : vector<2x32xf32> to vector<1x1x2x32xf32>
    tpu.vector_store %arg5[%c0_163, %381, %c0_164, %c0_165], %384 {strides = array<i32>} : memref<1x8x2x32xf32, #tpu.memory_space<vmem>>, vector<1x1x2x32xf32>,
    %c7_i32 = arith.constant 7 : i32
    %c0_166 = arith.constant 0 : index
    %385 = arith.index_cast %c7_i32 : i32 to index
    %c0_167 = arith.constant 0 : index
    %c0_168 = arith.constant 0 : index
    %386 = vector.load %arg2[%c0_166, %385, %c0_167, %c0_168] : memref<1x8x2x128xf32, #tpu.memory_space<vmem>>, vector<1x1x2x128xf32>
    %387 = vector.shape_cast %386 : vector<1x1x2x128xf32> to vector<2x128xf32>
    %c0_169 = arith.constant 0 : index
    %c0_170 = arith.constant 0 : index
    %388 = vector.load %arg6[%c0_169, %c0_170] : memref<2x32xf32, #tpu.memory_space<vmem>>, vector<2x32xf32>
    %389 = arith.truncf %388 : vector<2x32xf32> to vector<2x32xbf16>
    %cst_171 = arith.constant dense<0.000000e+00> : vector<2x128xf32>
    %390 = tpu.matmul %389, %4, %cst_171 {dimension_numbers = #tpu.dot_dimension_numbers<[1], [0], [0], [1], [0, 0, 1, 1], [], []>} : vector<2x32xbf16>, vector<32x128xbf16>, vector<2x128xf32> -> vector<2x128xf32>
    %391 = arith.addf %387, %390 : vector<2x128xf32>
    %392 = vector.extract_strided_slice %391 {offsets = [0, 0], sizes = [2, 32], strides = [1, 1]} : vector<2x128xf32> to vector<2x32xf32>
    %393 = arith.negf %392 : vector<2x32xf32>
    %394 = math.exp %393 : vector<2x32xf32>
    %cst_172 = arith.constant 1.000000e+00 : f32
    %395 = vector.broadcast %cst_172 : f32 to vector<2x32xf32>
    %396 = arith.addf %395, %394 : vector<2x32xf32>
    %397 = arith.divf %395, %396 : vector<2x32xf32>
    %398 = vector.extract_strided_slice %391 {offsets = [0, 32], sizes = [2, 32], strides = [1, 1]} : vector<2x128xf32> to vector<2x32xf32>
    %399 = arith.negf %398 : vector<2x32xf32>
    %400 = math.exp %399 : vector<2x32xf32>
    %cst_173 = arith.constant 1.000000e+00 : f32
    %401 = vector.broadcast %cst_173 : f32 to vector<2x32xf32>
    %402 = arith.addf %401, %400 : vector<2x32xf32>
    %403 = arith.divf %401, %402 : vector<2x32xf32>
    %404 = vector.extract_strided_slice %391 {offsets = [0, 64], sizes = [2, 32], strides = [1, 1]} : vector<2x128xf32> to vector<2x32xf32>
    %405 = math.tanh %404 : vector<2x32xf32>
    %406 = vector.extract_strided_slice %391 {offsets = [0, 96], sizes = [2, 32], strides = [1, 1]} : vector<2x128xf32> to vector<2x32xf32>
    %407 = arith.negf %406 : vector<2x32xf32>
    %408 = math.exp %407 : vector<2x32xf32>
    %cst_174 = arith.constant 1.000000e+00 : f32
    %409 = vector.broadcast %cst_174 : f32 to vector<2x32xf32>
    %410 = arith.addf %409, %408 : vector<2x32xf32>
    %411 = arith.divf %409, %410 : vector<2x32xf32>
    %c0_175 = arith.constant 0 : index
    %c0_176 = arith.constant 0 : index
    %412 = vector.load %arg7[%c0_175, %c0_176] : memref<2x32xf32, #tpu.memory_space<vmem>>, vector<2x32xf32>
    %413 = arith.mulf %403, %412 : vector<2x32xf32>
    %414 = arith.mulf %397, %405 : vector<2x32xf32>
    %415 = arith.addf %413, %414 : vector<2x32xf32>
    %416 = math.tanh %415 : vector<2x32xf32>
    %417 = arith.mulf %411, %416 : vector<2x32xf32>
    %418 = arith.addi %6, %c7_i32 : i32
    %419 = vector.broadcast %418 : i32 to vector<2x1xi32>
    %420 = arith.cmpi sgt, %5, %419 : vector<2x1xi32>
    %c0_177 = arith.constant 0 : index
    %c0_178 = arith.constant 0 : index
    %421 = vector.load %arg7[%c0_177, %c0_178] : memref<2x32xf32, #tpu.memory_space<vmem>>, vector<2x32xf32>
    %422 = vector.shape_cast %420 : vector<2x1xi1> to vector<2x1xi1>
    %423 = vector.broadcast %422 : vector<2x1xi1> to vector<2x32xi1>
    %424 = arith.select %423, %415, %421 : vector<2x32xi1>, vector<2x32xf32>
    %c0_179 = arith.constant 0 : index
    %c0_180 = arith.constant 0 : index
    %425 = vector.load %arg7[%c0_179, %c0_180] : memref<2x32xf32, #tpu.memory_space<vmem>>, vector<2x32xf32>
    tpu.vector_store %arg7[%c0_179, %c0_180], %424 {strides = array<i32>} : memref<2x32xf32, #tpu.memory_space<vmem>>, vector<2x32xf32>,
    %c0_181 = arith.constant 0 : index
    %c0_182 = arith.constant 0 : index
    %426 = vector.load %arg6[%c0_181, %c0_182] : memref<2x32xf32, #tpu.memory_space<vmem>>, vector<2x32xf32>
    %427 = vector.shape_cast %420 : vector<2x1xi1> to vector<2x1xi1>
    %428 = vector.broadcast %427 : vector<2x1xi1> to vector<2x32xi1>
    %429 = arith.select %428, %417, %426 : vector<2x32xi1>, vector<2x32xf32>
    %c0_183 = arith.constant 0 : index
    %c0_184 = arith.constant 0 : index
    %430 = vector.load %arg6[%c0_183, %c0_184] : memref<2x32xf32, #tpu.memory_space<vmem>>, vector<2x32xf32>
    tpu.vector_store %arg6[%c0_183, %c0_184], %429 {strides = array<i32>} : memref<2x32xf32, #tpu.memory_space<vmem>>, vector<2x32xf32>,
    %cst_185 = arith.constant 0.000000e+00 : f32
    %431 = vector.broadcast %cst_185 : f32 to vector<2x32xf32>
    %432 = vector.shape_cast %420 : vector<2x1xi1> to vector<2x1xi1>
    %433 = vector.broadcast %432 : vector<2x1xi1> to vector<2x32xi1>
    %434 = arith.select %433, %417, %431 : vector<2x32xi1>, vector<2x32xf32>
    %c0_186 = arith.constant 0 : index
    %435 = arith.index_cast %c7_i32 : i32 to index
    %c0_187 = arith.constant 0 : index
    %c0_188 = arith.constant 0 : index
    %436 = vector.load %arg5[%c0_186, %435, %c0_187, %c0_188] : memref<1x8x2x32xf32, #tpu.memory_space<vmem>>, vector<1x1x2x32xf32>
    %437 = vector.shape_cast %436 : vector<1x1x2x32xf32> to vector<2x32xf32>
    %438 = vector.shape_cast %434 : vector<2x32xf32> to vector<1x1x2x32xf32>
    tpu.vector_store %arg5[%c0_186, %435, %c0_187, %c0_188], %438 {strides = array<i32>} : memref<1x8x2x32xf32, #tpu.memory_space<vmem>>, vector<1x1x2x32xf32>,
    %c8_i32_189 = arith.constant 8 : i32
    return
  }
  func.func @transform_0(%arg0: i32, %arg1: i32) -> (i32, i32, i32, i32) {
    %c0_i32 = arith.constant 0 : i32
    %c0_i32_0 = arith.constant 0 : i32
    %c0_i32_1 = arith.constant 0 : i32
    return %arg0, %arg1, %c0_i32, %c0_i32_0 : i32, i32, i32, i32
  }
  func.func @transform_1(%arg0: i32, %arg1: i32) -> (i32, i32, i32) {
    %c0_i32 = arith.constant 0 : i32
    %c0_i32_0 = arith.constant 0 : i32
    %c0_i32_1 = arith.constant 0 : i32
    return %arg0, %c0_i32, %c0_i32_0 : i32, i32, i32
  }
  func.func @transform_2(%arg0: i32, %arg1: i32) -> (i32, i32) {
    %c0_i32 = arith.constant 0 : i32
    %c0_i32_0 = arith.constant 0 : i32
    %c0_i32_1 = arith.constant 0 : i32
    return %c0_i32, %c0_i32_0 : i32, i32
  }
  func.func @transform_3(%arg0: i32, %arg1: i32) -> (i32, i32, i32, i32) {
    %c0_i32 = arith.constant 0 : i32
    %c0_i32_0 = arith.constant 0 : i32
    %c0_i32_1 = arith.constant 0 : i32
    return %arg0, %arg1, %c0_i32, %c0_i32_0 : i32, i32, i32, i32
  }
}

module attributes {stable_mosaic.version = 11 : i64} {
  func.func @_pairmax_proj_kernel(%arg0: i32, %arg1: memref<8x64xf32, #tpu.memory_space<vmem>>, %arg2: memref<8x64xf32, #tpu.memory_space<vmem>>, %arg3: memref<8x1xf32, #tpu.memory_space<vmem>>, %arg4: memref<64x256xbf16, #tpu.memory_space<vmem>>, %arg5: memref<1x256xf32, #tpu.memory_space<vmem>>, %arg6: memref<8x256xf32, #tpu.memory_space<vmem>>) attributes {dimension_semantics = [#tpu.dimension_semantics<parallel>], iteration_bounds = array<i64: 1>, scalar_prefetch = 0 : i64, scratch_operands = 0 : i64, tpu.core_type = #tpu.core_type<tc>, window_params = [{transform_indices = @transform_0, window_bounds = array<i64: 8, 64>}, {transform_indices = @transform_1, window_bounds = array<i64: 8, 64>}, {transform_indices = @transform_2, window_bounds = array<i64: 8, 1>}, {pipeline_mode = #tpu.pipeline_mode<synchronous>, transform_indices = @transform_3, window_bounds = array<i64: 64, 256>}, {pipeline_mode = #tpu.pipeline_mode<synchronous>, transform_indices = @transform_4, window_bounds = array<i64: 1, 256>}, {transform_indices = @transform_5, window_bounds = array<i64: 8, 256>}]} {
    %c0 = arith.constant 0 : index
    %c0_0 = arith.constant 0 : index
    %0 = vector.load %arg1[%c0, %c0_0] : memref<8x64xf32, #tpu.memory_space<vmem>>, vector<8x64xf32>
    %c0_1 = arith.constant 0 : index
    %c0_2 = arith.constant 0 : index
    %1 = vector.load %arg2[%c0_1, %c0_2] : memref<8x64xf32, #tpu.memory_space<vmem>>, vector<8x64xf32>
    %2 = arith.maximumf %0, %1 : vector<8x64xf32>
    %c0_3 = arith.constant 0 : index
    %c0_4 = arith.constant 0 : index
    %3 = vector.load %arg3[%c0_3, %c0_4] : memref<8x1xf32, #tpu.memory_space<vmem>>, vector<8x1xf32>
    %4 = vector.broadcast %3 : vector<8x1xf32> to vector<8x64xf32>
    %5 = arith.mulf %2, %4 : vector<8x64xf32>
    %6 = arith.truncf %5 : vector<8x64xf32> to vector<8x64xbf16>
    %c0_5 = arith.constant 0 : index
    %c0_6 = arith.constant 0 : index
    %7 = vector.load %arg4[%c0_5, %c0_6] : memref<64x256xbf16, #tpu.memory_space<vmem>>, vector<64x256xbf16>
    %cst = arith.constant dense<0.000000e+00> : vector<8x256xf32>
    %8 = tpu.matmul %6, %7, %cst {dimension_numbers = #tpu.dot_dimension_numbers<[1], [0], [0], [1], [0, 0, 1, 1], [], []>} : vector<8x64xbf16>, vector<64x256xbf16>, vector<8x256xf32> -> vector<8x256xf32>
    %c0_7 = arith.constant 0 : index
    %c0_8 = arith.constant 0 : index
    %9 = vector.load %arg5[%c0_7, %c0_8] : memref<1x256xf32, #tpu.memory_space<vmem>>, vector<1x256xf32>
    %10 = vector.broadcast %9 : vector<1x256xf32> to vector<8x256xf32>
    %11 = arith.addf %8, %10 : vector<8x256xf32>
    %c0_9 = arith.constant 0 : index
    %c0_10 = arith.constant 0 : index
    %12 = vector.load %arg6[%c0_9, %c0_10] : memref<8x256xf32, #tpu.memory_space<vmem>>, vector<8x256xf32>
    tpu.vector_store %arg6[%c0_9, %c0_10], %11 {strides = array<i32>} : memref<8x256xf32, #tpu.memory_space<vmem>>, vector<8x256xf32>,
    return
  }
  func.func @transform_0(%arg0: i32) -> (i32, i32) {
    %c0_i32 = arith.constant 0 : i32
    %c0_i32_0 = arith.constant 0 : i32
    return %arg0, %c0_i32 : i32, i32
  }
  func.func @transform_1(%arg0: i32) -> (i32, i32) {
    %c0_i32 = arith.constant 0 : i32
    %c0_i32_0 = arith.constant 0 : i32
    return %arg0, %c0_i32 : i32, i32
  }
  func.func @transform_2(%arg0: i32) -> (i32, i32) {
    %c0_i32 = arith.constant 0 : i32
    %c0_i32_0 = arith.constant 0 : i32
    return %arg0, %c0_i32 : i32, i32
  }
  func.func @transform_3(%arg0: i32) -> (i32, i32) {
    %c0_i32 = arith.constant 0 : i32
    %c0_i32_0 = arith.constant 0 : i32
    %c0_i32_1 = arith.constant 0 : i32
    return %c0_i32, %c0_i32_0 : i32, i32
  }
  func.func @transform_4(%arg0: i32) -> (i32, i32) {
    %c0_i32 = arith.constant 0 : i32
    %c0_i32_0 = arith.constant 0 : i32
    %c0_i32_1 = arith.constant 0 : i32
    return %c0_i32, %c0_i32_0 : i32, i32
  }
  func.func @transform_5(%arg0: i32) -> (i32, i32) {
    %c0_i32 = arith.constant 0 : i32
    %c0_i32_0 = arith.constant 0 : i32
    return %arg0, %c0_i32 : i32, i32
  }
}

module attributes {stable_mosaic.version = 11 : i64} {
  func.func @_pairmax_proj_kernel(%arg0: i32, %arg1: memref<8x64xf32, #tpu.memory_space<vmem>>, %arg2: memref<8x64xf32, #tpu.memory_space<vmem>>, %arg3: memref<8x1xf32, #tpu.memory_space<vmem>>, %arg4: memref<64x512xbf16, #tpu.memory_space<vmem>>, %arg5: memref<1x512xf32, #tpu.memory_space<vmem>>, %arg6: memref<8x512xf32, #tpu.memory_space<vmem>>) attributes {dimension_semantics = [#tpu.dimension_semantics<parallel>], iteration_bounds = array<i64: 1>, scalar_prefetch = 0 : i64, scratch_operands = 0 : i64, tpu.core_type = #tpu.core_type<tc>, window_params = [{transform_indices = @transform_0, window_bounds = array<i64: 8, 64>}, {transform_indices = @transform_1, window_bounds = array<i64: 8, 64>}, {transform_indices = @transform_2, window_bounds = array<i64: 8, 1>}, {pipeline_mode = #tpu.pipeline_mode<synchronous>, transform_indices = @transform_3, window_bounds = array<i64: 64, 512>}, {pipeline_mode = #tpu.pipeline_mode<synchronous>, transform_indices = @transform_4, window_bounds = array<i64: 1, 512>}, {transform_indices = @transform_5, window_bounds = array<i64: 8, 512>}]} {
    %c0 = arith.constant 0 : index
    %c0_0 = arith.constant 0 : index
    %0 = vector.load %arg1[%c0, %c0_0] : memref<8x64xf32, #tpu.memory_space<vmem>>, vector<8x64xf32>
    %c0_1 = arith.constant 0 : index
    %c0_2 = arith.constant 0 : index
    %1 = vector.load %arg2[%c0_1, %c0_2] : memref<8x64xf32, #tpu.memory_space<vmem>>, vector<8x64xf32>
    %2 = arith.maximumf %0, %1 : vector<8x64xf32>
    %c0_3 = arith.constant 0 : index
    %c0_4 = arith.constant 0 : index
    %3 = vector.load %arg3[%c0_3, %c0_4] : memref<8x1xf32, #tpu.memory_space<vmem>>, vector<8x1xf32>
    %4 = vector.broadcast %3 : vector<8x1xf32> to vector<8x64xf32>
    %5 = arith.mulf %2, %4 : vector<8x64xf32>
    %6 = arith.truncf %5 : vector<8x64xf32> to vector<8x64xbf16>
    %c0_5 = arith.constant 0 : index
    %c0_6 = arith.constant 0 : index
    %7 = vector.load %arg4[%c0_5, %c0_6] : memref<64x512xbf16, #tpu.memory_space<vmem>>, vector<64x512xbf16>
    %cst = arith.constant dense<0.000000e+00> : vector<8x512xf32>
    %8 = tpu.matmul %6, %7, %cst {dimension_numbers = #tpu.dot_dimension_numbers<[1], [0], [0], [1], [0, 0, 1, 1], [], []>} : vector<8x64xbf16>, vector<64x512xbf16>, vector<8x512xf32> -> vector<8x512xf32>
    %c0_7 = arith.constant 0 : index
    %c0_8 = arith.constant 0 : index
    %9 = vector.load %arg5[%c0_7, %c0_8] : memref<1x512xf32, #tpu.memory_space<vmem>>, vector<1x512xf32>
    %10 = vector.broadcast %9 : vector<1x512xf32> to vector<8x512xf32>
    %11 = arith.addf %8, %10 : vector<8x512xf32>
    %c0_9 = arith.constant 0 : index
    %c0_10 = arith.constant 0 : index
    %12 = vector.load %arg6[%c0_9, %c0_10] : memref<8x512xf32, #tpu.memory_space<vmem>>, vector<8x512xf32>
    tpu.vector_store %arg6[%c0_9, %c0_10], %11 {strides = array<i32>} : memref<8x512xf32, #tpu.memory_space<vmem>>, vector<8x512xf32>,
    return
  }
  func.func @transform_0(%arg0: i32) -> (i32, i32) {
    %c0_i32 = arith.constant 0 : i32
    %c0_i32_0 = arith.constant 0 : i32
    return %arg0, %c0_i32 : i32, i32
  }
  func.func @transform_1(%arg0: i32) -> (i32, i32) {
    %c0_i32 = arith.constant 0 : i32
    %c0_i32_0 = arith.constant 0 : i32
    return %arg0, %c0_i32 : i32, i32
  }
  func.func @transform_2(%arg0: i32) -> (i32, i32) {
    %c0_i32 = arith.constant 0 : i32
    %c0_i32_0 = arith.constant 0 : i32
    return %arg0, %c0_i32 : i32, i32
  }
  func.func @transform_3(%arg0: i32) -> (i32, i32) {
    %c0_i32 = arith.constant 0 : i32
    %c0_i32_0 = arith.constant 0 : i32
    %c0_i32_1 = arith.constant 0 : i32
    return %c0_i32, %c0_i32_0 : i32, i32
  }
  func.func @transform_4(%arg0: i32) -> (i32, i32) {
    %c0_i32 = arith.constant 0 : i32
    %c0_i32_0 = arith.constant 0 : i32
    %c0_i32_1 = arith.constant 0 : i32
    return %c0_i32, %c0_i32_0 : i32, i32
  }
  func.func @transform_5(%arg0: i32) -> (i32, i32) {
    %c0_i32 = arith.constant 0 : i32
    %c0_i32_0 = arith.constant 0 : i32
    return %arg0, %c0_i32 : i32, i32
  }
}

</mosaic_0001>

<bundles_post_ra>
// kernel: _encoder_core.10
= control target key start
LH: loop header
LB: loop body
LE: loop exit
PB: predicated region body
PF: predicated region fallthrough
CT: control target
= control target key end

     0   :  { %v160_v10 = vlaneseq  ;;  %v277_v21 = vmov 0.0   ;;  %vm210_vm4 = vcmask 1040384   ;;  %s359_s2 = inlined_call_operand.vmem [shape: bf16[128,128], index: 2, kind: input, shape index: {}]   ;;  %s360_s1 = inlined_call_operand.vmem [shape: bf16[32,128], index: 1, kind: input, shape index: {}]   ;;  %s361_s3 = inlined_call_operand.vmem [shape: f32[1,128], index: 3, kind: input, shape index: {}]   ;;  %s362_s0 = inlined_call_operand.<no memory space> [shape: s32[1], index: 0, kind: input, shape index: {}]   ;;  %s363_s4 = inlined_call_operand.vmem [shape: f32[32,128], index: 4, kind: output, shape index: {0}]   ;;  %s364_s5 = inlined_call_operand.vmem [shape: f32[1,2,128], index: 5, kind: output, shape index: {1}]  }
   0x1   :  { %v267_v0 = vld [vmem:[%s359_s2 + $0x38] sm:$0xff]   ;;  %v268_v1 = vld [vmem:[%s359_s2 + $0x30] sm:$0xff]   ;;  %v269_v2 = vld [vmem:[%s359_s2 + $0x28] sm:$0xff]   ;;  %v171_v16 = vstv %s362_s0 }
   0x2   :  { %246 = vmatprep.subr.bf16.mxu0 %v267_v0  ;;  %v270_v3 = vld [vmem:[%s359_s2 + $0x20] sm:$0xff]   ;;  %v271_v5 = vld [vmem:[%s359_s2 + $0x18] sm:$0xff]   ;;  %v272_v6 = vld [vmem:[%s359_s2 + $0x10] sm:$0xff]   ;;  %v161_v11 = vshrl.u32 %v160_v10, 7 }
   0x3   :  { %247 = vmatpush3.bf16.msra.mxu0 %v267_v0  ;;  %v275_v4 = vld [vmem:[%s360_s1] sm:$0xff]   ;;  %v273_v7 = vld [vmem:[%s359_s2 + $0x8] sm:$0xff]  }
   0x4   :  { %248 = vmatprep.subr.bf16.mxu0 %v268_v1  ;;  %262 = vmatprep.mubr.bf16.mxu0 %v275_v4  ;;  %v274_v8 = vld [vmem:[%s359_s2] sm:$0xff]   ;;  %v276_v9 = vld [vmem:[%s360_s1 + $0x8] sm:$0xff]   ;;  %v163_v13 = vadd.s32 16, %v161_v11  ;;  %v162_v14 = vadd.s32 8, %v161_v11  ;;  %vm172_vm0 = vcmp.lt.s32.totalorder %v161_v11, %v171_v16  ;;  %v164_v18 = vadd.s32 24, %v161_v11 }
   0x5   :  { %v221_v12 = vld [vmem:[%s361_s3] ss:$0 sm:$0xff]  ;;  %v232_v22 = vsel %vm172_vm0, 1.0, %v277_v21 }
   0x6   :  { %vm174_vm1 = vcmp.lt.s32.totalorder %v163_v13, %v171_v16  ;;  %vm173_vm2 = vcmp.lt.s32.totalorder %v162_v14, %v171_v16  ;;  %vm175_vm3 = vcmp.lt.s32.totalorder %v164_v18, %v171_v16 }
   0x7   :  { %249 = vmatpush3.bf16.msra.mxu0 %v268_v1  ;;  %v234_v25 = vsel %vm174_vm1, 1.0, %v277_v21  ;;  %v233_v27 = vsel %vm173_vm2, 1.0, %v277_v21  ;;  %v235_v30 = vsel %vm175_vm3, 1.0, %v277_v21 }
   0x8   :  { %250 = vmatprep.subr.bf16.mxu0 %v269_v2 }
   0xb   :  { %251 = vmatpush3.bf16.msra.mxu0 %v269_v2 }
   0xc   :  { %252 = vmatprep.subr.bf16.mxu0 %v270_v3 }
   0xf   :  { %253 = vmatpush3.bf16.msra.mxu0 %v270_v3 }
  0x10   :  { %254 = vmatprep.subr.bf16.mxu0 %v271_v5 }
  0x13   :  { %255 = vmatpush3.bf16.msra.mxu0 %v271_v5 }
  0x14   :  { %256 = vmatprep.subr.bf16.mxu0 %v272_v6 }
  0x17   :  { %257 = vmatpush3.bf16.msra.mxu0 %v272_v6 }
  0x18   :  { %258 = vmatprep.subr.bf16.mxu0 %v273_v7 }
  0x1b   :  { %259 = vmatpush3.bf16.msra.mxu0 %v273_v7 }
  0x1c   :  { %260 = vmatprep.subr.bf16.mxu0 %v274_v8 }
  0x1f   :  { %261 = vmatpush3.bf16.msra.mxu0 %v274_v8 }
  0x22   :  { %263 = vmatmul.mubr.bf16.vlgmr.msra.gmra.mxu0 %v276_v9 }
  0xe2   :  { %v264_v15 = vpop.f32.mrf.mxu0 }
  0xe3   :  { %v149_v17 = vadd.f32 %v264_v15, %v221_v12 }
  0xe4   :  { %v140_v19 = vpop.f32.mrf.mxu0 }
  0xe5   :  { %157 = vst [vmem:[%s363_s4 + $0x10] sm:$0xff] %v149_v17  ;;  %v141_v20 = vadd.f32 %v221_v12, %v140_v19  ;;  %v186_v31 = vmul.f32 %v234_v25, %v149_v17 }
  0xe6   :  { %v265_v23 = vpop.f32.mrf.mxu0 }
  0xe7   :  { %155 = vst [vmem:[%s363_s4] sm:$0xff] %v141_v20  ;;  %v152_v24 = vadd.f32 %v265_v23, %v221_v12  ;;  %v184_v28 = vmul.f32 %v232_v22, %v141_v20  ;;  %v199_v37 = vmul.f32 %v186_v31, %v186_v31 }
  0xe8   :  { %v143_v26 = vpop.f32.mrf.mxu0 }
  0xe9   :  { %158 = vst [vmem:[%s363_s4 + $0x18] sm:$0xff] %v152_v24  ;;  %v144_v29 = vadd.f32 %v221_v12, %v143_v26  ;;  %v197_v33 = vmul.f32 %v184_v28, %v184_v28  ;;  %v187_v34 = vmul.f32 %v235_v30, %v152_v24 }
  0xeb   :  { %156 = vst [vmem:[%s363_s4 + $0x8] sm:$0xff] %v144_v29  ;;  %v185_v32 = vmul.f32 %v233_v27, %v144_v29  ;;  %v200_v40 = vmul.f32 %v187_v34, %v187_v34 }
  0xed   :  { %v188_v35 = vadd.f32 %v185_v32, %v184_v28  ;;  %v198_v36 = vmul.f32 %v185_v32, %v185_v32 }
  0xef   :  { %v189_v38 = vadd.f32 %v188_v35, %v186_v31  ;;  %v201_v39 = vadd.f32 %v198_v36, %v197_v33 }
  0xf1   :  { %v190_v41 = vadd.f32 %v189_v38, %v187_v34  ;;  %v202_v42 = vadd.f32 %v201_v39, %v199_v37 }
  0xf3   :  { %v191_v43 = vrot.slane %v190_v41, 4  ;;  %v203_v44 = vadd.f32 %v202_v42, %v200_v40 }
  0xf5   :  { %v192_v45 = vadd.f32 %v191_v43, %v190_v41  ;;  %v204_v46 = vrot.slane %v203_v44, 4 }
  0xf7   :  { %v193_v47 = vrot.slane %v192_v45, 2  ;;  %v205_v48 = vadd.f32 %v204_v46, %v203_v44 }
  0xf9   :  { %v194_v49 = vadd.f32 %v193_v47, %v192_v45  ;;  %v206_v50 = vrot.slane %v205_v48, 2 }
  0xfb   :  { %v195_v51 = vrot.slane %v194_v49, 1  ;;  %v207_v52 = vadd.f32 %v206_v50, %v205_v48 }
  0xfd   :  { %v208_v53 = vrot.slane %v207_v52, 1  ;;  %v196_v54 = vadd.f32 %v195_v51, %v194_v49 }
  0xff   :  { %v209_v55 = vadd.f32 %v208_v53, %v207_v52 }
 0x101   :  { %v211_v56 = vsel %vm210_vm4, %v196_v54, %v209_v55 }
 0x102   :  { %212 = vst [vmem:[%s364_s5] sm:$0x3] %v211_v56 }

// kernel: _encoder_core.11
= control target key start
LH: loop header
LB: loop body
LE: loop exit
PB: predicated region body
PF: predicated region fallthrough
CT: control target
= control target key end

     0   :  { %v293_v1 = vmov 0   ;;  %v79_v41 = vlaneseq  ;;  %s417_s3 = inlined_call_operand.vmem [shape: bf16[128,256], index: 3, kind: input, shape index: {}]   ;;  %s418_s0 = inlined_call_operand.vmem [shape: f32[32,128], index: 0, kind: input, shape index: {}]   ;;  %s419_s1 = inlined_call_operand.vmem [shape: f32[1,128], index: 1, kind: input, shape index: {}]   ;;  %s420_s2 = inlined_call_operand.vmem [shape: f32[1,128], index: 2, kind: input, shape index: {}]   ;;  %s421_s4 = inlined_call_operand.vmem [shape: f32[1,256], index: 4, kind: input, shape index: {}]   ;;  %s422_s5 = inlined_call_operand.vmem [shape: f32[32,256], index: 5, kind: output, shape index: {}]  }
   0x1   :  { %v269_v0 = vld [vmem:[%s417_s3 + $0x74] ss:$8 sps:$4 sm:$0xff]   ;;  %201 = vmatprep.mubr.bf16.mxu0 %v293_v1  ;;  %211 = vmatprep.mubr.bf16.mxu1 %v293_v1  ;;  %v271_v2 = vld [vmem:[%s417_s3 + $0x70] ss:$8 sps:$4 sm:$0xff]   ;;  %v272_v3 = vld [vmem:[%s417_s3 + $0x64] ss:$8 sps:$4 sm:$0xff]  }
   0x2   :  { %169 = vmatprep.subr.bf16.mxu0 %v269_v0  ;;  %252 = vmatprep.subr.bf16.mxu1 %v269_v0  ;;  %v274_v4 = vld [vmem:[%s417_s3 + $0x60] ss:$8 sps:$4 sm:$0xff]   ;;  %v275_v5 = vld [vmem:[%s417_s3 + $0x54] ss:$8 sps:$4 sm:$0xff]   ;;  %v277_v6 = vld [vmem:[%s417_s3 + $0x50] ss:$8 sps:$4 sm:$0xff]  }
   0x3   :  { %170 = vmatpush1.bf16.msra.mxu0 %v271_v2  ;;  %260 = vmatpush1.bf16.msra.mxu1 %v271_v2  ;;  %v278_v7 = vld [vmem:[%s417_s3 + $0x44] ss:$8 sps:$4 sm:$0xff]   ;;  %v280_v8 = vld [vmem:[%s417_s3 + $0x40] ss:$8 sps:$4 sm:$0xff]   ;;  %v281_v9 = vld [vmem:[%s417_s3 + $0x34] ss:$8 sps:$4 sm:$0xff]  }
   0x4   :  { %171 = vmatprep.subr.bf16.mxu0 %v272_v3  ;;  %253 = vmatprep.subr.bf16.mxu1 %v272_v3  ;;  %v21_v10 = vld [vmem:[%s418_s0] sm:$0xff]  ;;  %v22_v12 = vld [vmem:[%s418_s0 + $0x8] sm:$0xff]  ;;  %v23_v13 = vld [vmem:[%s418_s0 + $0x10] sm:$0xff]  ;;  %v80_v42 = vshrl.u32 %v79_v41, 7 }
   0x5   :  { %v234_v11 = vld [vmem:[%s419_s1] ss:$0 sm:$0xff]  ;;  %v24_v14 = vld [vmem:[%s418_s0 + $0x18] sm:$0xff]  ;;  %v284_v21 = vld [vmem:[%s417_s3 + $0x24] ss:$8 sps:$4 sm:$0xff]  }
   0x6   :  { %v32_v15 = vmul.f32 %v234_v11, %v21_v10  ;;  %v283_v16 = vld [vmem:[%s417_s3 + $0x30] ss:$8 sps:$4 sm:$0xff]   ;;  %v33_v17 = vmul.f32 %v234_v11, %v22_v12  ;;  %v235_v18 = vld [vmem:[%s420_s2] ss:$0 sm:$0xff]  ;;  %v34_v19 = vmul.f32 %v234_v11, %v23_v13  ;;  %v35_v20 = vmul.f32 %v234_v11, %v24_v14  ;;  %v287_v27 = vld [vmem:[%s417_s3 + $0x14] ss:$8 sps:$4 sm:$0xff]  }
   0x7   :  { %172 = vmatpush1.bf16.msra.mxu0 %v274_v4  ;;  %261 = vmatpush1.bf16.msra.mxu1 %v274_v4  ;;  %v286_v23 = vld [vmem:[%s417_s3 + $0x20] ss:$8 sps:$4 sm:$0xff]   ;;  %v289_v28 = vld [vmem:[%s417_s3 + $0x10] ss:$8 sps:$4 sm:$0xff]   ;;  %v290_v33 = vld [vmem:[%s417_s3 + $0x4] ss:$8 sps:$4 sm:$0xff]  }
   0x8   :  { %173 = vmatprep.subr.bf16.mxu0 %v275_v5  ;;  %254 = vmatprep.subr.bf16.mxu1 %v275_v5  ;;  %v43_v22 = vadd.f32 %v235_v18, %v32_v15  ;;  %v44_v24 = vadd.f32 %v235_v18, %v33_v17  ;;  %v45_v25 = vadd.f32 %v235_v18, %v34_v19  ;;  %v292_v35 = vld [vmem:[%s417_s3] ss:$8 sps:$4 sm:$0xff]   ;;  %v81_v43 = vsub.s32 0, %v80_v42 }
   0x9   :  { %v46_v26 = vadd.f32 %v235_v18, %v35_v20  ;;  %v77_v44 = vld [vmem:[%s421_s4] sm:$0x3]  ;;  %v85_v45 = vsub.s32 1, %v80_v42 }
   0xa   :  { %vm47_vm0 = vcmp.ge.f32.partialorder %v43_v22, 0.0  ;;  %v51_v29 = vmul.f32 0.01, %v43_v22  ;;  %v52_v30 = vmul.f32 0.01, %v44_v24  ;;  %vm48_vm1 = vcmp.ge.f32.partialorder %v44_v24, 0.0 }
   0xb   :  { %174 = vmatpush1.bf16.msra.mxu0 %v277_v6  ;;  %262 = vmatpush1.bf16.msra.mxu1 %v277_v6  ;;  %v53_v31 = vmul.f32 0.01, %v45_v25  ;;  %v54_v32 = vmul.f32 0.01, %v46_v26  ;;  %vm49_vm2 = vcmp.ge.f32.partialorder %v45_v25, 0.0  ;;  %vm50_vm3 = vcmp.ge.f32.partialorder %v46_v26, 0.0 }
   0xc   :  { %175 = vmatprep.subr.bf16.mxu0 %v278_v7  ;;  %255 = vmatprep.subr.bf16.mxu1 %v278_v7  ;;  %v55_v34 = vsel %vm47_vm0, %v43_v22, %v51_v29  ;;  %v56_v36 = vsel %vm48_vm1, %v44_v24, %v52_v30  ;;  %v82_v46 = vrot.slane %v77_v44, %v81_v43 }
   0xd   :  { %v57_v37 = vsel %vm49_vm2, %v45_v25, %v53_v31  ;;  %v58_v38 = vsel %vm50_vm3, %v46_v26, %v54_v32  ;;  %v59_v39 = vpack.c.bf16 %v56_v36, %v55_v34  ;;  %v86_v47 = vrot.slane %v77_v44, %v85_v45 }
   0xe   :  { %v60_v40 = vpack.c.bf16 %v58_v38, %v57_v37 }
   0xf   :  { %176 = vmatpush1.bf16.msra.mxu0 %v280_v8  ;;  %263 = vmatpush1.bf16.msra.mxu1 %v280_v8 }
  0x10   :  { %177 = vmatprep.subr.bf16.mxu0 %v281_v9  ;;  %256 = vmatprep.subr.bf16.mxu1 %v281_v9 }
  0x13   :  { %178 = vmatpush1.bf16.msra.mxu0 %v283_v16  ;;  %264 = vmatpush1.bf16.msra.mxu1 %v283_v16 }
  0x14   :  { %179 = vmatprep.subr.bf16.mxu0 %v284_v21  ;;  %257 = vmatprep.subr.bf16.mxu1 %v284_v21 }
  0x17   :  { %180 = vmatpush1.bf16.msra.mxu0 %v286_v23  ;;  %265 = vmatpush1.bf16.msra.mxu1 %v286_v23 }
  0x18   :  { %181 = vmatprep.subr.bf16.mxu0 %v287_v27  ;;  %258 = vmatprep.subr.bf16.mxu1 %v287_v27 }
  0x1b   :  { %182 = vmatpush1.bf16.msra.mxu0 %v289_v28  ;;  %266 = vmatpush1.bf16.msra.mxu1 %v289_v28 }
  0x1c   :  { %183 = vmatprep.subr.bf16.mxu0 %v290_v33  ;;  %259 = vmatprep.subr.bf16.mxu1 %v290_v33 }
  0x1f   :  { %184 = vmatpush1.bf16.msra.mxu0 %v292_v35  ;;  %267 = vmatpush1.bf16.msra.mxu1 %v292_v35 }
  0x22   :  { %202 = vmatmul.mubr.bf16.vlgmr.msra.gmra.mxu0 %v59_v39  ;;  %212 = vmatmul.mubr.bf16.vlgmr.msra.gmra.mxu1 %v60_v40 }
  0xe2   :  { %v203_v48 = vpop.f32.mrf.mxu0  ;;  %v213_v49 = vpop.f32.mrf.mxu1 }
  0xe3   :  { %v204_v50 = vadd.f32 %v203_v48, %v82_v46  ;;  %v214_v51 = vadd.f32 %v213_v49, %v82_v46 }
  0xe4   :  { %v205_v52 = vpop.f32.mrf.mxu0  ;;  %v215_v53 = vpop.f32.mrf.mxu1 }
  0xe5   :  { %222 = vst [vmem:[%s422_s5] sm:$0xff] %v204_v50  ;;  %226 = vst [vmem:[%s422_s5 + $0x20] sm:$0xff] %v214_v51  ;;  %v206_v54 = vadd.f32 %v205_v52, %v86_v47  ;;  %v216_v55 = vadd.f32 %v215_v53, %v86_v47 }
  0xe6   :  { %v207_v56 = vpop.f32.mrf.mxu0  ;;  %v217_v57 = vpop.f32.mrf.mxu1 }
  0xe7   :  { %223 = vst [vmem:[%s422_s5 + $0x8] sm:$0xff] %v206_v54  ;;  %227 = vst [vmem:[%s422_s5 + $0x28] sm:$0xff] %v216_v55  ;;  %v208_v58 = vadd.f32 %v207_v56, %v82_v46  ;;  %v218_v59 = vadd.f32 %v217_v57, %v82_v46 }
  0xe8   :  { %v209_v60 = vpop.f32.mrf.mxu0  ;;  %v219_v61 = vpop.f32.mrf.mxu1 }
  0xe9   :  { %224 = vst [vmem:[%s422_s5 + $0x10] sm:$0xff] %v208_v58  ;;  %228 = vst [vmem:[%s422_s5 + $0x30] sm:$0xff] %v218_v59  ;;  %v210_v62 = vadd.f32 %v209_v60, %v86_v47  ;;  %v220_v63 = vadd.f32 %v219_v61, %v86_v47 }
  0xeb   :  { %225 = vst [vmem:[%s422_s5 + $0x18] sm:$0xff] %v210_v62  ;;  %229 = vst [vmem:[%s422_s5 + $0x38] sm:$0xff] %v220_v63 }

// kernel: _encoder_core.13
= control target key start
LH: loop header
LB: loop body
LE: loop exit
PB: predicated region body
PF: predicated region fallthrough
CT: control target
= control target key end

     0   :  { %v184_v1 = vmov 0   ;;  %vm81_vm0 = vcmask 523264   ;;  %v31_v15 = vlaneseq  ;;  %s268_s1 = inlined_call_operand.vmem [shape: bf16[64,256], index: 1, kind: input, shape index: {}]   ;;  %s269_s0 = inlined_call_operand.vmem [shape: f32[32,64], index: 0, kind: input, shape index: {}]   ;;  %s270_s2 = inlined_call_operand.vmem [shape: f32[1,256], index: 2, kind: input, shape index: {}]   ;;  %s271_s3 = inlined_call_operand.vmem [shape: f32[32,256], index: 3, kind: output, shape index: {}]  }
   0x1   :  { %v172_v0 = vld [vmem:[%s268_s1 + $0x34] ss:$8 sps:$4 sm:$0xff]   ;;  %120 = vmatprep.mubr.bf16.mxu0 %v184_v1  ;;  %130 = vmatprep.mubr.bf16.mxu1 %v184_v1  ;;  %v174_v2 = vld [vmem:[%s268_s1 + $0x30] ss:$8 sps:$4 sm:$0xff]   ;;  %v175_v3 = vld [vmem:[%s268_s1 + $0x24] ss:$8 sps:$4 sm:$0xff]  }
   0x2   :  { %96 = vmatprep.subr.bf16.mxu0 %v172_v0  ;;  %163 = vmatprep.subr.bf16.mxu1 %v172_v0  ;;  %v177_v4 = vld [vmem:[%s268_s1 + $0x20] ss:$8 sps:$4 sm:$0xff]   ;;  %v178_v5 = vld [vmem:[%s268_s1 + $0x14] ss:$8 sps:$4 sm:$0xff]   ;;  %v180_v6 = vld [vmem:[%s268_s1 + $0x10] ss:$8 sps:$4 sm:$0xff]  }
   0x3   :  { %97 = vmatpush1.bf16.msra.mxu0 %v174_v2  ;;  %167 = vmatpush1.bf16.msra.mxu1 %v174_v2  ;;  %v181_v7 = vld [vmem:[%s268_s1 + $0x4] ss:$8 sps:$4 sm:$0xff]   ;;  %v183_v8 = vld [vmem:[%s268_s1] ss:$8 sps:$4 sm:$0xff]   ;;  %v17_v11 = vld [vmem:[%s269_s0 + $0x10] sm:$0xff]  ;;  %v32_v16 = vshrl.u32 %v31_v15, 7 }
   0x4   :  { %98 = vmatprep.subr.bf16.mxu0 %v175_v3  ;;  %164 = vmatprep.subr.bf16.mxu1 %v175_v3  ;;  %v15_v9 = vld [vmem:[%s269_s0] sm:$0xff]  ;;  %v16_v10 = vld [vmem:[%s269_s0 + $0x8] sm:$0xff]  ;;  %v18_v12 = vld [vmem:[%s269_s0 + $0x18] sm:$0xff] }
   0x5   :  { %v19_v13 = vpack.c.bf16 %v16_v10, %v15_v9  ;;  %v20_v14 = vpack.c.bf16 %v18_v12, %v17_v11  ;;  %v33_v17 = vsub.s32 0, %v32_v16  ;;  %v29_v18 = vld [vmem:[%s270_s2] sm:$0x3]  ;;  %v37_v19 = vsub.s32 1, %v32_v16 }
   0x7   :  { %99 = vmatpush1.bf16.msra.mxu0 %v177_v4  ;;  %168 = vmatpush1.bf16.msra.mxu1 %v177_v4  ;;  %v34_v20 = vrot.slane %v29_v18, %v33_v17  ;;  %v38_v21 = vrot.slane %v29_v18, %v37_v19 }
   0x8   :  { %100 = vmatprep.subr.bf16.mxu0 %v178_v5  ;;  %165 = vmatprep.subr.bf16.mxu1 %v178_v5 }
   0xb   :  { %101 = vmatpush1.bf16.msra.mxu0 %v180_v6  ;;  %169 = vmatpush1.bf16.msra.mxu1 %v180_v6 }
   0xc   :  { %102 = vmatprep.subr.bf16.mxu0 %v181_v7  ;;  %166 = vmatprep.subr.bf16.mxu1 %v181_v7 }
   0xf   :  { %103 = vmatpush1.bf16.msra.mxu0 %v183_v8  ;;  %170 = vmatpush1.bf16.msra.mxu1 %v183_v8 }
  0x12   :  { %161 = vmatmul.mubr.msk.bf16.vlgmr.msra.gmra.mxu0 %vm81_vm0, %v19_v13  ;;  %162 = vmatmul.mubr.msk.bf16.vlgmr.msra.gmra.mxu1 %vm81_vm0, %v20_v14 }
  0xd2   :  { %v122_v22 = vpop.f32.mrf.mxu0  ;;  %v132_v23 = vpop.f32.mrf.mxu1 }
  0xd3   :  { %v123_v24 = vadd.f32 %v122_v22, %v34_v20  ;;  %v133_v25 = vadd.f32 %v132_v23, %v34_v20 }
  0xd4   :  { %v124_v26 = vpop.f32.mrf.mxu0  ;;  %v134_v27 = vpop.f32.mrf.mxu1 }
  0xd5   :  { %141 = vst [vmem:[%s271_s3] sm:$0xff] %v123_v24  ;;  %145 = vst [vmem:[%s271_s3 + $0x20] sm:$0xff] %v133_v25  ;;  %v125_v28 = vadd.f32 %v124_v26, %v38_v21  ;;  %v135_v29 = vadd.f32 %v134_v27, %v38_v21 }
  0xd6   :  { %v126_v30 = vpop.f32.mrf.mxu0  ;;  %v136_v31 = vpop.f32.mrf.mxu1 }
  0xd7   :  { %142 = vst [vmem:[%s271_s3 + $0x8] sm:$0xff] %v125_v28  ;;  %146 = vst [vmem:[%s271_s3 + $0x28] sm:$0xff] %v135_v29  ;;  %v127_v32 = vadd.f32 %v126_v30, %v34_v20  ;;  %v137_v33 = vadd.f32 %v136_v31, %v34_v20 }
  0xd8   :  { %v128_v34 = vpop.f32.mrf.mxu0  ;;  %v138_v35 = vpop.f32.mrf.mxu1 }
  0xd9   :  { %143 = vst [vmem:[%s271_s3 + $0x10] sm:$0xff] %v127_v32  ;;  %147 = vst [vmem:[%s271_s3 + $0x30] sm:$0xff] %v137_v33  ;;  %v129_v36 = vadd.f32 %v128_v34, %v38_v21  ;;  %v139_v37 = vadd.f32 %v138_v35, %v38_v21 }
  0xdb   :  { %144 = vst [vmem:[%s271_s3 + $0x18] sm:$0xff] %v129_v36  ;;  %148 = vst [vmem:[%s271_s3 + $0x38] sm:$0xff] %v139_v37 }

// kernel: _encoder_core.12
= control target key start
LH: loop header
LB: loop body
LE: loop exit
PB: predicated region body
PF: predicated region fallthrough
CT: control target
= control target key end

     0   :  { %s1549_s12 = smov 0   ;;  %s1551_s13 = smov 0   ;;  %s1896_s0 = inlined_call_operand.vmem [shape: f32[2,16,2,128], index: 0, kind: input, shape index: {}]   ;;  %s1897_s1 = inlined_call_operand.vmem [shape: bf16[2,32,128], index: 1, kind: input, shape index: {}]   ;;  %s1898_s2 = inlined_call_operand.vmem [shape: s32[2,1], index: 2, kind: input, shape index: {}]   ;;  %s1899_s3 = inlined_call_operand.vmem [shape: f32[2,16,2,32], index: 3, kind: output, shape index: {}]  }
   0x1   :  { %s1553_s14 = smov 0   ;;  %s1555_s15 = smov 0  }
   0x2   :  { %s1557_s16 = smov 0  }
   0x3 LB: > { %s22_s17 = sadd.s32 1, %s1512_s14  ;;  %s25_s18 = sadd.s32 1, %s1516_s15  ;;  %s1520_s16 = sphi %s1557_s16, %s13_s16   ;;  %s1516_s15 = sphi %s1555_s15, %s1903_s15   ;;  %s1512_s14 = sphi %s1553_s14, %s1902_s14   ;;  %s1508_s13 = sphi %s1551_s13, %s1901_s13   ;;  %s1504_s12 = sphi %s1549_s12, %s1900_s12  }
   0x4   : > { %p23_p0 = scmp.ge.s32.totalorder %s22_s17, 2  ;;  %p1233_p1 = scmp.ge.s32.totalorder %s1520_s16, 1 }
   0x5   : > { %p168_p2 = scmp.lt.s32.totalorder %s1520_s16, 5 }
   0x6   : > { %s1905_s17 = smov (%p23_p0, %s22_s17), 0  ;;  %s1907_s18 = smov (!%p23_p0, %s25_s18), %s1516_s15 }
   0x7   : > { %p169_p3 = pnand %p1233_p1, %p168_p2  ;;  %p27_p4 = scmp.ge.s32.totalorder %s1907_s18, 2 }
   0x8   : > { %s1579_s19 = sshll.u32 (!%p169_p3), %s1504_s12, 3  ;;  %p206_p5 = scmp.lt.s32.totalorder (!%p169_p3), %s1508_s13, 1 }
   0x9   : > { %s1909_s18 = smov (%p27_p4, %s1907_s18), 0  ;;  %172 = sbr.rel (%p169_p3) target bundleno = 5630 (0x15fe), region = 32 }
   0xa   : > { %p208_p6 = scmp.lt.s32.totalorder (!%p169_p3), %s1579_s19, 15  ;;  %p1242_p7 = scmp.ne.s32.totalorder (!%p169_p3), %s1504_s12, 0 }
   0xe   : > { %s1911_s13 = smov (!%p206_p5, %s1508_s13), 1 }
   0xf   : > { %s209_s20 = scalar_select %p208_p6, %s1579_s19, 15 }
  0x10   : > { %s1235_s21 = sshll.u32 %s1911_s13, 4  ;;  %234 = sbr.rel (%p1242_p7) target bundleno = 23 (0x17), region = 36 }
  0x11   : > { %s211_s22 = sadd.s32 %s1235_s21, %s209_s20  ;;  %s219_s25 = scalar_lea.vmem %s1897_s1, %s1235_s21 }
  0x12   : > { %s1236_s26 = sshll.u32 %s211_s22, 1 }
  0x13   : > { %s1589_s29 = scalar_lea.vmem %s1896_s0, %s1236_s26  ;;  %s1594_s5 = scalar_lea.vmem %s1899_s3, %s1236_s26 }
  0x15   : > { %vm235_vm0 = vcmask 254976   ;;  %v1522_v0 = vmov 0.0  }
  0x16   : > { %236 = vst.msk [vmem:[#allocation2] sm:$0x3] %vm235_vm0, %v1522_v0  ;;  %237 = vst.msk [vmem:[#allocation3] sm:$0x3] %vm235_vm0, %v1522_v0 }
  0x17 PF: > { %v1596_v1 = vld [vmem:[%s219_s25 + $0x8] sm:$0xff]   ;;  %v1523_v2 = vmov 0.0   ;;  %v1601_v3 = vld [vmem:[%s219_s25] sm:$0xff]   ;;  %vm1524_vm1 = vmmov 0   ;;  %vm259_vm2 = vcmask 261120   ;;  %v1525_v12 = vmov 0  }
  0x18   : > { %1303 = vmatprep.subr.bf16.mxu0 %v1523_v2  ;;  %1311 = vmatprep.subr.bf16.mxu1 %v1523_v2  ;;  %v244_v6 = vld [vmem:[%s1589_s29] sm:$0x3]  ;;  %s1526_s6 = smov 64   ;;  %s1527_s7 = smov 32   ;;  %v333_v19 = vstv %s1579_s19  ;;  %vm345_vm5 = vcmask 254976  }
  0x19   : > { %1304 = vmatpush3.bf16.msra.mxu0 %v1596_v1  ;;  %1307 = vmatprep.mubr.msk.bf16.mxu0 %vm1524_vm1, %v1523_v2  ;;  %v1629_v18 = vld [vmem:[%s1898_s2] sm:$0x3]  ;;  %s1528_s10 = smov 96   ;;  %s441_s11 = sadd.s32 1, %s1579_s19  ;;  %v1248_v44 = vld [vmem:[%s1589_s29 + $0x2] sm:$0x3] }
  0x1a   : > { %1305 = vmatprep.subr.bf16.mxu0 %v1523_v2  ;;  %1312 = vmatpush3.bf16.msra.mxu1 %v1596_v1  ;;  %vm334_vm3 = vcmp.gt.s32.totalorder %v1629_v18, %v333_v19  ;;  %v442_v37 = vstv %s441_s11  ;;  %s550_s12 = sadd.s32 2, %s1579_s19  ;;  %s659_s13 = sadd.s32 3, %s1579_s19 }
  0x1b   : > { %1313 = vmatprep.subr.bf16.mxu1 %v1523_v2  ;;  %1315 = vmatprep.mubr.msk.bf16.mxu1 %vm1524_vm1, %v1523_v2  ;;  %v335_v23 = vsel %vm334_vm3, 1, %v1525_v12  ;;  %vm443_vm6 = vcmp.gt.s32.totalorder %v1629_v18, %v442_v37  ;;  %s768_s20 = sadd.s32 4, %s1579_s19  ;;  %s877_s21 = sadd.s32 5, %s1579_s19 }
  0x1c   : > { %1414 = vset.pattern.permute.xlu1 %v1525_v12  ;;  %1415 = vset.pattern.permute.xlu0 %v1525_v12  ;;  %v444_v39 = vsel %vm443_vm6, 1, %v1525_v12  ;;  %s986_s22 = sadd.s32 6, %s1579_s19  ;;  %s1095_s23 = sadd.s32 7, %s1579_s19 }
  0x1d   : > { %v245_v4 = vld [vmem:[#allocation2] sm:$0x3]  ;;  %1306 = vmatpush3.bf16.msra.mxu0 %v1601_v3  ;;  %v311_v14 = vld [vmem:[#allocation3] sm:$0x3] }
  0x1e   : > { %v246_v5 = vpack.c.bf16 %v245_v4, %v245_v4  ;;  %1314 = vmatpush3.bf16.msra.mxu1 %v1601_v3  ;;  %1319 = vmatprep.subr.bf16.mxu0 %v1523_v2  ;;  %v347_v24 = vld [vmem:[#allocation2] sm:$0x3] }
  0x1f   : > { %1327 = vmatprep.subr.bf16.mxu1 %v1523_v2 }
  0x20   : > { %1308 = vmatmul.mubr.msk.bf16.vlgmr.msra.gmra.mxu0 %vm259_vm2, %v246_v5  ;;  %v551_v5 = vstv %s550_s12 }
  0x21   : > { %1320 = vmatpush3.bf16.msra.mxu0 %v1596_v1  ;;  %1323 = vmatprep.mubr.msk.bf16.mxu0 %vm1524_vm1, %v1523_v2  ;;  %vm552_vm8 = vcmp.gt.s32.totalorder %v1629_v18, %v551_v5 }
  0x22   : > { %1321 = vmatprep.subr.bf16.mxu0 %v1523_v2 }
  0x25   : > { %1322 = vmatpush3.bf16.msra.mxu0 %v1601_v3 }
  0x26   : > { %1335 = vmatprep.subr.bf16.mxu0 %v1523_v2 }
  0xe0   : > { %v297_v7 = vpop.f32.mrf.mxu0 }
  0xe1   : > { %v303_v8 = vadd.f32 %v297_v7, %v244_v6  ;;  %v553_v7 = vsel %vm552_vm8, 1, %v1525_v12 }
  0xe2   : > { %v1309_v9 = vpop.f32.mrf.mxu0 }
  0xe3   : > { %1418 = vtanh.f32 %v303_v8  ;;  %v1247_v15 = vmul.f32 -1.442695, %v303_v8 }
  0xe4   : > { %v300_v10 = vpop.f32.mrf.mxu0 }
  0xe5   : > { %1420 = vpow2.f32 %v1247_v15 }
  0xe6   : > { %v1310_v11 = vpop.f32.mrf.mxu0 }
  0xf0   : > { %v1419_v13 = vpop.eup %1418 }
  0xf1   : > { %318 = vrot.lane.b32.xlu0 %v1419_v13, %s1526_s6 }
  0xf2   : > { %v1421_v16 = vpop.eup %1420 }
  0xf3   : > { %v307_v17 = vadd.f32 1.0, %v1421_v16  ;;  %v1252_v16 = vld [vmem:[%s1589_s29 + $0x4] sm:$0x3] }
  0xf5   : > { %313 = vrot.lane.b32.xlu0 %v311_v14, %s1527_s7  ;;  %1422 = vrcp.f32 %v307_v17 }
 0x102   : > { %v1423_v20 = vpop.eup %1422 }
 0x163   : > { %v319_v21 = vpop.permute.xlu0 %318 }
 0x164   : > { %v321_v22 = vmul.f32 %v1423_v20, %v319_v21 }
 0x166   : > { %323 = vrot.lane.b32.xlu1 %v321_v22, %s1527_s7 }
 0x167   : > { %v314_v25 = vpop.permute.xlu0 %313 }
 0x168   : > { %v316_v26 = vmul.f32 %v1423_v20, %v314_v25 }
 0x16a   : > { %337 = vperm.xlu1 %1414, %v335_v23  }
 0x16e   : > { %349 = vrot.lane.b32.xlu1 %v347_v24, %s1528_s10 }
 0x1d8   : > { %v324_v27 = vpop.permute.xlu1 %323 }
 0x1d9   : > { %v326_v28 = vadd.f32 %v324_v27, %v316_v26 }
 0x1db   : > { %1424 = vtanh.f32 %v326_v28 }
 0x1e5   : > { %v1636_v29 = vpop.permute.xlu1 %337 }
 0x1e6   : > { %vm339_vm4 = vcmp.eq.s32.totalorder %v1636_v29, 1 }
 0x1e7   : > { %v340_v30 = vsel %vm339_vm4, %v326_v28, %v314_v25 }
 0x1e8   : > { %v1425_v31 = vpop.eup %1424  ;;  %342 = vrot.lane.b32.xlu1 %v340_v30, %s1528_s10 }
 0x1e9   : > { %329 = vrot.lane.b32.xlu0 %v1425_v31, %s1526_s6  ;;  %v350_v32 = vpop.permute.xlu1 %349 }
 0x25a   : > { %v343_v33 = vpop.permute.xlu1 %342 }
 0x25b   : > { %346 = vst.msk [vmem:[#allocation3] sm:$0x3] %vm345_vm5, %v343_v33  ;;  %v330_v34 = vpop.permute.xlu0 %329 }
 0x25c   : > { %v1645_v35 = vmul.f32 %v1423_v20, %v330_v34 }
 0x25e   : > { %v352_v36 = vsel %vm339_vm4, %v1645_v35, %v350_v32 }
 0x25f   : > { %354 = vrot.lane.b32.xlu0 %v352_v36, %s1527_s7 }
 0x262   : > { %v419_v38 = vld [vmem:[#allocation3] sm:$0x3] }
 0x263   : > { %421 = vrot.lane.b32.xlu1 %v419_v38, %s1527_s7 }
 0x267   : > { %446 = vperm.xlu1 %1414, %v444_v39  }
 0x2d1   : > { %v355_v40 = vpop.permute.xlu0 %354 }
 0x2d2   : > { %357 = vst.msk [vmem:[#allocation2] sm:$0x3] %vm345_vm5, %v355_v40 }
 0x2d5   : > { %v422_v57 = vpop.permute.xlu1 %421 }
 0x2d9   : > { %v455_v41 = vld [vmem:[#allocation2] sm:$0x3] }
 0x2da   : > { %v366_v42 = vld [vmem:[#allocation2] sm:$0x3]  ;;  %457 = vrot.lane.b32.xlu1 %v455_v41, %s1528_s10  ;;  %v660_v41 = vstv %s659_s13 }
 0x2db   : > { %v367_v43 = vpack.c.bf16 %v366_v42, %v366_v42  ;;  %vm661_vm10 = vcmp.gt.s32.totalorder %v1629_v18, %v660_v41 }
 0x2dd   : > { %1316 = vmatmul.mubr.msk.bf16.vlgmr.msra.gmra.mxu1 %vm259_vm2, %v367_v43  ;;  %v662_v43 = vsel %vm661_vm10, 1, %v1525_v12 }
 0x2de   : > { %1328 = vmatpush3.bf16.msra.mxu1 %v1596_v1  ;;  %1331 = vmatprep.mubr.msk.bf16.mxu1 %vm1524_vm1, %v1523_v2 }
 0x2df   : > { %1329 = vmatprep.subr.bf16.mxu1 %v1523_v2 }
 0x2e2   : > { %1330 = vmatpush3.bf16.msra.mxu1 %v1601_v3  ;;  %v1666_v58 = vpop.permute.xlu1 %446 }
 0x2e3   : > { %1343 = vmatprep.subr.bf16.mxu1 %v1523_v2  ;;  %vm448_vm7 = vcmp.eq.s32.totalorder %v1666_v58, 1 }
 0x34c   : > { %v458_v0 = vpop.permute.xlu1 %457 }
 0x39d   : > { %v405_v45 = vpop.f32.mrf.mxu1 }
 0x39e   : > { %v411_v46 = vadd.f32 %v1248_v44, %v405_v45 }
 0x39f   : > { %v1317_v47 = vpop.f32.mrf.mxu1 }
 0x3a0   : > { %1426 = vtanh.f32 %v411_v46  ;;  %v1250_v51 = vmul.f32 -1.442695, %v411_v46 }
 0x3a1   : > { %v408_v48 = vpop.f32.mrf.mxu1 }
 0x3a2   : > { %1428 = vpow2.f32 %v1250_v51  ;;  %v1256_v51 = vld [vmem:[%s1589_s29 + $0x6] sm:$0x3] }
 0x3a3   : > { %v1318_v49 = vpop.f32.mrf.mxu1 }
 0x3ad   : > { %v1427_v50 = vpop.eup %1426 }
 0x3ae   : > { %426 = vrot.lane.b32.xlu0 %v1427_v50, %s1526_s6 }
 0x3af   : > { %v1429_v52 = vpop.eup %1428 }
 0x3b0   : > { %v415_v53 = vadd.f32 1.0, %v1429_v52 }
 0x3b2   : > { %1430 = vrcp.f32 %v415_v53 }
 0x3bf   : > { %v1431_v54 = vpop.eup %1430 }
 0x3c0   : > { %v424_v59 = vmul.f32 %v1431_v54, %v422_v57 }
 0x420   : > { %v427_v55 = vpop.permute.xlu0 %426 }
 0x421   : > { %v429_v56 = vmul.f32 %v1431_v54, %v427_v55 }
 0x423   : > { %431 = vrot.lane.b32.xlu0 %v429_v56, %s1527_s7 }
 0x495   : > { %v432_v60 = vpop.permute.xlu0 %431 }
 0x496   : > { %v434_v61 = vadd.f32 %v432_v60, %v424_v59 }
 0x498   : > { %1432 = vtanh.f32 %v434_v61  ;;  %v449_v62 = vsel %vm448_vm7, %v434_v61, %v422_v57 }
 0x499   : > { %451 = vrot.lane.b32.xlu1 %v449_v62, %s1528_s10 }
 0x4a5   : > { %v1433_v63 = vpop.eup %1432 }
 0x4a6   : > { %437 = vrot.lane.b32.xlu0 %v1433_v63, %s1526_s6 }
 0x50b   : > { %v452_v4 = vpop.permute.xlu1 %451 }
 0x50c   : > { %454 = vst.msk [vmem:[#allocation3] sm:$0x3] %vm345_vm5, %v452_v4 }
 0x513   : > { %v528_v6 = vld [vmem:[#allocation3] sm:$0x3] }
 0x514   : > { %530 = vrot.lane.b32.xlu1 %v528_v6, %s1527_s7 }
 0x518   : > { %555 = vperm.xlu1 %1414, %v553_v7   ;;  %v438_v8 = vpop.permute.xlu0 %437 }
 0x519   : > { %v1678_v9 = vmul.f32 %v1431_v54, %v438_v8 }
 0x51b   : > { %v460_v10 = vsel %vm448_vm7, %v1678_v9, %v458_v0 }
 0x51c   : > { %462 = vrot.lane.b32.xlu0 %v460_v10, %s1527_s7 }
 0x586   : > { %v531_v31 = vpop.permute.xlu1 %530 }
 0x58e   : > { %v463_v11 = vpop.permute.xlu0 %462 }
 0x58f   : > { %465 = vst.msk [vmem:[#allocation2] sm:$0x3] %vm345_vm5, %v463_v11 }
 0x593   : > { %v1696_v32 = vpop.permute.xlu1 %555 }
 0x594   : > { %vm557_vm9 = vcmp.eq.s32.totalorder %v1696_v32, 1 }
 0x596   : > { %v564_v13 = vld [vmem:[#allocation2] sm:$0x3] }
 0x597   : > { %v475_v14 = vld [vmem:[#allocation2] sm:$0x3]  ;;  %566 = vrot.lane.b32.xlu1 %v564_v13, %s1528_s10 }
 0x598   : > { %v476_v15 = vpack.c.bf16 %v475_v14, %v475_v14 }
 0x59a   : > { %1324 = vmatmul.mubr.msk.bf16.vlgmr.msra.gmra.mxu0 %vm259_vm2, %v476_v15  ;;  %v769_v15 = vstv %s768_s20 }
 0x59b   : > { %1336 = vmatpush3.bf16.msra.mxu0 %v1596_v1  ;;  %1339 = vmatprep.mubr.msk.bf16.mxu0 %vm1524_vm1, %v1523_v2  ;;  %vm770_vm12 = vcmp.gt.s32.totalorder %v1629_v18, %v769_v15 }
 0x59c   : > { %1337 = vmatprep.subr.bf16.mxu0 %v1523_v2 }
 0x59f   : > { %1338 = vmatpush3.bf16.msra.mxu0 %v1601_v3 }
 0x5a0   : > { %1351 = vmatprep.subr.bf16.mxu0 %v1523_v2 }
 0x609   : > { %v567_v39 = vpop.permute.xlu1 %566 }
 0x65a   : > { %v514_v17 = vpop.f32.mrf.mxu0 }
 0x65b   : > { %v520_v19 = vadd.f32 %v1252_v16, %v514_v17  ;;  %v771_v17 = vsel %vm770_vm12, 1, %v1525_v12 }
 0x65c   : > { %v1325_v20 = vpop.f32.mrf.mxu0 }
 0x65d   : > { %1434 = vtanh.f32 %v520_v19  ;;  %v1254_v24 = vmul.f32 -1.442695, %v520_v19 }
 0x65e   : > { %v517_v21 = vpop.f32.mrf.mxu0 }
 0x65f   : > { %1436 = vpow2.f32 %v1254_v24 }
 0x660   : > { %v1326_v22 = vpop.f32.mrf.mxu0 }
 0x66a   : > { %v1435_v23 = vpop.eup %1434 }
 0x66b   : > { %535 = vrot.lane.b32.xlu0 %v1435_v23, %s1526_s6 }
 0x66c   : > { %v1437_v25 = vpop.eup %1436 }
 0x66d   : > { %v524_v26 = vadd.f32 1.0, %v1437_v25 }
 0x66f   : > { %1438 = vrcp.f32 %v524_v26  ;;  %v1260_v26 = vld [vmem:[%s1589_s29 + $0x8] sm:$0x3] }
 0x67c   : > { %v1439_v27 = vpop.eup %1438 }
 0x67d   : > { %v533_v33 = vmul.f32 %v1439_v27, %v531_v31 }
 0x6dd   : > { %v536_v28 = vpop.permute.xlu0 %535 }
 0x6de   : > { %v538_v30 = vmul.f32 %v1439_v27, %v536_v28 }
 0x6e0   : > { %540 = vrot.lane.b32.xlu0 %v538_v30, %s1527_s7 }
 0x752   : > { %v541_v34 = vpop.permute.xlu0 %540 }
 0x753   : > { %v543_v36 = vadd.f32 %v541_v34, %v533_v33 }
 0x755   : > { %1440 = vtanh.f32 %v543_v36  ;;  %v558_v37 = vsel %vm557_vm9, %v543_v36, %v531_v31 }
 0x756   : > { %560 = vrot.lane.b32.xlu1 %v558_v37, %s1528_s10 }
 0x762   : > { %v1441_v38 = vpop.eup %1440 }
 0x763   : > { %546 = vrot.lane.b32.xlu0 %v1441_v38, %s1526_s6 }
 0x7c8   : > { %v561_v40 = vpop.permute.xlu1 %560 }
 0x7c9   : > { %563 = vst.msk [vmem:[#allocation3] sm:$0x3] %vm345_vm5, %v561_v40 }
 0x7d0   : > { %v637_v42 = vld [vmem:[#allocation3] sm:$0x3] }
 0x7d1   : > { %639 = vrot.lane.b32.xlu1 %v637_v42, %s1527_s7 }
 0x7d5   : > { %664 = vperm.xlu1 %1414, %v662_v43   ;;  %v547_v44 = vpop.permute.xlu0 %546 }
 0x7d6   : > { %v1708_v45 = vmul.f32 %v1439_v27, %v547_v44 }
 0x7d8   : > { %v569_v46 = vsel %vm557_vm9, %v1708_v45, %v567_v39 }
 0x7d9   : > { %571 = vrot.lane.b32.xlu0 %v569_v46, %s1527_s7 }
 0x843   : > { %v640_v4 = vpop.permute.xlu1 %639 }
 0x84b   : > { %v572_v47 = vpop.permute.xlu0 %571 }
 0x84c   : > { %574 = vst.msk [vmem:[#allocation2] sm:$0x3] %vm345_vm5, %v572_v47 }
 0x850   : > { %v1726_v5 = vpop.permute.xlu1 %664 }
 0x851   : > { %vm666_vm11 = vcmp.eq.s32.totalorder %v1726_v5, 1  ;;  %v1272_v5 = vld [vmem:[%s1589_s29 + $0xe] sm:$0x3] }
 0x853   : > { %v673_v48 = vld [vmem:[#allocation2] sm:$0x3] }
 0x854   : > { %v584_v49 = vld [vmem:[#allocation2] sm:$0x3]  ;;  %675 = vrot.lane.b32.xlu1 %v673_v48, %s1528_s10 }
 0x855   : > { %v585_v50 = vpack.c.bf16 %v584_v49, %v584_v49 }
 0x857   : > { %1332 = vmatmul.mubr.msk.bf16.vlgmr.msra.gmra.mxu1 %vm259_vm2, %v585_v50 }
 0x858   : > { %1344 = vmatpush3.bf16.msra.mxu1 %v1596_v1  ;;  %1347 = vmatprep.mubr.msk.bf16.mxu1 %vm1524_vm1, %v1523_v2 }
 0x859   : > { %1345 = vmatprep.subr.bf16.mxu1 %v1523_v2 }
 0x85c   : > { %1346 = vmatpush3.bf16.msra.mxu1 %v1601_v3 }
 0x85d   : > { %1359 = vmatprep.subr.bf16.mxu1 %v1523_v2 }
 0x8c6   : > { %v676_v13 = vpop.permute.xlu1 %675 }
 0x917   : > { %v623_v52 = vpop.f32.mrf.mxu1 }
 0x918   : > { %v629_v53 = vadd.f32 %v1256_v51, %v623_v52  ;;  %v878_v52 = vstv %s877_s21 }
 0x919   : > { %v1333_v54 = vpop.f32.mrf.mxu1  ;;  %vm879_vm14 = vcmp.gt.s32.totalorder %v1629_v18, %v878_v52 }
 0x91a   : > { %1442 = vtanh.f32 %v629_v53  ;;  %v1258_v59 = vmul.f32 -1.442695, %v629_v53  ;;  %v880_v54 = vsel %vm879_vm14, 1, %v1525_v12 }
 0x91b   : > { %v626_v55 = vpop.f32.mrf.mxu1 }
 0x91c   : > { %1444 = vpow2.f32 %v1258_v59 }
 0x91d   : > { %v1334_v56 = vpop.f32.mrf.mxu1 }
 0x927   : > { %v1443_v57 = vpop.eup %1442 }
 0x928   : > { %644 = vrot.lane.b32.xlu0 %v1443_v57, %s1526_s6 }
 0x929   : > { %v1445_v60 = vpop.eup %1444 }
 0x92a   : > { %v633_v61 = vadd.f32 1.0, %v1445_v60 }
 0x92c   : > { %1446 = vrcp.f32 %v633_v61 }
 0x939   : > { %v1447_v62 = vpop.eup %1446 }
 0x93a   : > { %v642_v6 = vmul.f32 %v1447_v62, %v640_v4 }
 0x99a   : > { %v645_v63 = vpop.permute.xlu0 %644 }
 0x99b   : > { %v647_v0 = vmul.f32 %v1447_v62, %v645_v63  ;;  %v1264_v63 = vld [vmem:[%s1589_s29 + $0xa] sm:$0x3] }
 0x99d   : > { %649 = vrot.lane.b32.xlu0 %v647_v0, %s1527_s7 }
 0xa0f   : > { %v650_v7 = vpop.permute.xlu0 %649 }
 0xa10   : > { %v652_v8 = vadd.f32 %v650_v7, %v642_v6 }
 0xa12   : > { %1448 = vtanh.f32 %v652_v8  ;;  %v667_v10 = vsel %vm666_vm11, %v652_v8, %v640_v4 }
 0xa13   : > { %669 = vrot.lane.b32.xlu1 %v667_v10, %s1528_s10 }
 0xa1f   : > { %v1449_v11 = vpop.eup %1448 }
 0xa20   : > { %655 = vrot.lane.b32.xlu0 %v1449_v11, %s1526_s6 }
 0xa85   : > { %v670_v14 = vpop.permute.xlu1 %669 }
 0xa86   : > { %672 = vst.msk [vmem:[#allocation3] sm:$0x3] %vm345_vm5, %v670_v14 }
 0xa8d   : > { %v746_v16 = vld [vmem:[#allocation3] sm:$0x3] }
 0xa8e   : > { %748 = vrot.lane.b32.xlu1 %v746_v16, %s1527_s7 }
 0xa92   : > { %773 = vperm.xlu1 %1414, %v771_v17   ;;  %v656_v19 = vpop.permute.xlu0 %655 }
 0xa93   : > { %v1738_v20 = vmul.f32 %v1447_v62, %v656_v19 }
 0xa95   : > { %v678_v21 = vsel %vm666_vm11, %v1738_v20, %v676_v13 }
 0xa96   : > { %680 = vrot.lane.b32.xlu0 %v678_v21, %s1527_s7 }
 0xb00   : > { %v749_v42 = vpop.permute.xlu1 %748 }
 0xb08   : > { %v681_v22 = vpop.permute.xlu0 %680 }
 0xb09   : > { %683 = vst.msk [vmem:[#allocation2] sm:$0x3] %vm345_vm5, %v681_v22 }
 0xb0d   : > { %v1755_v43 = vpop.permute.xlu1 %773 }
 0xb0e   : > { %vm775_vm13 = vcmp.eq.s32.totalorder %v1755_v43, 1 }
 0xb10   : > { %v782_v23 = vld [vmem:[#allocation2] sm:$0x3] }
 0xb11   : > { %v693_v24 = vld [vmem:[#allocation2] sm:$0x3]  ;;  %784 = vrot.lane.b32.xlu1 %v782_v23, %s1528_s10 }
 0xb12   : > { %v694_v25 = vpack.c.bf16 %v693_v24, %v693_v24 }
 0xb14   : > { %1340 = vmatmul.mubr.msk.bf16.vlgmr.msra.gmra.mxu0 %vm259_vm2, %v694_v25 }
 0xb15   : > { %1352 = vmatpush3.bf16.msra.mxu0 %v1596_v1  ;;  %1355 = vmatprep.mubr.msk.bf16.mxu0 %vm1524_vm1, %v1523_v2 }
 0xb16   : > { %1353 = vmatprep.subr.bf16.mxu0 %v1523_v2 }
 0xb19   : > { %1354 = vmatpush3.bf16.msra.mxu0 %v1601_v3 }
 0xb83   : > { %v785_v50 = vpop.permute.xlu1 %784 }
 0xbd4   : > { %v732_v27 = vpop.f32.mrf.mxu0 }
 0xbd5   : > { %v738_v28 = vadd.f32 %v1260_v26, %v732_v27  ;;  %v987_v26 = vstv %s986_s22 }
 0xbd6   : > { %v1341_v30 = vpop.f32.mrf.mxu0  ;;  %vm988_vm0 = vcmp.gt.s32.totalorder %v1629_v18, %v987_v26 }
 0xbd7   : > { %1450 = vtanh.f32 %v738_v28  ;;  %v1262_v36 = vmul.f32 -1.442695, %v738_v28  ;;  %v989_v28 = vsel %vm988_vm0, 1, %v1525_v12 }
 0xbd8   : > { %v735_v31 = vpop.f32.mrf.mxu0 }
 0xbd9   : > { %1452 = vpow2.f32 %v1262_v36 }
 0xbda   : > { %v1342_v33 = vpop.f32.mrf.mxu0 }
 0xbe4   : > { %v1451_v34 = vpop.eup %1450 }
 0xbe5   : > { %753 = vrot.lane.b32.xlu0 %v1451_v34, %s1526_s6 }
 0xbe6   : > { %v1453_v37 = vpop.eup %1452 }
 0xbe7   : > { %v742_v38 = vadd.f32 1.0, %v1453_v37 }
 0xbe9   : > { %1454 = vrcp.f32 %v742_v38 }
 0xbf6   : > { %v1455_v39 = vpop.eup %1454 }
 0xbf7   : > { %v751_v44 = vmul.f32 %v1455_v39, %v749_v42 }
 0xc57   : > { %v754_v40 = vpop.permute.xlu0 %753 }
 0xc58   : > { %v756_v41 = vmul.f32 %v1455_v39, %v754_v40 }
 0xc5a   : > { %758 = vrot.lane.b32.xlu0 %v756_v41, %s1527_s7 }
 0xccc   : > { %v759_v46 = vpop.permute.xlu0 %758 }
 0xccd   : > { %v761_v47 = vadd.f32 %v759_v46, %v751_v44 }
 0xccf   : > { %1456 = vtanh.f32 %v761_v47  ;;  %v776_v48 = vsel %vm775_vm13, %v761_v47, %v749_v42 }
 0xcd0   : > { %778 = vrot.lane.b32.xlu1 %v776_v48, %s1528_s10 }
 0xcdc   : > { %v1457_v49 = vpop.eup %1456 }
 0xcdd   : > { %764 = vrot.lane.b32.xlu0 %v1457_v49, %s1526_s6 }
 0xd42   : > { %v779_v51 = vpop.permute.xlu1 %778 }
 0xd43   : > { %781 = vst.msk [vmem:[#allocation3] sm:$0x3] %vm345_vm5, %v779_v51 }
 0xd4a   : > { %v855_v53 = vld [vmem:[#allocation3] sm:$0x3] }
 0xd4b   : > { %857 = vrot.lane.b32.xlu1 %v855_v53, %s1527_s7 }
 0xd4f   : > { %882 = vperm.xlu1 %1414, %v880_v54   ;;  %v765_v55 = vpop.permute.xlu0 %764 }
 0xd50   : > { %v1767_v56 = vmul.f32 %v1455_v39, %v765_v55  ;;  %v1268_v39 = vld [vmem:[%s1589_s29 + $0xc] sm:$0x3] }
 0xd52   : > { %v787_v57 = vsel %vm775_vm13, %v1767_v56, %v785_v50 }
 0xd53   : > { %789 = vrot.lane.b32.xlu0 %v787_v57, %s1527_s7 }
 0xdc5   : > { %v790_v59 = vpop.permute.xlu0 %789 }
 0xdc6   : > { %792 = vst.msk [vmem:[#allocation2] sm:$0x3] %vm345_vm5, %v790_v59 }
 0xdcd   : > { %v891_v60 = vld [vmem:[#allocation2] sm:$0x3] }
 0xdce   : > { %v802_v61 = vld [vmem:[#allocation2] sm:$0x3]  ;;  %893 = vrot.lane.b32.xlu1 %v891_v60, %s1528_s10 }
 0xdcf   : > { %v803_v62 = vpack.c.bf16 %v802_v61, %v802_v61 }
 0xdd1   : > { %1348 = vmatmul.mubr.msk.bf16.vlgmr.msra.gmra.mxu1 %vm259_vm2, %v803_v62 }
 0xdd2   : > { %1360 = vmatpush3.bf16.msra.mxu1 %v1596_v1  ;;  %1363 = vmatprep.mubr.msk.bf16.mxu1 %vm1524_vm1, %v1523_v2 }
 0xdd3   : > { %1361 = vmatprep.subr.bf16.mxu1 %v1523_v2 }
 0xdd6   : > { %1362 = vmatpush3.bf16.msra.mxu1 %v1601_v3  ;;  %v858_v3 = vpop.permute.xlu1 %857 }
 0xdda   : > { %v1784_v16 = vpop.permute.xlu1 %882 }
 0xddb   : > { %vm884_vm15 = vcmp.eq.s32.totalorder %v1784_v16, 1 }
 0xe40   : > { %v894_v24 = vpop.permute.xlu1 %893 }
 0xe91   : > { %v841_v0 = vpop.f32.mrf.mxu1 }
 0xe92   : > { %v847_v4 = vadd.f32 %v1264_v63, %v841_v0 }
 0xe93   : > { %v1349_v6 = vpop.f32.mrf.mxu1 }
 0xe94   : > { %1458 = vtanh.f32 %v847_v4  ;;  %v1266_v11 = vmul.f32 -1.442695, %v847_v4  ;;  %v1096_v4 = vstv %s1095_s23 }
 0xe95   : > { %v844_v7 = vpop.f32.mrf.mxu1  ;;  %vm1097_vm3 = vcmp.gt.s32.totalorder %v1629_v18, %v1096_v4 }
 0xe96   : > { %1460 = vpow2.f32 %v1266_v11  ;;  %v1098_v7 = vsel %vm1097_vm3, 1, %v1525_v12  ;;  %v466_v12 = vsel %vm448_vm7, %v1678_v9, 0.0 }
 0xe97   : > { %v1350_v8 = vpop.f32.mrf.mxu1 }
 0xea1   : > { %v1459_v10 = vpop.eup %1458 }
 0xea2   : > { %862 = vrot.lane.b32.xlu0 %v1459_v10, %s1526_s6 }
 0xea3   : > { %v1461_v1 = vpop.eup %1460 }
 0xea4   : > { %v851_v13 = vadd.f32 1.0, %v1461_v1 }
 0xea6   : > { %1462 = vrcp.f32 %v851_v13 }
 0xeb3   : > { %v1463_v14 = vpop.eup %1462 }
 0xeb4   : > { %v860_v17 = vmul.f32 %v1463_v14, %v858_v3 }
 0xf14   : > { %v863_v15 = vpop.permute.xlu0 %862 }
 0xf15   : > { %v865_v2 = vmul.f32 %v1463_v14, %v863_v15  ;;  %v684_v15 = vsel %vm666_vm11, %v1738_v20, 0.0 }
 0xf17   : > { %867 = vrot.lane.b32.xlu0 %v865_v2, %s1527_s7 }
 0xf89   : > { %v868_v19 = vpop.permute.xlu0 %867 }
 0xf8a   : > { %v870_v21 = vadd.f32 %v868_v19, %v860_v17 }
 0xf8c   : > { %1464 = vtanh.f32 %v870_v21  ;;  %v885_v22 = vsel %vm884_vm15, %v870_v21, %v858_v3 }
 0xf8d   : > { %887 = vrot.lane.b32.xlu1 %v885_v22, %s1528_s10 }
 0xf99   : > { %v1465_v23 = vpop.eup %1464 }
 0xf9a   : > { %873 = vrot.lane.b32.xlu0 %v1465_v23, %s1526_s6 }
 0xfff   : > { %v888_v25 = vpop.permute.xlu1 %887 }
0x1000   : > { %890 = vst.msk [vmem:[#allocation3] sm:$0x3] %vm345_vm5, %v888_v25 }
0x1007   : > { %v964_v27 = vld [vmem:[#allocation3] sm:$0x3] }
0x1008   : > { %966 = vrot.lane.b32.xlu1 %v964_v27, %s1527_s7 }
0x100c   : > { %991 = vperm.xlu1 %1414, %v989_v28   ;;  %v874_v30 = vpop.permute.xlu0 %873 }
0x100d   : > { %v1796_v31 = vmul.f32 %v1463_v14, %v874_v30 }
0x100f   : > { %v896_v33 = vsel %vm884_vm15, %v1796_v31, %v894_v24  ;;  %v902_v2 = vsel %vm884_vm15, %v1796_v31, 0.0 }
0x1010   : > { %898 = vrot.lane.b32.xlu0 %v896_v33, %s1527_s7 }
0x107a   : > { %v967_v54 = vpop.permute.xlu1 %966 }
0x1082   : > { %v899_v34 = vpop.permute.xlu0 %898 }
0x1083   : > { %901 = vst.msk [vmem:[#allocation2] sm:$0x3] %vm345_vm5, %v899_v34 }
0x1087   : > { %v1808_v55 = vpop.permute.xlu1 %991 }
0x1088   : > { %vm993_vm1 = vcmp.eq.s32.totalorder %v1808_v55, 1 }
0x108a   : > { %v1000_v36 = vld [vmem:[#allocation2] sm:$0x3] }
0x108b   : > { %v911_v37 = vld [vmem:[#allocation2] sm:$0x3]  ;;  %1002 = vrot.lane.b32.xlu1 %v1000_v36, %s1528_s10 }
0x108c   : > { %v912_v38 = vpack.c.bf16 %v911_v37, %v911_v37 }
0x108e   : > { %1356 = vmatmul.mubr.msk.bf16.vlgmr.msra.gmra.mxu0 %vm259_vm2, %v912_v38 }
0x10fd   : > { %v1003_v63 = vpop.permute.xlu1 %1002 }
0x114e   : > { %v950_v40 = vpop.f32.mrf.mxu0 }
0x114f   : > { %v956_v41 = vadd.f32 %v1268_v39, %v950_v40  ;;  %v358_v40 = vsel %vm339_vm4, %v1645_v35, 0.0 }
0x1150   : > { %v1357_v42 = vpop.f32.mrf.mxu0 }
0x1151   : > { %1466 = vtanh.f32 %v956_v41  ;;  %v1270_v48 = vmul.f32 -1.442695, %v956_v41  ;;  %v575_v41 = vsel %vm557_vm9, %v1708_v45, 0.0  ;;  %v793_v42 = vsel %vm775_vm13, %v1767_v56, 0.0 }
0x1152   : > { %v953_v44 = vpop.f32.mrf.mxu0 }
0x1153   : > { %1468 = vpow2.f32 %v1270_v48 }
0x1154   : > { %v1358_v46 = vpop.f32.mrf.mxu0 }
0x115e   : > { %v1467_v47 = vpop.eup %1466 }
0x115f   : > { %971 = vrot.lane.b32.xlu0 %v1467_v47, %s1526_s6 }
0x1160   : > { %v1469_v49 = vpop.eup %1468 }
0x1161   : > { %v960_v50 = vadd.f32 1.0, %v1469_v49 }
0x1163   : > { %1470 = vrcp.f32 %v960_v50 }
0x1170   : > { %v1471_v51 = vpop.eup %1470 }
0x1171   : > { %v969_v57 = vmul.f32 %v1471_v51, %v967_v54 }
0x11d1   : > { %v972_v52 = vpop.permute.xlu0 %971 }
0x11d2   : > { %v974_v53 = vmul.f32 %v1471_v51, %v972_v52 }
0x11d4   : > { %976 = vrot.lane.b32.xlu0 %v974_v53, %s1527_s7 }
0x1246   : > { %v977_v59 = vpop.permute.xlu0 %976 }
0x1247   : > { %v979_v60 = vadd.f32 %v977_v59, %v969_v57 }
0x1249   : > { %1472 = vtanh.f32 %v979_v60  ;;  %v994_v61 = vsel %vm993_vm1, %v979_v60, %v967_v54 }
0x124a   : > { %996 = vrot.lane.b32.xlu1 %v994_v61, %s1528_s10 }
0x1256   : > { %v1473_v62 = vpop.eup %1472 }
0x1257   : > { %982 = vrot.lane.b32.xlu0 %v1473_v62, %s1526_s6 }
0x12bc   : > { %v997_v0 = vpop.permute.xlu1 %996 }
0x12bd   : > { %999 = vst.msk [vmem:[#allocation3] sm:$0x3] %vm345_vm5, %v997_v0 }
0x12c4   : > { %v1073_v6 = vld [vmem:[#allocation3] sm:$0x3] }
0x12c5   : > { %1075 = vrot.lane.b32.xlu1 %v1073_v6, %s1527_s7 }
0x12c9   : > { %1100 = vperm.xlu1 %1414, %v1098_v7   ;;  %v983_v8 = vpop.permute.xlu0 %982 }
0x12ca   : > { %v985_v10 = vmul.f32 %v1471_v51, %v983_v8 }
0x12cc   : > { %v1005_v11 = vsel %vm993_vm1, %v985_v10, %v1003_v63  ;;  %v1011_v29 = vsel %vm993_vm1, %v985_v10, 0.0 }
0x12cd   : > { %1007 = vrot.lane.b32.xlu0 %v1005_v11, %s1527_s7 }
0x1337   : > { %v1076_v3 = vpop.permute.xlu1 %1075 }
0x133f   : > { %v1008_v1 = vpop.permute.xlu0 %1007 }
0x1340   : > { %1010 = vst.msk [vmem:[#allocation2] sm:$0x3] %vm345_vm5, %v1008_v1 }
0x1344   : > { %v1101_v17 = vpop.permute.xlu1 %1100 }
0x1347   : > { %v1109_v13 = vld [vmem:[#allocation2] sm:$0x3] }
0x1348   : > { %v1020_v14 = vld [vmem:[#allocation2] sm:$0x3]  ;;  %1111 = vrot.lane.b32.xlu1 %v1109_v13, %s1528_s10 }
0x1349   : > { %v1021_v18 = vpack.c.bf16 %v1020_v14, %v1020_v14 }
0x134b   : > { %1364 = vmatmul.mubr.msk.bf16.vlgmr.msra.gmra.mxu1 %vm259_vm2, %v1021_v18  ;;  %vm1102_vm2 = vcmp.eq.s32.totalorder %v1101_v17, 1 }
0x134c   : > { %468 = vrot.lane.b32.xlu1 %v466_v12, %s1527_s7 }
0x1350   : > { %686 = vrot.lane.b32.xlu1 %v684_v15, %s1527_s7 }
0x1354   : > { %904 = vrot.lane.b32.xlu1 %v902_v2, %s1527_s7 }
0x13ba   : > { %v1112_v19 = vpop.permute.xlu1 %1111 }
0x13be   : > { %v469_v58 = vpop.permute.xlu1 %468 }
0x13bf   : > { %1251 = vst.msk [vmem:[%s1594_s5 + $0x2] sm:$0x3] %vm345_vm5, %v469_v58 }
0x13c2   : > { %v687_v9 = vpop.permute.xlu1 %686 }
0x13c3   : > { %1259 = vst.msk [vmem:[%s1594_s5 + $0x6] sm:$0x3] %vm345_vm5, %v687_v9 }
0x13c6   : > { %v905_v21 = vpop.permute.xlu1 %904 }
0x13c7   : > { %1267 = vst.msk [vmem:[%s1594_s5 + $0xa] sm:$0x3] %vm345_vm5, %v905_v21 }
0x140b   : > { %v1059_v20 = vpop.f32.mrf.mxu1 }
0x140c   : > { %v1065_v22 = vadd.f32 %v1272_v5, %v1059_v20 }
0x140d   : > { %v1365_v23 = vpop.f32.mrf.mxu1 }
0x140e   : > { %1474 = vtanh.f32 %v1065_v22  ;;  %v1274_v26 = vmul.f32 -1.442695, %v1065_v22 }
0x140f   : > { %v1062_v16 = vpop.f32.mrf.mxu1 }
0x1410   : > { %1476 = vpow2.f32 %v1274_v26 }
0x1411   : > { %v1366_v24 = vpop.f32.mrf.mxu1 }
0x141b   : > { %v1475_v25 = vpop.eup %1474 }
0x141c   : > { %1080 = vrot.lane.b32.xlu0 %v1475_v25, %s1526_s6 }
0x141d   : > { %v1477_v27 = vpop.eup %1476 }
0x141e   : > { %v1069_v28 = vadd.f32 1.0, %v1477_v27 }
0x1420   : > { %1478 = vrcp.f32 %v1069_v28 }
0x142d   : > { %v1479_v30 = vpop.eup %1478 }
0x142e   : > { %v1078_v34 = vmul.f32 %v1479_v30, %v1076_v3 }
0x148e   : > { %v1081_v31 = vpop.permute.xlu0 %1080 }
0x148f   : > { %v1083_v33 = vmul.f32 %v1479_v30, %v1081_v31 }
0x1491   : > { %1085 = vrot.lane.b32.xlu0 %v1083_v33, %s1527_s7 }
0x1503   : > { %v1086_v36 = vpop.permute.xlu0 %1085 }
0x1504   : > { %v1088_v37 = vadd.f32 %v1086_v36, %v1078_v34 }
0x1506   : > { %1480 = vtanh.f32 %v1088_v37  ;;  %v1103_v38 = vsel %vm1102_vm2, %v1088_v37, %v1076_v3 }
0x1507   : > { %1105 = vrot.lane.b32.xlu1 %v1103_v38, %s1528_s10 }
0x1513   : > { %v1481_v39 = vpop.eup %1480 }
0x1514   : > { %1091 = vrot.lane.b32.xlu0 %v1481_v39, %s1526_s6 }
0x1518   : > { %360 = vrot.lane.b32.xlu0 %v358_v40, %s1527_s7 }
0x151c   : > { %577 = vrot.lane.b32.xlu0 %v575_v41, %s1527_s7 }
0x1520   : > { %795 = vrot.lane.b32.xlu0 %v793_v42, %s1527_s7 }
0x1524   : > { %1013 = vrot.lane.b32.xlu0 %v1011_v29, %s1527_s7 }
0x1579   : > { %v1106_v35 = vpop.permute.xlu1 %1105 }
0x157a   : > { %1108 = vst.msk [vmem:[#allocation3] sm:$0x3] %vm345_vm5, %v1106_v35 }
0x1586   : > { %v1092_v32 = vpop.permute.xlu0 %1091 }
0x1587   : > { %v1094_v45 = vmul.f32 %v1479_v30, %v1092_v32 }
0x1589   : > { %v1120_v44 = vsel %vm1102_vm2, %v1094_v45, 0.0  ;;  %v1114_v43 = vsel %vm1102_vm2, %v1094_v45, %v1112_v19 }
0x158a   : > { %1122 = vrot.lane.b32.xlu1 %v1120_v44, %s1527_s7  ;;  %1116 = vrot.lane.b32.xlu0 %v1114_v43, %s1527_s7  ;;  %v361_v56 = vpop.permute.xlu0 %360 }
0x158b   : > { %363 = vst.msk [vmem:[%s1594_s5] sm:$0x3] %vm345_vm5, %v361_v56 }
0x158e   : > { %v578_v46 = vpop.permute.xlu0 %577 }
0x158f   : > { %1255 = vst.msk [vmem:[%s1594_s5 + $0x4] sm:$0x3] %vm345_vm5, %v578_v46 }
0x1592   : > { %v796_v47 = vpop.permute.xlu0 %795 }
0x1593   : > { %1263 = vst.msk [vmem:[%s1594_s5 + $0x8] sm:$0x3] %vm345_vm5, %v796_v47 }
0x1596   : > { %v1014_v48 = vpop.permute.xlu0 %1013 }
0x1597   : > { %1271 = vst.msk [vmem:[%s1594_s5 + $0xc] sm:$0x3] %vm345_vm5, %v1014_v48 }
0x15fc   : > { %v1123_v49 = vpop.permute.xlu1 %1122  ;;  %v1117_v50 = vpop.permute.xlu0 %1116 }
0x15fd   : > { %1275 = vst.msk [vmem:[%s1594_s5 + $0xe] sm:$0x3] %vm345_vm5, %v1123_v49  ;;  %1119 = vst.msk [vmem:[#allocation2] sm:$0x3] %vm345_vm5, %v1117_v50 }
0x15fe PF: > { %s13_s16 = sadd.s32 1, %s1520_s16   ;;  %s1900_s12 = smov %s1512_s14 }
0x15ff   : > { %p10_p8 = scmp.ge.s32.totalorder %s13_s16, 6   ;;  %s1901_s13 = smov %s1516_s15 }
0x1600   : > { %s1902_s14 = smov %s1905_s17  ;;  %s1903_s15 = smov %s1909_s18 }
0x1601   :  { %12 = sbr.rel (!%p10_p8) target bundleno = 3 (0x3), region = 83 }

// kernel: _encoder_core.15
= control target key start
LH: loop header
LB: loop body
LE: loop exit
PB: predicated region body
PF: predicated region fallthrough
CT: control target
= control target key end

     0   :  { %v180_v0 = vmov 0   ;;  %vm102_vm0 = vcmask 523264   ;;  %v52_v22 = vlaneseq  ;;  %s268_s2 = inlined_call_operand.vmem [shape: f32[16,1], index: 2, kind: input, shape index: {}]   ;;  %s269_s3 = inlined_call_operand.vmem [shape: bf16[64,256], index: 3, kind: input, shape index: {}]   ;;  %s270_s0 = inlined_call_operand.vmem [shape: f32[16,64], index: 0, kind: input, shape index: {}]   ;;  %s271_s1 = inlined_call_operand.vmem [shape: f32[16,64], index: 1, kind: input, shape index: {}]   ;;  %s272_s4 = inlined_call_operand.vmem [shape: f32[1,256], index: 4, kind: input, shape index: {}]   ;;  %s273_s5 = inlined_call_operand.vmem [shape: f32[16,256], index: 5, kind: output, shape index: {}]  }
   0x1   :  { %167 = vset.pattern.permute.xlu0 %v180_v0  ;;  %v27_v1 = vld [vmem:[%s268_s2] sm:$0xff]  ;;  %v28_v2 = vld [vmem:[%s268_s2 + $0x8] sm:$0xff]  ;;  %138 = vmatprep.mubr.bf16.mxu0 %v180_v0  ;;  %v168_v3 = vld [vmem:[%s269_s3 + $0x34] ss:$8 sps:$4 sm:$0xff]  }
   0x2   :  { %31 = vperm.xlu0 %167, %v27_v1   ;;  %v170_v4 = vld [vmem:[%s269_s3 + $0x30] ss:$8 sps:$4 sm:$0xff]   ;;  %v171_v5 = vld [vmem:[%s269_s3 + $0x24] ss:$8 sps:$4 sm:$0xff]   ;;  %114 = vmatprep.subr.bf16.mxu0 %v168_v3  ;;  %v173_v6 = vld [vmem:[%s269_s3 + $0x20] ss:$8 sps:$4 sm:$0xff]  }
   0x3   :  { %115 = vmatpush1.bf16.msra.mxu0 %v170_v4  ;;  %v174_v7 = vld [vmem:[%s269_s3 + $0x14] ss:$8 sps:$4 sm:$0xff]   ;;  %v176_v8 = vld [vmem:[%s269_s3 + $0x10] ss:$8 sps:$4 sm:$0xff]   ;;  %v177_v9 = vld [vmem:[%s269_s3 + $0x4] ss:$8 sps:$4 sm:$0xff]  }
   0x4   :  { %116 = vmatprep.subr.bf16.mxu0 %v171_v5  ;;  %v179_v10 = vld [vmem:[%s269_s3] ss:$8 sps:$4 sm:$0xff]   ;;  %v53_v23 = vshrl.u32 %v52_v22, 7 }
   0x5   :  { %v21_v11 = vld [vmem:[%s270_s0] sm:$0xff]  ;;  %v22_v13 = vld [vmem:[%s270_s0 + $0x8] sm:$0xff] }
   0x6   :  { %36 = vperm.xlu0 %167, %v28_v2   ;;  %v23_v12 = vld [vmem:[%s271_s1] sm:$0xff]  ;;  %v24_v14 = vld [vmem:[%s271_s1 + $0x8] sm:$0xff]  ;;  %v54_v24 = vsub.s32 0, %v53_v23  ;;  %v58_v26 = vsub.s32 1, %v53_v23 }
   0x7   :  { %117 = vmatpush1.bf16.msra.mxu0 %v173_v6  ;;  %v25_v16 = vmax.f32 %v21_v11, %v23_v12  ;;  %v26_v17 = vmax.f32 %v22_v13, %v24_v14  ;;  %v50_v25 = vld [vmem:[%s272_s4] sm:$0x3] }
   0x8   :  { %118 = vmatprep.subr.bf16.mxu0 %v174_v7  ;;  %v55_v27 = vrot.slane %v50_v25, %v54_v24  ;;  %v59_v28 = vrot.slane %v50_v25, %v58_v26 }
   0xb   :  { %119 = vmatpush1.bf16.msra.mxu0 %v176_v8 }
   0xc   :  { %120 = vmatprep.subr.bf16.mxu0 %v177_v9 }
   0xf   :  { %121 = vmatpush1.bf16.msra.mxu0 %v179_v10 }
  0x7d   :  { %v32_v15 = vpop.permute.xlu0 %31 }
  0x7e   :  { %v39_v19 = vmul.f32 %v32_v15, %v25_v16 }
  0x81   :  { %v37_v18 = vpop.permute.xlu0 %36 }
  0x82   :  { %v40_v20 = vmul.f32 %v37_v18, %v26_v17 }
  0x84   :  { %v41_v21 = vpack.c.bf16 %v40_v20, %v39_v19 }
  0x86   :  { %165 = vmatmul.mubr.msk.bf16.vlgmr.msra.gmra.mxu0 %vm102_vm0, %v41_v21 }
 0x146   :  { %v140_v29 = vpop.f32.mrf.mxu0 }
 0x147   :  { %v141_v30 = vadd.f32 %v140_v29, %v55_v27 }
 0x148   :  { %v142_v31 = vpop.f32.mrf.mxu0 }
 0x149   :  { %149 = vst [vmem:[%s273_s5] sm:$0xff] %v141_v30  ;;  %v143_v32 = vadd.f32 %v142_v31, %v59_v28 }
 0x14a   :  { %v144_v33 = vpop.f32.mrf.mxu0 }
 0x14b   :  { %150 = vst [vmem:[%s273_s5 + $0x8] sm:$0xff] %v143_v32  ;;  %v145_v34 = vadd.f32 %v144_v33, %v55_v27 }
 0x14c   :  { %v146_v35 = vpop.f32.mrf.mxu0 }
 0x14d   :  { %151 = vst [vmem:[%s273_s5 + $0x10] sm:$0xff] %v145_v34  ;;  %v147_v36 = vadd.f32 %v146_v35, %v59_v28 }
 0x14f   :  { %152 = vst [vmem:[%s273_s5 + $0x18] sm:$0xff] %v147_v36 }

// kernel: _encoder_core.17
= control target key start
LH: loop header
LB: loop body
LE: loop exit
PB: predicated region body
PF: predicated region fallthrough
CT: control target
= control target key end

     0   :  { %v166_v0 = vmov 0   ;;  %vm92_vm0 = vcmask 523264   ;;  %v42_v16 = vlaneseq  ;;  %s239_s2 = inlined_call_operand.vmem [shape: f32[8,1], index: 2, kind: input, shape index: {}]   ;;  %s240_s3 = inlined_call_operand.vmem [shape: bf16[64,256], index: 3, kind: input, shape index: {}]   ;;  %s241_s0 = inlined_call_operand.vmem [shape: f32[8,64], index: 0, kind: input, shape index: {}]   ;;  %s242_s1 = inlined_call_operand.vmem [shape: f32[8,64], index: 1, kind: input, shape index: {}]   ;;  %s243_s4 = inlined_call_operand.vmem [shape: f32[1,256], index: 4, kind: input, shape index: {}]   ;;  %s244_s5 = inlined_call_operand.vmem [shape: f32[8,256], index: 5, kind: output, shape index: {}]  }
   0x1   :  { %153 = vset.pattern.permute.xlu0 %v166_v0  ;;  %v24_v1 = vld [vmem:[%s239_s2] sm:$0xff]  ;;  %128 = vmatprep.mubr.bf16.mxu0 %v166_v0  ;;  %v154_v2 = vld [vmem:[%s240_s3 + $0x34] ss:$8 sps:$4 sm:$0xff]   ;;  %v156_v3 = vld [vmem:[%s240_s3 + $0x30] ss:$8 sps:$4 sm:$0xff]  }
   0x2   :  { %27 = vperm.xlu0 %153, %v24_v1   ;;  %v157_v4 = vld [vmem:[%s240_s3 + $0x24] ss:$8 sps:$4 sm:$0xff]   ;;  %104 = vmatprep.subr.bf16.mxu0 %v154_v2  ;;  %v159_v5 = vld [vmem:[%s240_s3 + $0x20] ss:$8 sps:$4 sm:$0xff]   ;;  %v160_v6 = vld [vmem:[%s240_s3 + $0x14] ss:$8 sps:$4 sm:$0xff]  }
   0x3   :  { %105 = vmatpush1.bf16.msra.mxu0 %v156_v3  ;;  %v162_v7 = vld [vmem:[%s240_s3 + $0x10] ss:$8 sps:$4 sm:$0xff]   ;;  %v163_v8 = vld [vmem:[%s240_s3 + $0x4] ss:$8 sps:$4 sm:$0xff]   ;;  %v165_v9 = vld [vmem:[%s240_s3] ss:$8 sps:$4 sm:$0xff]  }
   0x4   :  { %106 = vmatprep.subr.bf16.mxu0 %v157_v4  ;;  %v21_v10 = vld [vmem:[%s241_s0] sm:$0xff]  ;;  %v43_v17 = vshrl.u32 %v42_v16, 7 }
   0x5   :  { %v22_v11 = vld [vmem:[%s242_s1] sm:$0xff] }
   0x6   :  { %v23_v12 = vmax.f32 %v21_v10, %v22_v11  ;;  %v44_v18 = vsub.s32 0, %v43_v17  ;;  %v40_v19 = vld [vmem:[%s243_s4] sm:$0x3]  ;;  %v48_v20 = vsub.s32 1, %v43_v17 }
   0x7   :  { %107 = vmatpush1.bf16.msra.mxu0 %v159_v5 }
   0x8   :  { %108 = vmatprep.subr.bf16.mxu0 %v160_v6  ;;  %v45_v21 = vrot.slane %v40_v19, %v44_v18  ;;  %v49_v22 = vrot.slane %v40_v19, %v48_v20 }
   0xb   :  { %109 = vmatpush1.bf16.msra.mxu0 %v162_v7 }
   0xc   :  { %110 = vmatprep.subr.bf16.mxu0 %v163_v8 }
   0xf   :  { %111 = vmatpush1.bf16.msra.mxu0 %v165_v9 }
  0x7d   :  { %v28_v13 = vpop.permute.xlu0 %27 }
  0x7e   :  { %v30_v14 = vmul.f32 %v28_v13, %v23_v12 }
  0x80   :  { %v31_v15 = vpack.c.bf16 %v30_v14, %v30_v14 }
  0x82   :  { %151 = vmatmul.mubr.msk.bf16.vlgmr.msra.gmra.mxu0 %vm92_vm0, %v31_v15 }
 0x142   :  { %v130_v23 = vpop.f32.mrf.mxu0 }
 0x143   :  { %v131_v24 = vadd.f32 %v130_v23, %v45_v21 }
 0x144   :  { %v132_v25 = vpop.f32.mrf.mxu0 }
 0x145   :  { %137 = vst [vmem:[%s244_s5] sm:$0xff] %v131_v24  ;;  %v133_v26 = vadd.f32 %v132_v25, %v49_v22 }
 0x146   :  { %v134_v27 = vpop.f32.mrf.mxu0 }
 0x147   :  { %138 = vst [vmem:[%s244_s5 + $0x8] sm:$0xff] %v133_v26 }
 0x148   :  { %v135_v28 = vpop.f32.mrf.mxu0 }

// kernel: _encoder_core.16
= control target key start
LH: loop header
LB: loop body
LE: loop exit
PB: predicated region body
PF: predicated region fallthrough
CT: control target
= control target key end

     0   :  { %s1510_s12 = smov 0   ;;  %s1512_s13 = smov 0   ;;  %s1832_s0 = inlined_call_operand.vmem [shape: f32[2,8,2,128], index: 0, kind: input, shape index: {}]   ;;  %s1833_s1 = inlined_call_operand.vmem [shape: bf16[2,32,128], index: 1, kind: input, shape index: {}]   ;;  %s1834_s2 = inlined_call_operand.vmem [shape: s32[2,1], index: 2, kind: input, shape index: {}]   ;;  %s1835_s3 = inlined_call_operand.vmem [shape: f32[2,8,2,32], index: 3, kind: output, shape index: {}]  }
   0x1   :  { %s1514_s14 = smov 0  }
   0x2 LB: > { %s25_s15 = sadd.s32 1, %s1478_s13  ;;  %p1230_p0 = scmp.ge.s32.totalorder %s1482_s14, 1  ;;  %s1482_s14 = sphi %s1514_s14, %s13_s14   ;;  %s1478_s13 = sphi %s1512_s13, %s1837_s13   ;;  %s1474_s12 = sphi %s1510_s12, %s1836_s12  }
   0x3   : > { %p27_p1 = scmp.ge.s32.totalorder %s25_s15, 2  ;;  %p168_p2 = scmp.lt.s32.totalorder %s1482_s14, 3 }
   0x5   : > { %s1839_s15 = smov (%p27_p1, %s25_s15), 0  ;;  %p169_p3 = pnand %p1230_p0, %p168_p2 }
   0x6   : > { %p206_p4 = scmp.lt.s32.totalorder (!%p169_p3), %s1474_s12, 1  ;;  %s1487_s23 = smov (!%p169_p3), 64  }
   0x7   : > { %172 = sbr.rel (%p169_p3) target bundleno = 5621 (0x15f5), region = 32  ;;  %s1488_s24 = smov (!%p169_p3), 32  }
   0x8   : > { %s1489_s27 = smov (!%p169_p3), 96  }
   0xc   : > { %vm235_vm0 = vcmask 254976   ;;  %v1484_v0 = vmov 0.0   ;;  %vm1485_vm1 = vmmov 0   ;;  %s1841_s12 = smov (!%p206_p4, %s1474_s12), 1  ;;  %vm259_vm2 = vcmask 261120  }
   0xd   : > { %1298 = vmatprep.subr.bf16.mxu0 %v1484_v0  ;;  %1302 = vmatprep.mubr.msk.bf16.mxu0 %vm1485_vm1, %v1484_v0  ;;  %236 = vst.msk [vmem:[#allocation2] sm:$0x3] %vm235_vm0, %v1484_v0  ;;  %237 = vst.msk [vmem:[#allocation3] sm:$0x3] %vm235_vm0, %v1484_v0  ;;  %s1538_s16 = sshll.u32 %s1841_s12, 4  ;;  %v1486_v11 = vmov 0  }
   0xe   : > { %1306 = vmatprep.subr.bf16.mxu1 %v1484_v0  ;;  %1310 = vmatprep.mubr.msk.bf16.mxu1 %vm1485_vm1, %v1484_v0  ;;  %s219_s19 = scalar_lea.vmem %s1833_s1, %s1538_s16  ;;  %s1567_s22 = scalar_lea.vmem %s1832_s0, %s1538_s16  ;;  %v1577_v17 = vld [vmem:[%s1834_s2] sm:$0x3] }
   0xf   : > { %v1544_v1 = vld [vmem:[%s219_s19 + $0x8] sm:$0xff]   ;;  %v1547_v2 = vld [vmem:[%s219_s19] sm:$0xff]   ;;  %1392 = vset.pattern.permute.xlu1 %v1486_v11  ;;  %1393 = vset.pattern.permute.xlu0 %v1486_v11  ;;  %vm334_vm3 = vcmp.gt.s32.totalorder %v1577_v17, 0  ;;  %vm443_vm5 = vcmp.gt.s32.totalorder %v1577_v17, 1  ;;  %vm552_vm7 = vcmp.gt.s32.totalorder %v1577_v17, 2  ;;  %vm661_vm9 = vcmp.gt.s32.totalorder %v1577_v17, 3  ;;  %s1778_s30 = scalar_lea.vmem %s1835_s3, %s1538_s16 }
  0x10   : > { %1299 = vmatpush3.bf16.msra.mxu0 %v1544_v1  ;;  %1307 = vmatpush3.bf16.msra.mxu1 %v1544_v1  ;;  %v244_v5 = vld [vmem:[%s1567_s22] sm:$0x3]  ;;  %v335_v21 = vsel %vm334_vm3, 1, %v1486_v11  ;;  %v444_v36 = vsel %vm443_vm5, 1, %v1486_v11  ;;  %v1241_v41 = vld [vmem:[%s1567_s22 + $0x2] sm:$0x3] }
  0x11   : > { %1300 = vmatprep.subr.bf16.mxu0 %v1484_v0  ;;  %1308 = vmatprep.subr.bf16.mxu1 %v1484_v0  ;;  %vm770_vm11 = vcmp.gt.s32.totalorder %v1577_v17, 4  ;;  %vm879_vm13 = vcmp.gt.s32.totalorder %v1577_v17, 5  ;;  %vm988_vm15 = vcmp.gt.s32.totalorder %v1577_v17, 6  ;;  %vm1097_vm3 = vcmp.gt.s32.totalorder %v1577_v17, 7 }
  0x14   : > { %v245_v3 = vld [vmem:[#allocation2] sm:$0x3]  ;;  %1301 = vmatpush3.bf16.msra.mxu0 %v1547_v2  ;;  %1309 = vmatpush3.bf16.msra.mxu1 %v1547_v2  ;;  %v311_v13 = vld [vmem:[#allocation3] sm:$0x3] }
  0x15   : > { %v246_v4 = vpack.c.bf16 %v245_v3, %v245_v3  ;;  %1314 = vmatprep.subr.bf16.mxu0 %v1484_v0  ;;  %1322 = vmatprep.subr.bf16.mxu1 %v1484_v0  ;;  %v347_v22 = vld [vmem:[#allocation2] sm:$0x3]  ;;  %v553_v3 = vsel %vm552_vm7, 1, %v1486_v11 }
  0x17   : > { %1303 = vmatmul.mubr.msk.bf16.vlgmr.msra.gmra.mxu0 %vm259_vm2, %v246_v4 }
  0x18   : > { %1315 = vmatpush3.bf16.msra.mxu0 %v1544_v1  ;;  %1318 = vmatprep.mubr.msk.bf16.mxu0 %vm1485_vm1, %v1484_v0 }
  0x19   : > { %1316 = vmatprep.subr.bf16.mxu0 %v1484_v0 }
  0x1c   : > { %1317 = vmatpush3.bf16.msra.mxu0 %v1547_v2 }
  0x1d   : > { %1330 = vmatprep.subr.bf16.mxu0 %v1484_v0 }
  0xd7   : > { %v297_v6 = vpop.f32.mrf.mxu0 }
  0xd8   : > { %v303_v7 = vadd.f32 %v297_v6, %v244_v5 }
  0xd9   : > { %v1304_v8 = vpop.f32.mrf.mxu0 }
  0xda   : > { %1396 = vtanh.f32 %v303_v7  ;;  %v1240_v14 = vmul.f32 -1.442695, %v303_v7 }
  0xdb   : > { %v300_v9 = vpop.f32.mrf.mxu0 }
  0xdc   : > { %1398 = vpow2.f32 %v1240_v14 }
  0xdd   : > { %v1305_v10 = vpop.f32.mrf.mxu0 }
  0xe7   : > { %v1397_v12 = vpop.eup %1396 }
  0xe8   : > { %318 = vrot.lane.b32.xlu0 %v1397_v12, %s1487_s23  ;;  %v1245_v12 = vld [vmem:[%s1567_s22 + $0x4] sm:$0x3] }
  0xe9   : > { %v1399_v15 = vpop.eup %1398 }
  0xea   : > { %v307_v16 = vadd.f32 1.0, %v1399_v15 }
  0xec   : > { %313 = vrot.lane.b32.xlu0 %v311_v13, %s1488_s24  ;;  %1400 = vrcp.f32 %v307_v16 }
  0xf9   : > { %v1401_v18 = vpop.eup %1400 }
 0x15a   : > { %v319_v19 = vpop.permute.xlu0 %318 }
 0x15b   : > { %v321_v20 = vmul.f32 %v1401_v18, %v319_v19 }
 0x15d   : > { %323 = vrot.lane.b32.xlu1 %v321_v20, %s1488_s24 }
 0x15e   : > { %v314_v23 = vpop.permute.xlu0 %313 }
 0x15f   : > { %v316_v24 = vmul.f32 %v1401_v18, %v314_v23 }
 0x161   : > { %337 = vperm.xlu1 %1392, %v335_v21  }
 0x165   : > { %349 = vrot.lane.b32.xlu1 %v347_v22, %s1489_s27 }
 0x1cf   : > { %v324_v25 = vpop.permute.xlu1 %323 }
 0x1d0   : > { %v326_v26 = vadd.f32 %v324_v25, %v316_v24 }
 0x1d2   : > { %1402 = vtanh.f32 %v326_v26 }
 0x1dc   : > { %v1583_v27 = vpop.permute.xlu1 %337 }
 0x1dd   : > { %vm339_vm4 = vcmp.eq.s32.totalorder %v1583_v27, 1 }
 0x1de   : > { %v340_v28 = vsel %vm339_vm4, %v326_v26, %v314_v23 }
 0x1df   : > { %v1403_v29 = vpop.eup %1402  ;;  %342 = vrot.lane.b32.xlu1 %v340_v28, %s1489_s27 }
 0x1e0   : > { %329 = vrot.lane.b32.xlu0 %v1403_v29, %s1487_s23  ;;  %v350_v30 = vpop.permute.xlu1 %349 }
 0x251   : > { %v343_v31 = vpop.permute.xlu1 %342 }
 0x252   : > { %346 = vst.msk [vmem:[#allocation3] sm:$0x3] %vm235_vm0, %v343_v31  ;;  %v330_v32 = vpop.permute.xlu0 %329 }
 0x253   : > { %v1591_v33 = vmul.f32 %v1401_v18, %v330_v32 }
 0x255   : > { %v352_v34 = vsel %vm339_vm4, %v1591_v33, %v350_v30 }
 0x256   : > { %354 = vrot.lane.b32.xlu0 %v352_v34, %s1488_s24 }
 0x259   : > { %v419_v35 = vld [vmem:[#allocation3] sm:$0x3] }
 0x25a   : > { %421 = vrot.lane.b32.xlu1 %v419_v35, %s1488_s24 }
 0x25e   : > { %446 = vperm.xlu1 %1392, %v444_v36  }
 0x2c8   : > { %v355_v37 = vpop.permute.xlu0 %354 }
 0x2c9   : > { %357 = vst.msk [vmem:[#allocation2] sm:$0x3] %vm235_vm0, %v355_v37 }
 0x2cc   : > { %v422_v54 = vpop.permute.xlu1 %421 }
 0x2d0   : > { %v455_v38 = vld [vmem:[#allocation2] sm:$0x3] }
 0x2d1   : > { %v366_v39 = vld [vmem:[#allocation2] sm:$0x3]  ;;  %457 = vrot.lane.b32.xlu1 %v455_v38, %s1489_s27  ;;  %v662_v38 = vsel %vm661_vm9, 1, %v1486_v11 }
 0x2d2   : > { %v367_v40 = vpack.c.bf16 %v366_v39, %v366_v39 }
 0x2d4   : > { %1311 = vmatmul.mubr.msk.bf16.vlgmr.msra.gmra.mxu1 %vm259_vm2, %v367_v40 }
 0x2d5   : > { %1323 = vmatpush3.bf16.msra.mxu1 %v1544_v1  ;;  %1326 = vmatprep.mubr.msk.bf16.mxu1 %vm1485_vm1, %v1484_v0 }
 0x2d6   : > { %1324 = vmatprep.subr.bf16.mxu1 %v1484_v0 }
 0x2d9   : > { %1325 = vmatpush3.bf16.msra.mxu1 %v1547_v2  ;;  %v1612_v55 = vpop.permute.xlu1 %446 }
 0x2da   : > { %1338 = vmatprep.subr.bf16.mxu1 %v1484_v0  ;;  %vm448_vm6 = vcmp.eq.s32.totalorder %v1612_v55, 1 }
 0x343   : > { %v458_v61 = vpop.permute.xlu1 %457 }
 0x394   : > { %v405_v42 = vpop.f32.mrf.mxu1 }
 0x395   : > { %v411_v43 = vadd.f32 %v1241_v41, %v405_v42 }
 0x396   : > { %v1312_v44 = vpop.f32.mrf.mxu1 }
 0x397   : > { %1404 = vtanh.f32 %v411_v43  ;;  %v1243_v48 = vmul.f32 -1.442695, %v411_v43 }
 0x398   : > { %v408_v45 = vpop.f32.mrf.mxu1 }
 0x399   : > { %1406 = vpow2.f32 %v1243_v48 }
 0x39a   : > { %v1313_v46 = vpop.f32.mrf.mxu1 }
 0x39b   : > { %v1249_v46 = vld [vmem:[%s1567_s22 + $0x6] sm:$0x3] }
 0x3a4   : > { %v1405_v47 = vpop.eup %1404 }
 0x3a5   : > { %426 = vrot.lane.b32.xlu0 %v1405_v47, %s1487_s23 }
 0x3a6   : > { %v1407_v49 = vpop.eup %1406 }
 0x3a7   : > { %v415_v50 = vadd.f32 1.0, %v1407_v49 }
 0x3a9   : > { %1408 = vrcp.f32 %v415_v50 }
 0x3b6   : > { %v1409_v51 = vpop.eup %1408 }
 0x3b7   : > { %v424_v56 = vmul.f32 %v1409_v51, %v422_v54 }
 0x417   : > { %v427_v52 = vpop.permute.xlu0 %426 }
 0x418   : > { %v429_v53 = vmul.f32 %v1409_v51, %v427_v52 }
 0x41a   : > { %431 = vrot.lane.b32.xlu0 %v429_v53, %s1488_s24 }
 0x48c   : > { %v432_v57 = vpop.permute.xlu0 %431 }
 0x48d   : > { %v434_v58 = vadd.f32 %v432_v57, %v424_v56 }
 0x48f   : > { %1410 = vtanh.f32 %v434_v58  ;;  %v449_v59 = vsel %vm448_vm6, %v434_v58, %v422_v54 }
 0x490   : > { %451 = vrot.lane.b32.xlu1 %v449_v59, %s1489_s27 }
 0x49c   : > { %v1411_v60 = vpop.eup %1410 }
 0x49d   : > { %437 = vrot.lane.b32.xlu0 %v1411_v60, %s1487_s23 }
 0x502   : > { %v452_v62 = vpop.permute.xlu1 %451 }
 0x503   : > { %454 = vst.msk [vmem:[#allocation3] sm:$0x3] %vm235_vm0, %v452_v62 }
 0x50a   : > { %v528_v63 = vld [vmem:[#allocation3] sm:$0x3] }
 0x50b   : > { %530 = vrot.lane.b32.xlu1 %v528_v63, %s1488_s24 }
 0x50f   : > { %555 = vperm.xlu1 %1392, %v553_v3   ;;  %v438_v4 = vpop.permute.xlu0 %437 }
 0x510   : > { %v1623_v5 = vmul.f32 %v1409_v51, %v438_v4 }
 0x512   : > { %v460_v6 = vsel %vm448_vm6, %v1623_v5, %v458_v61 }
 0x513   : > { %462 = vrot.lane.b32.xlu0 %v460_v6, %s1488_s24 }
 0x57d   : > { %v531_v26 = vpop.permute.xlu1 %530 }
 0x585   : > { %v463_v7 = vpop.permute.xlu0 %462 }
 0x586   : > { %465 = vst.msk [vmem:[#allocation2] sm:$0x3] %vm235_vm0, %v463_v7 }
 0x58a   : > { %v1641_v28 = vpop.permute.xlu1 %555 }
 0x58b   : > { %vm557_vm8 = vcmp.eq.s32.totalorder %v1641_v28, 1 }
 0x58d   : > { %v564_v8 = vld [vmem:[#allocation2] sm:$0x3] }
 0x58e   : > { %v475_v9 = vld [vmem:[#allocation2] sm:$0x3]  ;;  %566 = vrot.lane.b32.xlu1 %v564_v8, %s1489_s27 }
 0x58f   : > { %v476_v10 = vpack.c.bf16 %v475_v9, %v475_v9 }
 0x591   : > { %1319 = vmatmul.mubr.msk.bf16.vlgmr.msra.gmra.mxu0 %vm259_vm2, %v476_v10  ;;  %v771_v10 = vsel %vm770_vm11, 1, %v1486_v11 }
 0x592   : > { %1331 = vmatpush3.bf16.msra.mxu0 %v1544_v1  ;;  %1334 = vmatprep.mubr.msk.bf16.mxu0 %vm1485_vm1, %v1484_v0 }
 0x593   : > { %1332 = vmatprep.subr.bf16.mxu0 %v1484_v0 }
 0x596   : > { %1333 = vmatpush3.bf16.msra.mxu0 %v1547_v2 }
 0x597   : > { %1346 = vmatprep.subr.bf16.mxu0 %v1484_v0 }
 0x600   : > { %v567_v35 = vpop.permute.xlu1 %566 }
 0x651   : > { %v514_v13 = vpop.f32.mrf.mxu0 }
 0x652   : > { %v520_v14 = vadd.f32 %v1245_v12, %v514_v13 }
 0x653   : > { %v1320_v15 = vpop.f32.mrf.mxu0 }
 0x654   : > { %1412 = vtanh.f32 %v520_v14  ;;  %v1247_v20 = vmul.f32 -1.442695, %v520_v14 }
 0x655   : > { %v517_v16 = vpop.f32.mrf.mxu0 }
 0x656   : > { %1414 = vpow2.f32 %v1247_v20  ;;  %v1253_v20 = vld [vmem:[%s1567_s22 + $0x8] sm:$0x3] }
 0x657   : > { %v1321_v18 = vpop.f32.mrf.mxu0 }
 0x661   : > { %v1413_v19 = vpop.eup %1412 }
 0x662   : > { %535 = vrot.lane.b32.xlu0 %v1413_v19, %s1487_s23 }
 0x663   : > { %v1415_v21 = vpop.eup %1414 }
 0x664   : > { %v524_v22 = vadd.f32 1.0, %v1415_v21 }
 0x666   : > { %1416 = vrcp.f32 %v524_v22 }
 0x673   : > { %v1417_v23 = vpop.eup %1416 }
 0x674   : > { %v533_v29 = vmul.f32 %v1417_v23, %v531_v26 }
 0x6d4   : > { %v536_v24 = vpop.permute.xlu0 %535 }
 0x6d5   : > { %v538_v25 = vmul.f32 %v1417_v23, %v536_v24 }
 0x6d7   : > { %540 = vrot.lane.b32.xlu0 %v538_v25, %s1488_s24 }
 0x749   : > { %v541_v30 = vpop.permute.xlu0 %540 }
 0x74a   : > { %v543_v31 = vadd.f32 %v541_v30, %v533_v29 }
 0x74c   : > { %1418 = vtanh.f32 %v543_v31  ;;  %v558_v32 = vsel %vm557_vm8, %v543_v31, %v531_v26 }
 0x74d   : > { %560 = vrot.lane.b32.xlu1 %v558_v32, %s1489_s27 }
 0x759   : > { %v1419_v34 = vpop.eup %1418 }
 0x75a   : > { %546 = vrot.lane.b32.xlu0 %v1419_v34, %s1487_s23 }
 0x7bf   : > { %v561_v36 = vpop.permute.xlu1 %560 }
 0x7c0   : > { %563 = vst.msk [vmem:[#allocation3] sm:$0x3] %vm235_vm0, %v561_v36 }
 0x7c7   : > { %v637_v37 = vld [vmem:[#allocation3] sm:$0x3] }
 0x7c8   : > { %639 = vrot.lane.b32.xlu1 %v637_v37, %s1488_s24 }
 0x7cc   : > { %664 = vperm.xlu1 %1392, %v662_v38   ;;  %v547_v39 = vpop.permute.xlu0 %546 }
 0x7cd   : > { %v1652_v40 = vmul.f32 %v1417_v23, %v547_v39 }
 0x7cf   : > { %v569_v41 = vsel %vm557_vm8, %v1652_v40, %v567_v35 }
 0x7d0   : > { %571 = vrot.lane.b32.xlu0 %v569_v41, %s1488_s24 }
 0x83a   : > { %v640_v60 = vpop.permute.xlu1 %639 }
 0x842   : > { %v572_v42 = vpop.permute.xlu0 %571 }
 0x843   : > { %574 = vst.msk [vmem:[#allocation2] sm:$0x3] %vm235_vm0, %v572_v42 }
 0x847   : > { %v1670_v61 = vpop.permute.xlu1 %664 }
 0x848   : > { %vm666_vm10 = vcmp.eq.s32.totalorder %v1670_v61, 1 }
 0x84a   : > { %v673_v43 = vld [vmem:[#allocation2] sm:$0x3] }
 0x84b   : > { %v584_v44 = vld [vmem:[#allocation2] sm:$0x3]  ;;  %675 = vrot.lane.b32.xlu1 %v673_v43, %s1489_s27 }
 0x84c   : > { %v585_v45 = vpack.c.bf16 %v584_v44, %v584_v44 }
 0x84e   : > { %1327 = vmatmul.mubr.msk.bf16.vlgmr.msra.gmra.mxu1 %vm259_vm2, %v585_v45 }
 0x84f   : > { %1339 = vmatpush3.bf16.msra.mxu1 %v1544_v1  ;;  %1342 = vmatprep.mubr.msk.bf16.mxu1 %vm1485_vm1, %v1484_v0 }
 0x850   : > { %1340 = vmatprep.subr.bf16.mxu1 %v1484_v0 }
 0x853   : > { %1341 = vmatpush3.bf16.msra.mxu1 %v1547_v2 }
 0x854   : > { %1354 = vmatprep.subr.bf16.mxu1 %v1484_v0 }
 0x8bd   : > { %v676_v7 = vpop.permute.xlu1 %675 }
 0x90e   : > { %v623_v47 = vpop.f32.mrf.mxu1 }
 0x90f   : > { %v629_v48 = vadd.f32 %v1249_v46, %v623_v47  ;;  %v880_v47 = vsel %vm879_vm13, 1, %v1486_v11 }
 0x910   : > { %v1328_v49 = vpop.f32.mrf.mxu1 }
 0x911   : > { %1420 = vtanh.f32 %v629_v48  ;;  %v1251_v53 = vmul.f32 -1.442695, %v629_v48 }
 0x912   : > { %v626_v50 = vpop.f32.mrf.mxu1 }
 0x913   : > { %1422 = vpow2.f32 %v1251_v53 }
 0x914   : > { %v1329_v51 = vpop.f32.mrf.mxu1 }
 0x91e   : > { %v1421_v52 = vpop.eup %1420 }
 0x91f   : > { %644 = vrot.lane.b32.xlu0 %v1421_v52, %s1487_s23 }
 0x920   : > { %v1423_v54 = vpop.eup %1422 }
 0x921   : > { %v633_v56 = vadd.f32 1.0, %v1423_v54 }
 0x923   : > { %1424 = vrcp.f32 %v633_v56  ;;  %v1257_v56 = vld [vmem:[%s1567_s22 + $0xa] sm:$0x3] }
 0x930   : > { %v1425_v57 = vpop.eup %1424 }
 0x931   : > { %v642_v62 = vmul.f32 %v1425_v57, %v640_v60 }
 0x991   : > { %v645_v58 = vpop.permute.xlu0 %644 }
 0x992   : > { %v647_v59 = vmul.f32 %v1425_v57, %v645_v58 }
 0x994   : > { %649 = vrot.lane.b32.xlu0 %v647_v59, %s1488_s24 }
 0xa06   : > { %v650_v63 = vpop.permute.xlu0 %649 }
 0xa07   : > { %v652_v3 = vadd.f32 %v650_v63, %v642_v62 }
 0xa09   : > { %1426 = vtanh.f32 %v652_v3  ;;  %v667_v4 = vsel %vm666_vm10, %v652_v3, %v640_v60 }
 0xa0a   : > { %669 = vrot.lane.b32.xlu1 %v667_v4, %s1489_s27 }
 0xa16   : > { %v1427_v6 = vpop.eup %1426 }
 0xa17   : > { %655 = vrot.lane.b32.xlu0 %v1427_v6, %s1487_s23 }
 0xa7c   : > { %v670_v8 = vpop.permute.xlu1 %669 }
 0xa7d   : > { %672 = vst.msk [vmem:[#allocation3] sm:$0x3] %vm235_vm0, %v670_v8 }
 0xa84   : > { %v746_v9 = vld [vmem:[#allocation3] sm:$0x3] }
 0xa85   : > { %748 = vrot.lane.b32.xlu1 %v746_v9, %s1488_s24 }
 0xa89   : > { %773 = vperm.xlu1 %1392, %v771_v10   ;;  %v656_v12 = vpop.permute.xlu0 %655 }
 0xa8a   : > { %v1681_v13 = vmul.f32 %v1425_v57, %v656_v12 }
 0xa8c   : > { %v678_v14 = vsel %vm666_vm10, %v1681_v13, %v676_v7 }
 0xa8d   : > { %680 = vrot.lane.b32.xlu0 %v678_v14, %s1488_s24 }
 0xaf7   : > { %v749_v36 = vpop.permute.xlu1 %748 }
 0xaff   : > { %v681_v15 = vpop.permute.xlu0 %680 }
 0xb00   : > { %683 = vst.msk [vmem:[#allocation2] sm:$0x3] %vm235_vm0, %v681_v15 }
 0xb04   : > { %v1698_v37 = vpop.permute.xlu1 %773 }
 0xb05   : > { %vm775_vm12 = vcmp.eq.s32.totalorder %v1698_v37, 1 }
 0xb07   : > { %v782_v16 = vld [vmem:[#allocation2] sm:$0x3] }
 0xb08   : > { %v693_v18 = vld [vmem:[#allocation2] sm:$0x3]  ;;  %784 = vrot.lane.b32.xlu1 %v782_v16, %s1489_s27 }
 0xb09   : > { %v694_v19 = vpack.c.bf16 %v693_v18, %v693_v18 }
 0xb0b   : > { %1335 = vmatmul.mubr.msk.bf16.vlgmr.msra.gmra.mxu0 %vm259_vm2, %v694_v19 }
 0xb0c   : > { %1347 = vmatpush3.bf16.msra.mxu0 %v1544_v1  ;;  %1350 = vmatprep.mubr.msk.bf16.mxu0 %vm1485_vm1, %v1484_v0 }
 0xb0d   : > { %1348 = vmatprep.subr.bf16.mxu0 %v1484_v0 }
 0xb10   : > { %1349 = vmatpush3.bf16.msra.mxu0 %v1547_v2 }
 0xb7a   : > { %v785_v44 = vpop.permute.xlu1 %784 }
 0xbcb   : > { %v732_v21 = vpop.f32.mrf.mxu0 }
 0xbcc   : > { %v738_v22 = vadd.f32 %v1253_v20, %v732_v21  ;;  %v989_v20 = vsel %vm988_vm15, 1, %v1486_v11 }
 0xbcd   : > { %v1336_v23 = vpop.f32.mrf.mxu0 }
 0xbce   : > { %1428 = vtanh.f32 %v738_v22  ;;  %v1255_v29 = vmul.f32 -1.442695, %v738_v22 }
 0xbcf   : > { %v735_v24 = vpop.f32.mrf.mxu0 }
 0xbd0   : > { %1430 = vpow2.f32 %v1255_v29 }
 0xbd1   : > { %v1337_v25 = vpop.f32.mrf.mxu0 }
 0xbdb   : > { %v1429_v26 = vpop.eup %1428 }
 0xbdc   : > { %753 = vrot.lane.b32.xlu0 %v1429_v26, %s1487_s23 }
 0xbdd   : > { %v1431_v30 = vpop.eup %1430 }
 0xbde   : > { %v742_v31 = vadd.f32 1.0, %v1431_v30  ;;  %v1261_v30 = vld [vmem:[%s1567_s22 + $0xc] sm:$0x3] }
 0xbe0   : > { %1432 = vrcp.f32 %v742_v31 }
 0xbed   : > { %v1433_v32 = vpop.eup %1432 }
 0xbee   : > { %v751_v38 = vmul.f32 %v1433_v32, %v749_v36 }
 0xc4e   : > { %v754_v34 = vpop.permute.xlu0 %753 }
 0xc4f   : > { %v756_v35 = vmul.f32 %v1433_v32, %v754_v34 }
 0xc51   : > { %758 = vrot.lane.b32.xlu0 %v756_v35, %s1488_s24 }
 0xcc3   : > { %v759_v39 = vpop.permute.xlu0 %758 }
 0xcc4   : > { %v761_v41 = vadd.f32 %v759_v39, %v751_v38 }
 0xcc6   : > { %1434 = vtanh.f32 %v761_v41  ;;  %v776_v42 = vsel %vm775_vm12, %v761_v41, %v749_v36 }
 0xcc7   : > { %778 = vrot.lane.b32.xlu1 %v776_v42, %s1489_s27 }
 0xcd3   : > { %v1435_v43 = vpop.eup %1434 }
 0xcd4   : > { %764 = vrot.lane.b32.xlu0 %v1435_v43, %s1487_s23 }
 0xd39   : > { %v779_v45 = vpop.permute.xlu1 %778 }
 0xd3a   : > { %781 = vst.msk [vmem:[#allocation3] sm:$0x3] %vm235_vm0, %v779_v45 }
 0xd41   : > { %v855_v46 = vld [vmem:[#allocation3] sm:$0x3] }
 0xd42   : > { %857 = vrot.lane.b32.xlu1 %v855_v46, %s1488_s24 }
 0xd46   : > { %882 = vperm.xlu1 %1392, %v880_v47   ;;  %v765_v48 = vpop.permute.xlu0 %764 }
 0xd47   : > { %v1709_v49 = vmul.f32 %v1433_v32, %v765_v48 }
 0xd49   : > { %v787_v50 = vsel %vm775_vm12, %v1709_v49, %v785_v44 }
 0xd4a   : > { %789 = vrot.lane.b32.xlu0 %v787_v50, %s1488_s24 }
 0xdbc   : > { %v790_v51 = vpop.permute.xlu0 %789 }
 0xdbd   : > { %792 = vst.msk [vmem:[#allocation2] sm:$0x3] %vm235_vm0, %v790_v51 }
 0xdc4   : > { %v891_v52 = vld [vmem:[#allocation2] sm:$0x3] }
 0xdc5   : > { %v802_v53 = vld [vmem:[#allocation2] sm:$0x3]  ;;  %893 = vrot.lane.b32.xlu1 %v891_v52, %s1489_s27 }
 0xdc6   : > { %v803_v54 = vpack.c.bf16 %v802_v53, %v802_v53 }
 0xdc8   : > { %1343 = vmatmul.mubr.msk.bf16.vlgmr.msra.gmra.mxu1 %vm259_vm2, %v803_v54 }
 0xdc9   : > { %1355 = vmatpush3.bf16.msra.mxu1 %v1544_v1  ;;  %1358 = vmatprep.mubr.msk.bf16.mxu1 %vm1485_vm1, %v1484_v0 }
 0xdca   : > { %1356 = vmatprep.subr.bf16.mxu1 %v1484_v0 }
 0xdcd   : > { %1357 = vmatpush3.bf16.msra.mxu1 %v1547_v2  ;;  %v858_v2 = vpop.permute.xlu1 %857 }
 0xdd1   : > { %v1726_v8 = vpop.permute.xlu1 %882 }
 0xdd2   : > { %vm884_vm14 = vcmp.eq.s32.totalorder %v1726_v8, 1 }
 0xe37   : > { %v894_v16 = vpop.permute.xlu1 %893 }
 0xe88   : > { %v841_v57 = vpop.f32.mrf.mxu1 }
 0xe89   : > { %v847_v58 = vadd.f32 %v1257_v56, %v841_v57 }
 0xe8a   : > { %v1344_v59 = vpop.f32.mrf.mxu1 }
 0xe8b   : > { %1436 = vtanh.f32 %v847_v58  ;;  %v1259_v3 = vmul.f32 -1.442695, %v847_v58  ;;  %v1098_v58 = vsel %vm1097_vm3, 1, %v1486_v11  ;;  %v466_v11 = vsel %vm448_vm6, %v1623_v5, 0.0 }
 0xe8c   : > { %v844_v60 = vpop.f32.mrf.mxu1 }
 0xe8d   : > { %1438 = vpow2.f32 %v1259_v3 }
 0xe8e   : > { %v1345_v62 = vpop.f32.mrf.mxu1 }
 0xe98   : > { %v1437_v63 = vpop.eup %1436 }
 0xe99   : > { %862 = vrot.lane.b32.xlu0 %v1437_v63, %s1487_s23 }
 0xe9a   : > { %v1439_v1 = vpop.eup %1438 }
 0xe9b   : > { %v851_v4 = vadd.f32 1.0, %v1439_v1 }
 0xe9d   : > { %1440 = vrcp.f32 %v851_v4  ;;  %v684_v4 = vsel %vm666_vm10, %v1681_v13, 0.0  ;;  %v1265_v13 = vld [vmem:[%s1567_s22 + $0xe] sm:$0x3] }
 0xeaa   : > { %v1441_v6 = vpop.eup %1440 }
 0xeab   : > { %v860_v9 = vmul.f32 %v1441_v6, %v858_v2 }
 0xf0b   : > { %v863_v7 = vpop.permute.xlu0 %862 }
 0xf0c   : > { %v865_v0 = vmul.f32 %v1441_v6, %v863_v7 }
 0xf0e   : > { %867 = vrot.lane.b32.xlu0 %v865_v0, %s1488_s24 }
 0xf80   : > { %v868_v10 = vpop.permute.xlu0 %867 }
 0xf81   : > { %v870_v12 = vadd.f32 %v868_v10, %v860_v9 }
 0xf83   : > { %1442 = vtanh.f32 %v870_v12  ;;  %v885_v14 = vsel %vm884_vm14, %v870_v12, %v858_v2 }
 0xf84   : > { %887 = vrot.lane.b32.xlu1 %v885_v14, %s1489_s27 }
 0xf90   : > { %v1443_v15 = vpop.eup %1442 }
 0xf91   : > { %873 = vrot.lane.b32.xlu0 %v1443_v15, %s1487_s23 }
 0xff6   : > { %v888_v18 = vpop.permute.xlu1 %887 }
 0xff7   : > { %890 = vst.msk [vmem:[#allocation3] sm:$0x3] %vm235_vm0, %v888_v18 }
 0xffe   : > { %v964_v19 = vld [vmem:[#allocation3] sm:$0x3] }
 0xfff   : > { %966 = vrot.lane.b32.xlu1 %v964_v19, %s1488_s24 }
0x1003   : > { %991 = vperm.xlu1 %1392, %v989_v20   ;;  %v874_v21 = vpop.permute.xlu0 %873 }
0x1004   : > { %v876_v22 = vmul.f32 %v1441_v6, %v874_v21 }
0x1006   : > { %v896_v23 = vsel %vm884_vm14, %v876_v22, %v894_v16  ;;  %v902_v6 = vsel %vm884_vm14, %v876_v22, 0.0 }
0x1007   : > { %898 = vrot.lane.b32.xlu0 %v896_v23, %s1488_s24 }
0x1071   : > { %v967_v46 = vpop.permute.xlu1 %966 }
0x1079   : > { %v899_v24 = vpop.permute.xlu0 %898 }
0x107a   : > { %901 = vst.msk [vmem:[#allocation2] sm:$0x3] %vm235_vm0, %v899_v24 }
0x107e   : > { %v1746_v47 = vpop.permute.xlu1 %991 }
0x107f   : > { %vm993_vm1 = vcmp.eq.s32.totalorder %v1746_v47, 1 }
0x1081   : > { %v1000_v25 = vld [vmem:[#allocation2] sm:$0x3] }
0x1082   : > { %v911_v26 = vld [vmem:[#allocation2] sm:$0x3]  ;;  %1002 = vrot.lane.b32.xlu1 %v1000_v25, %s1489_s27 }
0x1083   : > { %v912_v29 = vpack.c.bf16 %v911_v26, %v911_v26 }
0x1085   : > { %1351 = vmatmul.mubr.msk.bf16.vlgmr.msra.gmra.mxu0 %vm259_vm2, %v912_v29 }
0x10f4   : > { %v1003_v54 = vpop.permute.xlu1 %1002 }
0x1145   : > { %v950_v31 = vpop.f32.mrf.mxu0 }
0x1146   : > { %v956_v32 = vadd.f32 %v1261_v30, %v950_v31  ;;  %v358_v30 = vsel %vm339_vm4, %v1591_v33, 0.0  ;;  %v575_v31 = vsel %vm557_vm8, %v1652_v40, 0.0 }
0x1147   : > { %v1352_v34 = vpop.f32.mrf.mxu0 }
0x1148   : > { %1444 = vtanh.f32 %v956_v32  ;;  %v1263_v39 = vmul.f32 -1.442695, %v956_v32  ;;  %v793_v32 = vsel %vm775_vm12, %v1709_v49, 0.0 }
0x1149   : > { %v953_v35 = vpop.f32.mrf.mxu0 }
0x114a   : > { %1446 = vpow2.f32 %v1263_v39 }
0x114b   : > { %v1353_v36 = vpop.f32.mrf.mxu0 }
0x1155   : > { %v1445_v38 = vpop.eup %1444 }
0x1156   : > { %971 = vrot.lane.b32.xlu0 %v1445_v38, %s1487_s23 }
0x1157   : > { %v1447_v41 = vpop.eup %1446 }
0x1158   : > { %v960_v42 = vadd.f32 1.0, %v1447_v41 }
0x115a   : > { %1448 = vrcp.f32 %v960_v42 }
0x1167   : > { %v1449_v43 = vpop.eup %1448 }
0x1168   : > { %v969_v48 = vmul.f32 %v1449_v43, %v967_v46 }
0x11c8   : > { %v972_v44 = vpop.permute.xlu0 %971 }
0x11c9   : > { %v974_v45 = vmul.f32 %v1449_v43, %v972_v44 }
0x11cb   : > { %976 = vrot.lane.b32.xlu0 %v974_v45, %s1488_s24 }
0x123d   : > { %v977_v50 = vpop.permute.xlu0 %976 }
0x123e   : > { %v979_v51 = vadd.f32 %v977_v50, %v969_v48 }
0x1240   : > { %1450 = vtanh.f32 %v979_v51  ;;  %v994_v52 = vsel %vm993_vm1, %v979_v51, %v967_v46 }
0x1241   : > { %996 = vrot.lane.b32.xlu1 %v994_v52, %s1489_s27 }
0x124d   : > { %v1451_v53 = vpop.eup %1450 }
0x124e   : > { %982 = vrot.lane.b32.xlu0 %v1451_v53, %s1487_s23 }
0x12b3   : > { %v997_v56 = vpop.permute.xlu1 %996 }
0x12b4   : > { %999 = vst.msk [vmem:[#allocation3] sm:$0x3] %vm235_vm0, %v997_v56 }
0x12bb   : > { %v1073_v57 = vld [vmem:[#allocation3] sm:$0x3] }
0x12bc   : > { %1075 = vrot.lane.b32.xlu1 %v1073_v57, %s1488_s24 }
0x12c0   : > { %1100 = vperm.xlu1 %1392, %v1098_v58   ;;  %v983_v59 = vpop.permute.xlu0 %982 }
0x12c1   : > { %v985_v60 = vmul.f32 %v1449_v43, %v983_v59 }
0x12c3   : > { %v1005_v62 = vsel %vm993_vm1, %v985_v60, %v1003_v54  ;;  %v1011_v27 = vsel %vm993_vm1, %v985_v60, 0.0 }
0x12c4   : > { %1007 = vrot.lane.b32.xlu0 %v1005_v62, %s1488_s24 }
0x132e   : > { %v1076_v7 = vpop.permute.xlu1 %1075 }
0x1336   : > { %v1008_v63 = vpop.permute.xlu0 %1007 }
0x1337   : > { %1010 = vst.msk [vmem:[#allocation2] sm:$0x3] %vm235_vm0, %v1008_v63 }
0x133b   : > { %v1101_v0 = vpop.permute.xlu1 %1100 }
0x133e   : > { %v1109_v3 = vld [vmem:[#allocation2] sm:$0x3] }
0x133f   : > { %v1020_v1 = vld [vmem:[#allocation2] sm:$0x3]  ;;  %1111 = vrot.lane.b32.xlu1 %v1109_v3, %s1489_s27 }
0x1340   : > { %v1021_v17 = vpack.c.bf16 %v1020_v1, %v1020_v1 }
0x1342   : > { %1359 = vmatmul.mubr.msk.bf16.vlgmr.msra.gmra.mxu1 %vm259_vm2, %v1021_v17  ;;  %vm1102_vm2 = vcmp.eq.s32.totalorder %v1101_v0, 1 }
0x1343   : > { %468 = vrot.lane.b32.xlu1 %v466_v11, %s1488_s24 }
0x1347   : > { %686 = vrot.lane.b32.xlu1 %v684_v4, %s1488_s24 }
0x134b   : > { %904 = vrot.lane.b32.xlu1 %v902_v6, %s1488_s24 }
0x13b1   : > { %v1112_v2 = vpop.permute.xlu1 %1111 }
0x13b5   : > { %v469_v55 = vpop.permute.xlu1 %468 }
0x13b6   : > { %1244 = vst.msk [vmem:[%s1778_s30 + $0x2] sm:$0x3] %vm235_vm0, %v469_v55 }
0x13b9   : > { %v687_v5 = vpop.permute.xlu1 %686 }
0x13ba   : > { %1252 = vst.msk [vmem:[%s1778_s30 + $0x6] sm:$0x3] %vm235_vm0, %v687_v5 }
0x13bd   : > { %v905_v61 = vpop.permute.xlu1 %904 }
0x13be   : > { %1260 = vst.msk [vmem:[%s1778_s30 + $0xa] sm:$0x3] %vm235_vm0, %v905_v61 }
0x1402   : > { %v1059_v8 = vpop.f32.mrf.mxu1 }
0x1403   : > { %v1065_v9 = vadd.f32 %v1265_v13, %v1059_v8 }
0x1404   : > { %v1360_v10 = vpop.f32.mrf.mxu1 }
0x1405   : > { %1452 = vtanh.f32 %v1065_v9  ;;  %v1267_v16 = vmul.f32 -1.442695, %v1065_v9 }
0x1406   : > { %v1062_v12 = vpop.f32.mrf.mxu1 }
0x1407   : > { %1454 = vpow2.f32 %v1267_v16 }
0x1408   : > { %v1361_v14 = vpop.f32.mrf.mxu1 }
0x1412   : > { %v1453_v15 = vpop.eup %1452 }
0x1413   : > { %1080 = vrot.lane.b32.xlu0 %v1453_v15, %s1487_s23 }
0x1414   : > { %v1455_v18 = vpop.eup %1454 }
0x1415   : > { %v1069_v19 = vadd.f32 1.0, %v1455_v18 }
0x1417   : > { %1456 = vrcp.f32 %v1069_v19 }
0x1424   : > { %v1457_v20 = vpop.eup %1456 }
0x1425   : > { %v1078_v23 = vmul.f32 %v1457_v20, %v1076_v7 }
0x1485   : > { %v1081_v21 = vpop.permute.xlu0 %1080 }
0x1486   : > { %v1083_v22 = vmul.f32 %v1457_v20, %v1081_v21 }
0x1488   : > { %1085 = vrot.lane.b32.xlu0 %v1083_v22, %s1488_s24 }
0x14fa   : > { %v1086_v24 = vpop.permute.xlu0 %1085 }
0x14fb   : > { %v1088_v25 = vadd.f32 %v1086_v24, %v1078_v23 }
0x14fd   : > { %1458 = vtanh.f32 %v1088_v25  ;;  %v1103_v26 = vsel %vm1102_vm2, %v1088_v25, %v1076_v7 }
0x14fe   : > { %1105 = vrot.lane.b32.xlu1 %v1103_v26, %s1489_s27 }
0x150a   : > { %v1459_v29 = vpop.eup %1458 }
0x150b   : > { %1091 = vrot.lane.b32.xlu0 %v1459_v29, %s1487_s23 }
0x150f   : > { %360 = vrot.lane.b32.xlu0 %v358_v30, %s1488_s24 }
0x1513   : > { %577 = vrot.lane.b32.xlu0 %v575_v31, %s1488_s24 }
0x1517   : > { %795 = vrot.lane.b32.xlu0 %v793_v32, %s1488_s24 }
0x151b   : > { %1013 = vrot.lane.b32.xlu0 %v1011_v27, %s1488_s24 }
0x1570   : > { %v1106_v33 = vpop.permute.xlu1 %1105 }
0x1571   : > { %1108 = vst.msk [vmem:[#allocation3] sm:$0x3] %vm235_vm0, %v1106_v33 }
0x157d   : > { %v1092_v28 = vpop.permute.xlu0 %1091 }
0x157e   : > { %v1094_v40 = vmul.f32 %v1457_v20, %v1092_v28 }
0x1580   : > { %v1120_v34 = vsel %vm1102_vm2, %v1094_v40, 0.0  ;;  %v1114_v37 = vsel %vm1102_vm2, %v1094_v40, %v1112_v2 }
0x1581   : > { %1122 = vrot.lane.b32.xlu1 %v1120_v34, %s1488_s24  ;;  %1116 = vrot.lane.b32.xlu0 %v1114_v37, %s1488_s24  ;;  %v361_v49 = vpop.permute.xlu0 %360 }
0x1582   : > { %363 = vst.msk [vmem:[%s1778_s30] sm:$0x3] %vm235_vm0, %v361_v49 }
0x1585   : > { %v578_v35 = vpop.permute.xlu0 %577 }
0x1586   : > { %1248 = vst.msk [vmem:[%s1778_s30 + $0x4] sm:$0x3] %vm235_vm0, %v578_v35 }
0x1589   : > { %v796_v36 = vpop.permute.xlu0 %795 }
0x158a   : > { %1256 = vst.msk [vmem:[%s1778_s30 + $0x8] sm:$0x3] %vm235_vm0, %v796_v36 }
0x158d   : > { %v1014_v38 = vpop.permute.xlu0 %1013 }
0x158e   : > { %1264 = vst.msk [vmem:[%s1778_s30 + $0xc] sm:$0x3] %vm235_vm0, %v1014_v38 }
0x15f3   : > { %v1123_v39 = vpop.permute.xlu1 %1122  ;;  %v1117_v41 = vpop.permute.xlu0 %1116 }
0x15f4   : > { %1268 = vst.msk [vmem:[%s1778_s30 + $0xe] sm:$0x3] %vm235_vm0, %v1123_v39  ;;  %1119 = vst.msk [vmem:[#allocation2] sm:$0x3] %vm235_vm0, %v1117_v41 }
0x15f5 PF: > { %s13_s14 = sadd.s32 1, %s1482_s14   ;;  %s1836_s12 = smov %s1478_s13 }
0x15f6   : > { %p10_p5 = scmp.ge.s32.totalorder %s13_s14, 4   ;;  %s1837_s13 = smov %s1839_s15 }
0x15f8   :  { %12 = sbr.rel (!%p10_p5) target bundleno = 2 (0x2), region = 83 }

// kernel: _encoder_core.19
= control target key start
LH: loop header
LB: loop body
LE: loop exit
PB: predicated region body
PF: predicated region fallthrough
CT: control target
= control target key end

     0   :  { %v288_v0 = vmov 0   ;;  %vm150_vm0 = vcmask 523264   ;;  %v50_v24 = vlaneseq  ;;  %s391_s2 = inlined_call_operand.vmem [shape: f32[8,1], index: 2, kind: input, shape index: {}]   ;;  %s392_s3 = inlined_call_operand.vmem [shape: bf16[64,512], index: 3, kind: input, shape index: {}]   ;;  %s393_s0 = inlined_call_operand.vmem [shape: f32[8,64], index: 0, kind: input, shape index: {}]   ;;  %s394_s1 = inlined_call_operand.vmem [shape: f32[8,64], index: 1, kind: input, shape index: {}]   ;;  %s395_s4 = inlined_call_operand.vmem [shape: f32[1,512], index: 4, kind: input, shape index: {}]   ;;  %s396_s5 = inlined_call_operand.vmem [shape: f32[8,512], index: 5, kind: output, shape index: {}]  }
   0x1   :  { %263 = vset.pattern.permute.xlu0 %v288_v0  ;;  %v24_v1 = vld [vmem:[%s391_s2] sm:$0xff]  ;;  %186 = vmatprep.mubr.bf16.mxu0 %v288_v0  ;;  %v266_v3 = vld [vmem:[%s392_s3 + $0x6c] ss:$16 sps:$4 sm:$0xff]   ;;  %v269_v5 = vld [vmem:[%s392_s3 + $0x68] ss:$16 sps:$4 sm:$0xff]  }
   0x2   :  { %27 = vperm.xlu0 %263, %v24_v1   ;;  %v264_v2 = vld [vmem:[%s392_s3 + $0x64] ss:$16 sps:$4 sm:$0xff]   ;;  %227 = vmatprep.mubr.bf16.mxu1 %v288_v0  ;;  %v268_v4 = vld [vmem:[%s392_s3 + $0x60] ss:$16 sps:$4 sm:$0xff]   ;;  %v272_v7 = vld [vmem:[%s392_s3 + $0x4c] ss:$16 sps:$4 sm:$0xff]  }
   0x3   :  { %162 = vmatprep.subr.bf16.mxu0 %v264_v2  ;;  %v270_v6 = vld [vmem:[%s392_s3 + $0x44] ss:$16 sps:$4 sm:$0xff]   ;;  %203 = vmatprep.subr.bf16.mxu1 %v266_v3  ;;  %v274_v8 = vld [vmem:[%s392_s3 + $0x40] ss:$16 sps:$4 sm:$0xff]   ;;  %v275_v9 = vld [vmem:[%s392_s3 + $0x48] ss:$16 sps:$4 sm:$0xff]  }
   0x4   :  { %163 = vmatpush1.bf16.msra.mxu0 %v268_v4  ;;  %204 = vmatpush1.bf16.msra.mxu1 %v269_v5  ;;  %v276_v10 = vld [vmem:[%s392_s3 + $0x24] ss:$16 sps:$4 sm:$0xff]   ;;  %v278_v11 = vld [vmem:[%s392_s3 + $0x2c] ss:$16 sps:$4 sm:$0xff]   ;;  %v280_v12 = vld [vmem:[%s392_s3 + $0x20] ss:$16 sps:$4 sm:$0xff]  }
   0x5   :  { %164 = vmatprep.subr.bf16.mxu0 %v270_v6  ;;  %205 = vmatprep.subr.bf16.mxu1 %v272_v7  ;;  %v281_v13 = vld [vmem:[%s392_s3 + $0x28] ss:$16 sps:$4 sm:$0xff]   ;;  %v282_v14 = vld [vmem:[%s392_s3 + $0x4] ss:$16 sps:$4 sm:$0xff]   ;;  %v284_v15 = vld [vmem:[%s392_s3 + $0xc] ss:$16 sps:$4 sm:$0xff]  }
   0x6   :  { %v286_v16 = vld [vmem:[%s392_s3] ss:$16 sps:$4 sm:$0xff]   ;;  %v287_v17 = vld [vmem:[%s392_s3 + $0x8] ss:$16 sps:$4 sm:$0xff]   ;;  %v51_v25 = vshrl.u32 %v50_v24, 7 }
   0x7   :  { %v21_v18 = vld [vmem:[%s393_s0] sm:$0xff] }
   0x8   :  { %165 = vmatpush1.bf16.msra.mxu0 %v274_v8  ;;  %206 = vmatpush1.bf16.msra.mxu1 %v275_v9  ;;  %v22_v19 = vld [vmem:[%s394_s1] sm:$0xff]  ;;  %v52_v26 = vsub.s32 0, %v51_v25  ;;  %v60_v27 = vsub.s32 2, %v51_v25  ;;  %v56_v29 = vsub.s32 1, %v51_v25  ;;  %v64_v30 = vsub.s32 3, %v51_v25 }
   0x9   :  { %166 = vmatprep.subr.bf16.mxu0 %v276_v10  ;;  %207 = vmatprep.subr.bf16.mxu1 %v278_v11  ;;  %v23_v20 = vmax.f32 %v21_v18, %v22_v19  ;;  %v48_v28 = vld [vmem:[%s395_s4] sm:$0xf] }
   0xa   :  { %v53_v31 = vrot.slane %v48_v28, %v52_v26  ;;  %v61_v32 = vrot.slane %v48_v28, %v60_v27  ;;  %v57_v33 = vrot.slane %v48_v28, %v56_v29  ;;  %v65_v34 = vrot.slane %v48_v28, %v64_v30 }
   0xc   :  { %167 = vmatpush1.bf16.msra.mxu0 %v280_v12  ;;  %208 = vmatpush1.bf16.msra.mxu1 %v281_v13 }
   0xd   :  { %168 = vmatprep.subr.bf16.mxu0 %v282_v14  ;;  %209 = vmatprep.subr.bf16.mxu1 %v284_v15 }
  0x10   :  { %169 = vmatpush1.bf16.msra.mxu0 %v286_v16  ;;  %210 = vmatpush1.bf16.msra.mxu1 %v287_v17 }
  0x7d   :  { %v28_v21 = vpop.permute.xlu0 %27 }
  0x7e   :  { %v30_v22 = vmul.f32 %v28_v21, %v23_v20 }
  0x80   :  { %v31_v23 = vpack.c.bf16 %v30_v22, %v30_v22 }
  0x82   :  { %260 = vmatmul.mubr.msk.bf16.vlgmr.msra.gmra.mxu0 %vm150_vm0, %v31_v23  ;;  %261 = vmatmul.mubr.msk.bf16.vlgmr.msra.gmra.mxu1 %vm150_vm0, %v31_v23 }
 0x142   :  { %v188_v35 = vpop.f32.mrf.mxu0  ;;  %v229_v36 = vpop.f32.mrf.mxu1 }
 0x143   :  { %v189_v37 = vadd.f32 %v188_v35, %v53_v31  ;;  %v230_v38 = vadd.f32 %v229_v36, %v61_v32 }
 0x144   :  { %v190_v39 = vpop.f32.mrf.mxu0  ;;  %v231_v40 = vpop.f32.mrf.mxu1 }
 0x145   :  { %236 = vst [vmem:[%s396_s5] sm:$0xff] %v189_v37  ;;  %238 = vst [vmem:[%s396_s5 + $0x10] sm:$0xff] %v230_v38  ;;  %v191_v41 = vadd.f32 %v190_v39, %v57_v33  ;;  %v232_v42 = vadd.f32 %v231_v40, %v65_v34 }
 0x146   :  { %v192_v43 = vpop.f32.mrf.mxu0  ;;  %v233_v44 = vpop.f32.mrf.mxu1 }
 0x147   :  { %237 = vst [vmem:[%s396_s5 + $0x8] sm:$0xff] %v191_v41  ;;  %239 = vst [vmem:[%s396_s5 + $0x18] sm:$0xff] %v232_v42 }
 0x148   :  { %v193_v45 = vpop.f32.mrf.mxu0  ;;  %v234_v46 = vpop.f32.mrf.mxu1 }

</bundles_post_ra>
